<compile_context>
chip_gen: v6e
topology: v6e:2x2x1
jax: 0.10.0
libtpu: 0.0.40
codegen_flags: <defaults>
</compile_context>

<pallas_src>
import jax
import jax.numpy as jnp
from jax.experimental import pallas as pl
from jax.experimental.pallas import tpu as pltpu

# ----------------------------- configuration -------------------------------
N_BATCH    = 2          # N
C_NODES    = 19         # graph nodes (channels of the CNN output)
H = W      = 16         # spatial dims -> feature dim D = H*W (2116 in the original)
D_FEAT     = H * W      # GatedGraphConv out_channels
GNN_LAYERS = 2          # len(self.gnn_layers); only the last one affects the output
NUM_PROP   = 2          # GatedGraphConv(..., num_layers=2) internal propagation steps


# ------------------------------ Pallas kernel -------------------------------
def ggnn_kernel(x_ref, adj_ref, w_ref, gruw_ref, b_ref, out_ref, lhs_ref):
    """All samples at once.

    x_ref    : (M, D)  f32   node features, M = N*C
    adj_ref  : (M, M)  f32   block-diagonal adjacency (A[dst, src] = edge count)
    w_ref    : (NUM_PROP, D, D) bf16   propagation weights
    gruw_ref : (2D, 4D) bf16  fused GRU weight  [[Wih_rz, Wih_n, 0], [Whh_rz, 0, Whh_n]]
    b_ref    : (1, 4D) f32    packed biases [b_ih_rz + b_hh_rz | b_ih_n | b_hh_n]
    lhs_ref  : (M, 2D) bf16   scratch holding [agg | x] for the fused GRU matmul
    """
    d = x_ref.shape[1]
    x = x_ref[...]                        # (M, D) f32 hidden state (carried)
    adj = adj_ref[...]                    # (M, M) f32

    for l in range(NUM_PROP):             # small compile-time constant -> static unroll
        # message transform on the MXU (bf16 inputs, f32 accumulation)
        m = jnp.dot(x.astype(jnp.bfloat16), w_ref[l],
                    preferred_element_type=jnp.float32)              # (M, D)
        # scatter-add aggregation over edges == block-diagonal A @ m
        agg = jnp.dot(adj, m, preferred_element_type=jnp.float32)    # (M, D)

        # fused GRU matmul: one K=2D contraction instead of two K=D matmuls
        lhs_ref[:, 0:d] = agg.astype(jnp.bfloat16)
        lhs_ref[:, d:2 * d] = x.astype(jnp.bfloat16)
        g = jnp.dot(lhs_ref[...], gruw_ref[...],
                    preferred_element_type=jnp.float32)              # (M, 4D)
        g = g + b_ref[...]                # broadcast packed biases

        # gate slabs: [0:2D]=gi+gh for r,z ; [2D:3D]=gi_n ; [3D:4D]=gh_n (128-aligned)
        r = jax.nn.sigmoid(g[:, 0:d])
        z = jax.nn.sigmoid(g[:, d:2 * d])
        n = jnp.tanh(g[:, 2 * d:3 * d] + r * g[:, 3 * d:4 * d])
        x = n + z * (x - n)               # == (1 - z) * n + z * x

    out_ref[...] = x


def model_gnn_forward(cnn_output, adj, w, wih_t, whh_t, bih, bhh):
    """cnn_output: (N, C, H, W) f32 -> (N, C, H, W) f32."""
    n, c, h, w_sp = cnn_output.shape
    d = h * w_sp
    m_rows = n * c

    # (N, C, H, W) -> (N*C, D): pure view, no transpose.
    x = cnn_output.reshape(m_rows, d).astype(jnp.float32)

    # Block-diagonal adjacency: every sample shares the same edge_index.
    adj_bd = jnp.kron(jnp.eye(n, dtype=jnp.float32), adj.astype(jnp.float32))

    # Fused GRU weight (2D, 4D):
    #   [[Wih_rz, Wih_n, 0    ],
    #    [Whh_rz, 0,     Whh_n]]
    zeros = jnp.zeros((d, d), jnp.float32)
    top = jnp.concatenate([wih_t[:, 0:2 * d], wih_t[:, 2 * d:3 * d], zeros], axis=1)
    bot = jnp.concatenate([whh_t[:, 0:2 * d], zeros, whh_t[:, 2 * d:3 * d]], axis=1)
    gru_w = jnp.concatenate([top, bot], axis=0).astype(jnp.bfloat16)          # (2D, 4D)

    # Packed biases: [b_ih_rz + b_hh_rz | b_ih_n | b_hh_n]  -> (1, 4D) f32
    b_packed = jnp.concatenate(
        [bih[:, 0:2 * d] + bhh[:, 0:2 * d], bih[:, 2 * d:3 * d], bhh[:, 2 * d:3 * d]],
        axis=1)

    w_bf16 = w.astype(jnp.bfloat16)                                           # (P, D, D)

    flops = NUM_PROP * (2 * m_rows * d * d
                        + 2 * m_rows * m_rows * d
                        + 2 * m_rows * (2 * d) * (4 * d))
    transcendentals = NUM_PROP * m_rows * 3 * d
    bytes_accessed = (NUM_PROP * d * d * 2        # propagation weights (bf16)
                      + (2 * d) * (4 * d) * 2     # fused GRU weight (bf16)
                      + 4 * d * 4                 # packed bias
                      + m_rows * m_rows * 4       # adjacency
                      + 2 * m_rows * d * 4)       # x in + out

    out = pl.pallas_call(
        ggnn_kernel,
        out_shape=jax.ShapeDtypeStruct((m_rows, d), jnp.float32),
        in_specs=[pl.BlockSpec(memory_space=pltpu.MemorySpace.VMEM)] * 5,
        out_specs=pl.BlockSpec(memory_space=pltpu.MemorySpace.VMEM),
        scratch_shapes=[pltpu.VMEM((m_rows, 2 * d), jnp.bfloat16)],
        compiler_params=pltpu.CompilerParams(vmem_limit_bytes=64 * 1024 * 1024),
        cost_estimate=pl.CostEstimate(flops=flops,
                                      transcendentals=transcendentals,
                                      bytes_accessed=bytes_accessed),
    )(x, adj_bd, w_bf16, gru_w, b_packed)

    return out.reshape(n, c, h, w_sp)


# ------------------------------ JAX reference --------------------------------
def ggnn_reference(x, adj, w, wih_t, whh_t, bih, bhh):
    """Pure-JAX GatedGraphConv for one sample (same bf16 matmul inputs as the kernel)."""
    d = x.shape[1]
    for l in range(NUM_PROP):
        m = jnp.dot(x.astype(jnp.bfloat16), w[l].astype(jnp.bfloat16),
                    preferred_element_type=jnp.float32)
        agg = jnp.dot(adj, m, preferred_element_type=jnp.float32)
        gi = jnp.dot(agg.astype(jnp.bfloat16), wih_t.astype(jnp.bfloat16),
                     preferred_element_type=jnp.float32) + bih
        gh = jnp.dot(x.astype(jnp.bfloat16), whh_t.astype(jnp.bfloat16),
                     preferred_element_type=jnp.float32) + bhh
        r = jax.nn.sigmoid(gi[:, :d] + gh[:, :d])
        z = jax.nn.sigmoid(gi[:, d:2 * d] + gh[:, d:2 * d])
        n_ = jnp.tanh(gi[:, 2 * d:] + r * gh[:, 2 * d:])
        x = n_ + z * (x - n_)
    return x


# ------------------------------ parameter setup -------------------------------
def make_params():
    d = D_FEAT
    key = jax.random.PRNGKey(42)
    keys = jax.random.split(key, 1 + GNN_LAYERS * 5)

    # Deterministic synthetic edge_index for 19 nodes: bidirectional chain + skips.
    src, dst = [], []
    for i in range(C_NODES - 1):
        src += [i, i + 1]
        dst += [i + 1, i]
    for i in range(0, C_NODES - 3, 3):
        src += [i, i + 3]
        dst += [i + 3, i]
    src = jnp.array(src, dtype=jnp.int32)
    dst = jnp.array(dst, dtype=jnp.int32)
    adj = jnp.zeros((C_NODES, C_NODES), jnp.float32).at[dst, src].add(1.0)

    # Per-GatedGraphConv parameters; only the last layer's are used (matches PyTorch loop).
    scale = 0.05
    layer_params = []
    for l in range(GNN_LAYERS):
        k = keys[1 + 5 * l: 1 + 5 * (l + 1)]
        w_prop = scale * jax.random.normal(k[0], (NUM_PROP, d, d), jnp.float32)
        # torch GRUCell: weight_ih (3D, D), weight_hh (3D, D); pre-transposed to (D, 3D).
        wih_t = scale * jax.random.normal(k[1], (d, 3 * d), jnp.float32)
        whh_t = scale * jax.random.normal(k[2], (d, 3 * d), jnp.float32)
        bih = scale * jax.random.normal(k[3], (3 * d,), jnp.float32).reshape(1, 3 * d)
        bhh = scale * jax.random.normal(k[4], (3 * d,), jnp.float32).reshape(1, 3 * d)
        layer_params.append((w_prop, wih_t, whh_t, bih, bhh))

    return adj, layer_params


# ------------------------------------ main ------------------------------------
if __name__ == "__main__":
    adj, layer_params = make_params()
    # Only the last GatedGraphConv's output is kept by the original forward loop.
    w_prop, wih_t, whh_t, bih, bhh = layer_params[-1]

    key = jax.random.PRNGKey(0)
    cnn_output = jax.random.normal(key, (N_BATCH, C_NODES, H, W), jnp.float32)

    fwd = jax.jit(model_gnn_forward)
    out = fwd(cnn_output, adj, w_prop, wih_t, whh_t, bih, bhh)
    out = jax.block_until_ready(out)
    assert out.shape == (N_BATCH, C_NODES, H, W)

    # Correctness check against a pure-JAX reference (same bf16 weight quantization).
    x_flat = cnn_output.reshape(N_BATCH, C_NODES, H * W)
    ref = jnp.stack(
        [ggnn_reference(x_flat[n], adj, w_prop, wih_t, whh_t, bih, bhh)
         for n in range(N_BATCH)]
    ).reshape(N_BATCH, C_NODES, H, W)
    assert jnp.allclose(out, ref, atol=1e-2, rtol=1e-2), \
        float(jnp.max(jnp.abs(out - ref)))

    print("KERNEL_OK")
</pallas_src>

<mosaic_0001>
module attributes {stable_mosaic.version = 11 : i64} {
  func.func @ggnn_kernel(%arg0: memref<38x256xf32, #tpu.memory_space<vmem>>, %arg1: memref<38x38xf32, #tpu.memory_space<vmem>>, %arg2: memref<2x256x256xbf16, #tpu.memory_space<vmem>>, %arg3: memref<512x1024xbf16, #tpu.memory_space<vmem>>, %arg4: memref<1x1024xf32, #tpu.memory_space<vmem>>, %arg5: memref<38x256xf32, #tpu.memory_space<vmem>>, %arg6: memref<38x512xbf16, #tpu.memory_space<vmem>>) attributes {dimension_semantics = [], scalar_prefetch = 0 : i64, scratch_operands = 1 : i64, tpu.core_type = #tpu.core_type<tc>} {
    %c0 = arith.constant 0 : index
    %c0_0 = arith.constant 0 : index
    %0 = vector.load %arg0[%c0, %c0_0] : memref<38x256xf32, #tpu.memory_space<vmem>>, vector<38x256xf32>
    %c0_1 = arith.constant 0 : index
    %c0_2 = arith.constant 0 : index
    %1 = vector.load %arg1[%c0_1, %c0_2] : memref<38x38xf32, #tpu.memory_space<vmem>>, vector<38x38xf32>
    %2 = arith.truncf %0 : vector<38x256xf32> to vector<38x256xbf16>
    %c0_3 = arith.constant 0 : index
    %c0_4 = arith.constant 0 : index
    %c0_5 = arith.constant 0 : index
    %3 = vector.load %arg2[%c0_3, %c0_4, %c0_5] : memref<2x256x256xbf16, #tpu.memory_space<vmem>>, vector<1x256x256xbf16>
    %4 = vector.shape_cast %3 : vector<1x256x256xbf16> to vector<256x256xbf16>
    %cst = arith.constant dense<0.000000e+00> : vector<38x256xf32>
    %5 = tpu.matmul %2, %4, %cst {dimension_numbers = #tpu.dot_dimension_numbers<[1], [0], [0], [1], [0, 0, 1, 1], [], []>} : vector<38x256xbf16>, vector<256x256xbf16>, vector<38x256xf32> -> vector<38x256xf32>
    %cst_6 = arith.constant dense<0.000000e+00> : vector<38x256xf32>
    %6 = tpu.matmul %1, %5, %cst_6 {dimension_numbers = #tpu.dot_dimension_numbers<[1], [0], [0], [1], [0, 0, 1, 1], [], []>} : vector<38x38xf32>, vector<38x256xf32>, vector<38x256xf32> -> vector<38x256xf32>
    %7 = arith.truncf %6 : vector<38x256xf32> to vector<38x256xbf16>
    %c0_7 = arith.constant 0 : index
    %c0_8 = arith.constant 0 : index
    %8 = vector.load %arg6[%c0_7, %c0_8] : memref<38x512xbf16, #tpu.memory_space<vmem>>, vector<38x256xbf16>
    tpu.vector_store %arg6[%c0_7, %c0_8], %7 {strides = array<i32>} : memref<38x512xbf16, #tpu.memory_space<vmem>>, vector<38x256xbf16>,
    %9 = arith.truncf %0 : vector<38x256xf32> to vector<38x256xbf16>
    %c0_9 = arith.constant 0 : index
    %c256 = arith.constant 256 : index
    %10 = vector.load %arg6[%c0_9, %c256] : memref<38x512xbf16, #tpu.memory_space<vmem>>, vector<38x256xbf16>
    tpu.vector_store %arg6[%c0_9, %c256], %9 {strides = array<i32>} : memref<38x512xbf16, #tpu.memory_space<vmem>>, vector<38x256xbf16>,
    %c0_10 = arith.constant 0 : index
    %c0_11 = arith.constant 0 : index
    %11 = vector.load %arg6[%c0_10, %c0_11] : memref<38x512xbf16, #tpu.memory_space<vmem>>, vector<38x512xbf16>
    %c0_12 = arith.constant 0 : index
    %c0_13 = arith.constant 0 : index
    %12 = vector.load %arg3[%c0_12, %c0_13] : memref<512x1024xbf16, #tpu.memory_space<vmem>>, vector<512x1024xbf16>
    %cst_14 = arith.constant dense<0.000000e+00> : vector<38x1024xf32>
    %13 = tpu.matmul %11, %12, %cst_14 {dimension_numbers = #tpu.dot_dimension_numbers<[1], [0], [0], [1], [0, 0, 1, 1], [], []>} : vector<38x512xbf16>, vector<512x1024xbf16>, vector<38x1024xf32> -> vector<38x1024xf32>
    %c0_15 = arith.constant 0 : index
    %c0_16 = arith.constant 0 : index
    %14 = vector.load %arg4[%c0_15, %c0_16] : memref<1x1024xf32, #tpu.memory_space<vmem>>, vector<1x1024xf32>
    %15 = vector.broadcast %14 : vector<1x1024xf32> to vector<38x1024xf32>
    %16 = arith.addf %13, %15 : vector<38x1024xf32>
    %17 = vector.extract_strided_slice %16 {offsets = [0, 0], sizes = [38, 256], strides = [1, 1]} : vector<38x1024xf32> to vector<38x256xf32>
    %18 = arith.negf %17 : vector<38x256xf32>
    %19 = math.exp %18 : vector<38x256xf32>
    %cst_17 = arith.constant 1.000000e+00 : f32
    %20 = vector.broadcast %cst_17 : f32 to vector<38x256xf32>
    %21 = arith.addf %20, %19 : vector<38x256xf32>
    %22 = arith.divf %20, %21 : vector<38x256xf32>
    %23 = vector.extract_strided_slice %16 {offsets = [0, 256], sizes = [38, 256], strides = [1, 1]} : vector<38x1024xf32> to vector<38x256xf32>
    %24 = arith.negf %23 : vector<38x256xf32>
    %25 = math.exp %24 : vector<38x256xf32>
    %cst_18 = arith.constant 1.000000e+00 : f32
    %26 = vector.broadcast %cst_18 : f32 to vector<38x256xf32>
    %27 = arith.addf %26, %25 : vector<38x256xf32>
    %28 = arith.divf %26, %27 : vector<38x256xf32>
    %29 = vector.extract_strided_slice %16 {offsets = [0, 512], sizes = [38, 256], strides = [1, 1]} : vector<38x1024xf32> to vector<38x256xf32>
    %30 = vector.extract_strided_slice %16 {offsets = [0, 768], sizes = [38, 256], strides = [1, 1]} : vector<38x1024xf32> to vector<38x256xf32>
    %31 = arith.mulf %22, %30 : vector<38x256xf32>
    %32 = arith.addf %29, %31 : vector<38x256xf32>
    %33 = math.tanh %32 : vector<38x256xf32>
    %34 = arith.subf %0, %33 : vector<38x256xf32>
    %35 = arith.mulf %28, %34 : vector<38x256xf32>
    %36 = arith.addf %33, %35 : vector<38x256xf32>
    %37 = arith.truncf %36 : vector<38x256xf32> to vector<38x256xbf16>
    %c1 = arith.constant 1 : index
    %c0_19 = arith.constant 0 : index
    %c0_20 = arith.constant 0 : index
    %38 = vector.load %arg2[%c1, %c0_19, %c0_20] : memref<2x256x256xbf16, #tpu.memory_space<vmem>>, vector<1x256x256xbf16>
    %39 = vector.shape_cast %38 : vector<1x256x256xbf16> to vector<256x256xbf16>
    %cst_21 = arith.constant dense<0.000000e+00> : vector<38x256xf32>
    %40 = tpu.matmul %37, %39, %cst_21 {dimension_numbers = #tpu.dot_dimension_numbers<[1], [0], [0], [1], [0, 0, 1, 1], [], []>} : vector<38x256xbf16>, vector<256x256xbf16>, vector<38x256xf32> -> vector<38x256xf32>
    %cst_22 = arith.constant dense<0.000000e+00> : vector<38x256xf32>
    %41 = tpu.matmul %1, %40, %cst_22 {dimension_numbers = #tpu.dot_dimension_numbers<[1], [0], [0], [1], [0, 0, 1, 1], [], []>} : vector<38x38xf32>, vector<38x256xf32>, vector<38x256xf32> -> vector<38x256xf32>
    %42 = arith.truncf %41 : vector<38x256xf32> to vector<38x256xbf16>
    %c0_23 = arith.constant 0 : index
    %c0_24 = arith.constant 0 : index
    %43 = vector.load %arg6[%c0_23, %c0_24] : memref<38x512xbf16, #tpu.memory_space<vmem>>, vector<38x256xbf16>
    tpu.vector_store %arg6[%c0_23, %c0_24], %42 {strides = array<i32>} : memref<38x512xbf16, #tpu.memory_space<vmem>>, vector<38x256xbf16>,
    %44 = arith.truncf %36 : vector<38x256xf32> to vector<38x256xbf16>
    %c0_25 = arith.constant 0 : index
    %c256_26 = arith.constant 256 : index
    %45 = vector.load %arg6[%c0_25, %c256_26] : memref<38x512xbf16, #tpu.memory_space<vmem>>, vector<38x256xbf16>
    tpu.vector_store %arg6[%c0_25, %c256_26], %44 {strides = array<i32>} : memref<38x512xbf16, #tpu.memory_space<vmem>>, vector<38x256xbf16>,
    %c0_27 = arith.constant 0 : index
    %c0_28 = arith.constant 0 : index
    %46 = vector.load %arg6[%c0_27, %c0_28] : memref<38x512xbf16, #tpu.memory_space<vmem>>, vector<38x512xbf16>
    %c0_29 = arith.constant 0 : index
    %c0_30 = arith.constant 0 : index
    %47 = vector.load %arg3[%c0_29, %c0_30] : memref<512x1024xbf16, #tpu.memory_space<vmem>>, vector<512x1024xbf16>
    %cst_31 = arith.constant dense<0.000000e+00> : vector<38x1024xf32>
    %48 = tpu.matmul %46, %47, %cst_31 {dimension_numbers = #tpu.dot_dimension_numbers<[1], [0], [0], [1], [0, 0, 1, 1], [], []>} : vector<38x512xbf16>, vector<512x1024xbf16>, vector<38x1024xf32> -> vector<38x1024xf32>
    %c0_32 = arith.constant 0 : index
    %c0_33 = arith.constant 0 : index
    %49 = vector.load %arg4[%c0_32, %c0_33] : memref<1x1024xf32, #tpu.memory_space<vmem>>, vector<1x1024xf32>
    %50 = vector.broadcast %49 : vector<1x1024xf32> to vector<38x1024xf32>
    %51 = arith.addf %48, %50 : vector<38x1024xf32>
    %52 = vector.extract_strided_slice %51 {offsets = [0, 0], sizes = [38, 256], strides = [1, 1]} : vector<38x1024xf32> to vector<38x256xf32>
    %53 = arith.negf %52 : vector<38x256xf32>
    %54 = math.exp %53 : vector<38x256xf32>
    %cst_34 = arith.constant 1.000000e+00 : f32
    %55 = vector.broadcast %cst_34 : f32 to vector<38x256xf32>
    %56 = arith.addf %55, %54 : vector<38x256xf32>
    %57 = arith.divf %55, %56 : vector<38x256xf32>
    %58 = vector.extract_strided_slice %51 {offsets = [0, 256], sizes = [38, 256], strides = [1, 1]} : vector<38x1024xf32> to vector<38x256xf32>
    %59 = arith.negf %58 : vector<38x256xf32>
    %60 = math.exp %59 : vector<38x256xf32>
    %cst_35 = arith.constant 1.000000e+00 : f32
    %61 = vector.broadcast %cst_35 : f32 to vector<38x256xf32>
    %62 = arith.addf %61, %60 : vector<38x256xf32>
    %63 = arith.divf %61, %62 : vector<38x256xf32>
    %64 = vector.extract_strided_slice %51 {offsets = [0, 512], sizes = [38, 256], strides = [1, 1]} : vector<38x1024xf32> to vector<38x256xf32>
    %65 = vector.extract_strided_slice %51 {offsets = [0, 768], sizes = [38, 256], strides = [1, 1]} : vector<38x1024xf32> to vector<38x256xf32>
    %66 = arith.mulf %57, %65 : vector<38x256xf32>
    %67 = arith.addf %64, %66 : vector<38x256xf32>
    %68 = math.tanh %67 : vector<38x256xf32>
    %69 = arith.subf %36, %68 : vector<38x256xf32>
    %70 = arith.mulf %63, %69 : vector<38x256xf32>
    %71 = arith.addf %68, %70 : vector<38x256xf32>
    %c0_36 = arith.constant 0 : index
    %c0_37 = arith.constant 0 : index
    %72 = vector.load %arg5[%c0_36, %c0_37] : memref<38x256xf32, #tpu.memory_space<vmem>>, vector<38x256xf32>
    tpu.vector_store %arg5[%c0_36, %c0_37], %71 {strides = array<i32>} : memref<38x256xf32, #tpu.memory_space<vmem>>, vector<38x256xf32>,
    return
  }
}

</mosaic_0001>

<bundles_post_ra>
// kernel: model_gnn_forward.1
= control target key start
LH: loop header
LB: loop body
LE: loop exit
PB: predicated region body
PF: predicated region fallthrough
CT: control target
= control target key end

     0   :  { %v9286_v49 = vmov 0.0   ;;  %vm310_vm0 = vcmask 1045504   ;;  %vm294_vm1 = vcmask 310272   ;;  %s9280_s2 = inlined_call_operand.vmem [shape: bf16[2,256,256], index: 2, kind: input, shape index: {}]   ;;  %s9281_s0 = inlined_call_operand.vmem [shape: f32[38,256], index: 0, kind: input, shape index: {}]   ;;  %s9282_s3 = inlined_call_operand.vmem [shape: bf16[512,1024], index: 3, kind: input, shape index: {}]   ;;  %s9283_s1 = inlined_call_operand.vmem [shape: f32[38,38], index: 1, kind: input, shape index: {}]   ;;  %s9284_s4 = inlined_call_operand.vmem [shape: f32[1,1024], index: 4, kind: input, shape index: {}]   ;;  %s9285_s5 = inlined_call_operand.vmem [shape: f32[38,256], index: 5, kind: output, shape index: {}]  }
   0x1   :  { %v6270_v0 = vld [vmem:[%s9280_s2 + $0x74] ss:$8 sps:$4 sm:$0xff]   ;;  %v6272_v1 = vld [vmem:[%s9280_s2 + $0x70] ss:$8 sps:$4 sm:$0xff]   ;;  %v6273_v2 = vld [vmem:[%s9280_s2 + $0x64] ss:$8 sps:$4 sm:$0xff]   ;;  %381 = vmatprep.mubr.f32.mxu1 %v9286_v49 }
   0x2   :  { %233 = vmatprep.subr.bf16.mxu0 %v6270_v0  ;;  %v6275_v3 = vld [vmem:[%s9280_s2 + $0x60] ss:$8 sps:$4 sm:$0xff]   ;;  %v6276_v4 = vld [vmem:[%s9280_s2 + $0x54] ss:$8 sps:$4 sm:$0xff]   ;;  %v6278_v5 = vld [vmem:[%s9280_s2 + $0x50] ss:$8 sps:$4 sm:$0xff]  }
   0x3   :  { %234 = vmatpush1.bf16.msra.mxu0 %v6272_v1  ;;  %v6279_v6 = vld [vmem:[%s9280_s2 + $0x44] ss:$8 sps:$4 sm:$0xff]   ;;  %v6281_v7 = vld [vmem:[%s9280_s2 + $0x40] ss:$8 sps:$4 sm:$0xff]   ;;  %v6282_v8 = vld [vmem:[%s9280_s2 + $0x34] ss:$8 sps:$4 sm:$0xff]  }
   0x4   :  { %235 = vmatprep.subr.bf16.mxu0 %v6273_v2  ;;  %v6284_v9 = vld [vmem:[%s9280_s2 + $0x30] ss:$8 sps:$4 sm:$0xff]   ;;  %v6285_v10 = vld [vmem:[%s9280_s2 + $0x24] ss:$8 sps:$4 sm:$0xff]   ;;  %v6287_v11 = vld [vmem:[%s9280_s2 + $0x20] ss:$8 sps:$4 sm:$0xff]  }
   0x5   :  { %v6288_v12 = vld [vmem:[%s9280_s2 + $0x14] ss:$8 sps:$4 sm:$0xff]   ;;  %v21_v13 = vld [vmem:[%s9281_s0 + $0x8] sm:$0xff]  ;;  %v6290_v15 = vld [vmem:[%s9280_s2 + $0x10] ss:$8 sps:$4 sm:$0xff]  }
   0x6   :  { %v23_v14 = vld [vmem:[%s9281_s0 + $0x18] sm:$0xff]  ;;  %v6291_v16 = vld [vmem:[%s9280_s2 + $0x4] ss:$8 sps:$4 sm:$0xff]   ;;  %v6293_v20 = vld [vmem:[%s9280_s2] ss:$8 sps:$4 sm:$0xff]  }
   0x7   :  { %236 = vmatpush1.bf16.msra.mxu0 %v6275_v3  ;;  %v6687_v17 = vpack.c.bf16 %v23_v14, %v21_v13  ;;  %v29_v18 = vld [vmem:[%s9281_s0 + $0x48] sm:$0x3f]  ;;  %v28_v19 = vld [vmem:[%s9281_s0 + $0x40] sm:$0x3f]  ;;  %v6294_v22 = vld [vmem:[%s9280_s2 + $0xf4] ss:$8 sps:$4 sm:$0xff]  }
   0x8   :  { %237 = vmatprep.subr.bf16.mxu0 %v6276_v4  ;;  %v6258_v21 = vpack.c.bf16 %v29_v18, %v28_v19  ;;  %v6296_v23 = vld [vmem:[%s9280_s2 + $0xf0] ss:$8 sps:$4 sm:$0xff]   ;;  %v6297_v24 = vld [vmem:[%s9280_s2 + $0xe4] ss:$8 sps:$4 sm:$0xff]   ;;  %v6299_v25 = vld [vmem:[%s9280_s2 + $0xe0] ss:$8 sps:$4 sm:$0xff]   ;;  %v40_v47 = vpack.c.bf16 %v29_v18, %v29_v18  ;;  %v39_v48 = vpack.c.bf16 %v28_v19, %v28_v19 }
   0x9   :  { %265 = vmatprep.mubr.bf16.mxu0 %v6687_v17  ;;  %v6300_v26 = vld [vmem:[%s9280_s2 + $0xd4] ss:$8 sps:$4 sm:$0xff]   ;;  %v6302_v27 = vld [vmem:[%s9280_s2 + $0xd0] ss:$8 sps:$4 sm:$0xff]   ;;  %v6303_v28 = vld [vmem:[%s9280_s2 + $0xc4] ss:$8 sps:$4 sm:$0xff]  }
   0xa   :  { %479 = vst [vmem:[#allocation2 + $0x28] sm:$0x77] %v6258_v21  ;;  %v6305_v29 = vld [vmem:[%s9280_s2 + $0xc0] ss:$8 sps:$4 sm:$0xff]   ;;  %v6306_v30 = vld [vmem:[%s9280_s2 + $0xb4] ss:$8 sps:$4 sm:$0xff]  }
   0xb   :  { %238 = vmatpush1.bf16.msra.mxu0 %v6278_v5  ;;  %v6308_v31 = vld [vmem:[%s9280_s2 + $0xb0] ss:$8 sps:$4 sm:$0xff]   ;;  %v6309_v32 = vld [vmem:[%s9280_s2 + $0xa4] ss:$8 sps:$4 sm:$0xff]   ;;  %v6311_v33 = vld [vmem:[%s9280_s2 + $0xa0] ss:$8 sps:$4 sm:$0xff]  }
   0xc   :  { %239 = vmatprep.subr.bf16.mxu0 %v6279_v6  ;;  %v6312_v34 = vld [vmem:[%s9280_s2 + $0x94] ss:$8 sps:$4 sm:$0xff]   ;;  %v6314_v35 = vld [vmem:[%s9280_s2 + $0x90] ss:$8 sps:$4 sm:$0xff]   ;;  %v6315_v36 = vld [vmem:[%s9280_s2 + $0x84] ss:$8 sps:$4 sm:$0xff]  }
   0xd   :  { %v6317_v37 = vld [vmem:[%s9280_s2 + $0x80] ss:$8 sps:$4 sm:$0xff]   ;;  %v22_v39 = vld [vmem:[%s9281_s0 + $0x10] sm:$0xff]  ;;  %v27_v41 = vld [vmem:[%s9281_s0 + $0x38] sm:$0xff] }
   0xe   :  { %v20_v38 = vld [vmem:[%s9281_s0] sm:$0xff]  ;;  %v25_v40 = vld [vmem:[%s9281_s0 + $0x28] sm:$0xff]  ;;  %v26_v45 = vld [vmem:[%s9281_s0 + $0x30] sm:$0xff] }
   0xf   :  { %240 = vmatpush1.bf16.msra.mxu0 %v6281_v7  ;;  %v6759_v42 = vpack.c.bf16 %v22_v39, %v20_v38  ;;  %v6761_v43 = vpack.c.bf16 %v27_v41, %v25_v40  ;;  %v24_v44 = vld [vmem:[%s9281_s0 + $0x20] sm:$0xff] }
  0x10   :  { %241 = vmatprep.subr.bf16.mxu0 %v6282_v8  ;;  %v6771_v46 = vpack.c.bf16 %v26_v45, %v24_v44  ;;  %v674_v50 = vld [vmem:[%s9282_s3 + $0x5c0] sm:$0xff] }
  0x11   :  { %v678_v51 = vld [vmem:[%s9282_s3 + $0x5e0] sm:$0xff] }
  0x12   :  { %v5788_v52 = vcombine.low %v674_v50, %v678_v51  ;;  %v5789_v53 = vcombine.high %v674_v50, %v678_v51  ;;  %v666_v54 = vld [vmem:[%s9282_s3 + $0x580] sm:$0xff] }
  0x13   :  { %242 = vmatpush1.bf16.msra.mxu0 %v6284_v9  ;;  %v670_v55 = vld [vmem:[%s9282_s3 + $0x5a0] sm:$0xff] }
  0x14   :  { %243 = vmatprep.subr.bf16.mxu0 %v6285_v10  ;;  %v5781_v56 = vcombine.high %v666_v54, %v670_v55  ;;  %v658_v57 = vld [vmem:[%s9282_s3 + $0x540] sm:$0xff]  ;;  %v5780_v59 = vcombine.low %v666_v54, %v670_v55 }
  0x15   :  { %v662_v58 = vld [vmem:[%s9282_s3 + $0x560] sm:$0xff] }
  0x16   :  { %v5773_v60 = vcombine.high %v658_v57, %v662_v58  ;;  %v650_v61 = vld [vmem:[%s9282_s3 + $0x500] sm:$0xff]  ;;  %v5772_v63 = vcombine.low %v658_v57, %v662_v58 }
  0x17   :  { %244 = vmatpush1.bf16.msra.mxu0 %v6287_v11  ;;  %v654_v62 = vld [vmem:[%s9282_s3 + $0x520] sm:$0xff] }
  0x18   :  { %245 = vmatprep.subr.bf16.mxu0 %v6288_v12  ;;  %v5765_v0 = vcombine.high %v650_v61, %v654_v62  ;;  %v642_v1 = vld [vmem:[%s9282_s3 + $0x4c0] sm:$0xff]  ;;  %v5764_v3 = vcombine.low %v650_v61, %v654_v62 }
  0x19   :  { %v646_v2 = vld [vmem:[%s9282_s3 + $0x4e0] sm:$0xff] }
  0x1a   :  { %v5757_v4 = vcombine.high %v642_v1, %v646_v2  ;;  %v634_v5 = vld [vmem:[%s9282_s3 + $0x480] sm:$0xff]  ;;  %v5756_v7 = vcombine.low %v642_v1, %v646_v2  ;;  %v31_v1 = vld [vmem:[%s9283_s1 + $0x8] sm:$0xff] }
  0x1b   :  { %246 = vmatpush1.bf16.msra.mxu0 %v6290_v15  ;;  %v638_v6 = vld [vmem:[%s9282_s3 + $0x4a0] sm:$0xff] }
  0x1c   :  { %247 = vmatprep.subr.bf16.mxu0 %v6291_v16  ;;  %v5749_v8 = vcombine.high %v634_v5, %v638_v6  ;;  %v626_v9 = vld [vmem:[%s9282_s3 + $0x440] sm:$0xff]  ;;  %v5748_v11 = vcombine.low %v634_v5, %v638_v6  ;;  %v32_v6 = vld [vmem:[%s9283_s1 + $0x10] sm:$0xff] }
  0x1d   :  { %v630_v10 = vld [vmem:[%s9282_s3 + $0x460] sm:$0xff] }
  0x1e   :  { %v5741_v12 = vcombine.high %v626_v9, %v630_v10  ;;  %v618_v13 = vld [vmem:[%s9282_s3 + $0x400] sm:$0xff]  ;;  %v5740_v15 = vcombine.low %v626_v9, %v630_v10 }
  0x1f   :  { %248 = vmatpush1.bf16.msra.mxu0 %v6293_v20  ;;  %v622_v14 = vld [vmem:[%s9282_s3 + $0x420] sm:$0xff] }
  0x20   :  { %249 = vmatprep.subr.bf16.mxu0 %v6294_v22  ;;  %v5733_v16 = vcombine.high %v618_v13, %v622_v14  ;;  %v738_v18 = vld [vmem:[%s9282_s3 + $0x7c0] sm:$0xff]  ;;  %v5732_v20 = vcombine.low %v618_v13, %v622_v14 }
  0x21   :  { %v742_v19 = vld [vmem:[%s9282_s3 + $0x7e0] sm:$0xff] }
  0x22   :  { %v5853_v21 = vcombine.high %v738_v18, %v742_v19  ;;  %v730_v22 = vld [vmem:[%s9282_s3 + $0x780] sm:$0xff] }
  0x23   :  { %250 = vmatpush2.bf16.msra.mxu0 %v6296_v23  ;;  %v734_v23 = vld [vmem:[%s9282_s3 + $0x7a0] sm:$0xff] }
  0x24   :  { %251 = vmatprep.subr.bf16.mxu0 %v6297_v24  ;;  %v5852_v24 = vcombine.low %v738_v18, %v742_v19  ;;  %v546_v55 = vld [vmem:[%s9282_s3 + $0x1c0] sm:$0xff] }
  0x25   :  { %v538_v57 = vld [vmem:[%s9282_s3 + $0x180] sm:$0xff] }
  0x26   :  { %v542_v58 = vld [vmem:[%s9282_s3 + $0x1a0] sm:$0xff] }
  0x27   :  { %252 = vmatpush2.bf16.msra.mxu0 %v6299_v25  ;;  %v5845_v25 = vcombine.high %v730_v22, %v734_v23  ;;  %v5653_v62 = vcombine.high %v538_v57, %v542_v58  ;;  %v5652_v2 = vcombine.low %v538_v57, %v542_v58  ;;  %v526_v5 = vld [vmem:[%s9282_s3 + $0x120] sm:$0xff] }
  0x28   :  { %253 = vmatprep.subr.bf16.mxu0 %v6300_v26  ;;  %v722_v26 = vld [vmem:[%s9282_s3 + $0x740] sm:$0xff] }
  0x29   :  { %v514_v9 = vld [vmem:[%s9282_s3 + $0xc0] sm:$0xff] }
  0x2a   :  { %v518_v10 = vld [vmem:[%s9282_s3 + $0xe0] sm:$0xff] }
  0x2b   :  { %254 = vmatpush2.bf16.msra.mxu0 %v6302_v27  ;;  %v726_v27 = vld [vmem:[%s9282_s3 + $0x760] sm:$0xff]  ;;  %v5629_v13 = vcombine.high %v514_v9, %v518_v10  ;;  %v5628_v18 = vcombine.low %v514_v9, %v518_v10 }
  0x2c   :  { %255 = vmatprep.subr.bf16.mxu0 %v6303_v28  ;;  %v5844_v28 = vcombine.low %v730_v22, %v734_v23  ;;  %v506_v14 = vld [vmem:[%s9282_s3 + $0x80] sm:$0xff] }
  0x2d   :  { %v570_v57 = vld [vmem:[%s9282_s3 + $0x280] sm:$0xff] }
  0x2e   :  { %v574_v58 = vld [vmem:[%s9282_s3 + $0x2a0] sm:$0xff] }
  0x2f   :  { %256 = vmatpush2.bf16.msra.mxu0 %v6305_v29  ;;  %v5837_v29 = vcombine.high %v722_v26, %v726_v27  ;;  %v554_v9 = vld [vmem:[%s9282_s3 + $0x200] sm:$0xff] }
  0x30   :  { %257 = vmatprep.subr.bf16.mxu0 %v6306_v30  ;;  %v714_v30 = vld [vmem:[%s9282_s3 + $0x700] sm:$0xff] }
  0x31   :  { %v558_v10 = vld [vmem:[%s9282_s3 + $0x220] sm:$0xff] }
  0x33   :  { %258 = vmatpush2.bf16.msra.mxu0 %v6308_v31  ;;  %v718_v31 = vld [vmem:[%s9282_s3 + $0x720] sm:$0xff] }
  0x34   :  { %259 = vmatprep.subr.bf16.mxu0 %v6309_v32  ;;  %v5836_v32 = vcombine.low %v722_v26, %v726_v27 }
  0x37   :  { %260 = vmatpush2.bf16.msra.mxu0 %v6311_v33  ;;  %v5829_v33 = vcombine.high %v714_v30, %v718_v31 }
  0x38   :  { %261 = vmatprep.subr.bf16.mxu0 %v6312_v34  ;;  %v706_v34 = vld [vmem:[%s9282_s3 + $0x6c0] sm:$0xff] }
  0x3b   :  { %262 = vmatpush2.bf16.msra.mxu0 %v6314_v35  ;;  %v710_v35 = vld [vmem:[%s9282_s3 + $0x6e0] sm:$0xff] }
  0x3c   :  { %263 = vmatprep.subr.bf16.mxu0 %v6315_v36  ;;  %v5828_v36 = vcombine.low %v714_v30, %v718_v31  ;;  %v5820_v38 = vcombine.low %v706_v34, %v710_v35 }
  0x3f   :  { %264 = vmatpush2.bf16.msra.mxu0 %v6317_v37  ;;  %v5821_v37 = vcombine.high %v706_v34, %v710_v35 }
  0x40   :  { %2183 = vmatprep.subr.bf16.mxu0 %v5789_v53 }
  0x42   :  { %266 = vmatmul.mubr.bf16.vlgmr.msra.gmra.mxu0 %v6759_v42 }
  0x43   :  { %275 = vmatprep.mubr.bf16.mxu0 %v6761_v43  ;;  %2184 = vmatpush1.bf16.msra.mxu0 %v5788_v52 }
  0x44   :  { %2185 = vmatprep.subr.bf16.mxu0 %v5781_v56  ;;  %v550_v56 = vld [vmem:[%s9282_s3 + $0x1e0] sm:$0xff] }
  0x45   :  { %v5660_v61 = vcombine.low %v546_v55, %v550_v56 }
  0x47   :  { %2186 = vmatpush1.bf16.msra.mxu0 %v5780_v59  ;;  %v5661_v59 = vcombine.high %v546_v55, %v550_v56 }
  0x48   :  { %2187 = vmatprep.subr.bf16.mxu0 %v5773_v60  ;;  %v30_v60 = vld [vmem:[%s9283_s1] sm:$0xff] }
  0x4a   :  { %276 = vmatmul.mubr.bf16.gmra.mxu0 %v6771_v46 }
  0x4b   :  { %285 = vmatprep.mubr.bf16.mxu0 %v40_v47  ;;  %2188 = vmatpush1.bf16.msra.mxu0 %v5772_v63  ;;  %v530_v63 = vld [vmem:[%s9282_s3 + $0x140] sm:$0xff] }
  0x4c   :  { %2189 = vmatprep.subr.bf16.mxu0 %v5765_v0  ;;  %v534_v0 = vld [vmem:[%s9282_s3 + $0x160] sm:$0xff] }
  0x4f   :  { %2190 = vmatpush1.bf16.msra.mxu0 %v5764_v3  ;;  %v5645_v3 = vcombine.high %v530_v63, %v534_v0 }
  0x50   :  { %2191 = vmatprep.subr.bf16.mxu0 %v5757_v4  ;;  %v522_v4 = vld [vmem:[%s9282_s3 + $0x100] sm:$0xff] }
  0x52   :  { %286 = vmatmul.mubr.bf16.gmra.mxu0 %v39_v48 }
  0x53   :  { %2192 = vmatpush1.bf16.msra.mxu0 %v5756_v7  ;;  %v5644_v7 = vcombine.low %v530_v63, %v534_v0  ;;  %2215 = vmatprep.mubr.bf16.mxu0 %v6687_v17 }
  0x54   :  { %2193 = vmatprep.subr.bf16.mxu0 %v5749_v8  ;;  %v5637_v8 = vcombine.high %v522_v4, %v526_v5 }
  0x57   :  { %2194 = vmatpush1.bf16.msra.mxu0 %v5748_v11  ;;  %v33_v11 = vld [vmem:[%s9283_s1 + $0x18] sm:$0xff] }
  0x58   :  { %2195 = vmatprep.subr.bf16.mxu0 %v5741_v12  ;;  %v5636_v12 = vcombine.low %v522_v4, %v526_v5  ;;  %v686_v5 = vld [vmem:[%s9282_s3 + $0x620] sm:$0xff] }
  0x5b   :  { %2196 = vmatpush1.bf16.msra.mxu0 %v5740_v15  ;;  %v510_v15 = vld [vmem:[%s9282_s3 + $0xa0] sm:$0xff] }
  0x5c   :  { %2197 = vmatprep.subr.bf16.mxu0 %v5733_v16  ;;  %v34_v16 = vld [vmem:[%s9283_s1 + $0x20] sm:$0x3f]  ;;  %v5621_v19 = vcombine.high %v506_v14, %v510_v15  ;;  %v5620_v22 = vcombine.low %v506_v14, %v510_v15  ;;  %v5668_v14 = vcombine.low %v554_v9, %v558_v10 }
  0x5f   :  { %2198 = vmatpush1.bf16.msra.mxu0 %v5732_v20  ;;  %v498_v20 = vld [vmem:[%s9282_s3 + $0x40] sm:$0xff] }
  0x60   :  { %2199 = vmatprep.subr.bf16.mxu0 %v5853_v21  ;;  %v502_v21 = vld [vmem:[%s9282_s3 + $0x60] sm:$0xff] }
  0x61   :  { %v5613_v23 = vcombine.high %v498_v20, %v502_v21  ;;  %v5612_v26 = vcombine.low %v498_v20, %v502_v21  ;;  %v667_v20 = vld [vmem:[%s9282_s3 + $0x588] sm:$0xff] }
  0x63   :  { %2200 = vmatpush2.bf16.msra.mxu0 %v5852_v24  ;;  %v490_v24 = vld [vmem:[%s9282_s3] sm:$0xff] }
  0x64   :  { %2201 = vmatprep.subr.bf16.mxu0 %v5845_v25  ;;  %v494_v25 = vld [vmem:[%s9282_s3 + $0x20] sm:$0xff] }
  0x65   :  { %v5605_v27 = vcombine.high %v490_v24, %v494_v25  ;;  %v5604_v30 = vcombine.low %v490_v24, %v494_v25 }
  0x67   :  { %2202 = vmatpush2.bf16.msra.mxu0 %v5844_v28  ;;  %v610_v28 = vld [vmem:[%s9282_s3 + $0x3c0] sm:$0xff] }
  0x68   :  { %2203 = vmatprep.subr.bf16.mxu0 %v5837_v29  ;;  %v614_v29 = vld [vmem:[%s9282_s3 + $0x3e0] sm:$0xff] }
  0x69   :  { %v5725_v31 = vcombine.high %v610_v28, %v614_v29  ;;  %v5724_v34 = vcombine.low %v610_v28, %v614_v29 }
  0x6b   :  { %2204 = vmatpush2.bf16.msra.mxu0 %v5836_v32  ;;  %v602_v32 = vld [vmem:[%s9282_s3 + $0x380] sm:$0xff] }
  0x6c   :  { %2205 = vmatprep.subr.bf16.mxu0 %v5829_v33  ;;  %v606_v33 = vld [vmem:[%s9282_s3 + $0x3a0] sm:$0xff] }
  0x6d   :  { %v5717_v35 = vcombine.high %v602_v32, %v606_v33 }
  0x6f   :  { %2206 = vmatpush2.bf16.msra.mxu0 %v5828_v36  ;;  %v594_v36 = vld [vmem:[%s9282_s3 + $0x340] sm:$0xff] }
  0x70   :  { %2207 = vmatprep.subr.bf16.mxu0 %v5821_v37  ;;  %v598_v37 = vld [vmem:[%s9282_s3 + $0x360] sm:$0xff] }
  0x73   :  { %2208 = vmatpush2.bf16.msra.mxu0 %v5820_v38  ;;  %v5716_v38 = vcombine.low %v602_v32, %v606_v33 }
 0x102   :  { %v267_v39 = vpop.f32.mrf.mxu0 }
 0x104   :  { %v269_v40 = vpop.f32.mrf.mxu0 }
 0x106   :  { %v271_v41 = vpop.f32.mrf.mxu0 }
 0x108   :  { %v273_v44 = vpop.f32.mrf.mxu0 }
 0x10a   :  { %v277_v45 = vpop.f32.mrf.mxu0 }
 0x10c   :  { %v279_v47 = vpop.f32.mrf.mxu0 }
 0x10e   :  { %v281_v48 = vpop.f32.mrf.mxu0 }
 0x110   :  { %v283_v50 = vpop.f32.mrf.mxu0 }
 0x112   :  { %v287_v51 = vpop.f32.mrf.mxu0 }
 0x114   :  { %v289_v52 = vpop.f32.mrf.mxu0 }
 0x115   :  { %5575 = vmatprep.subr.msk.mxu1 %vm310_vm0, %v289_v52 }
 0x116   :  { %v291_v53 = vpop.f32.mrf.mxu0  ;;  %5576 = vmatpush1.msk.msra.mxu1 %vm310_vm0, %v287_v51  ;;  %v698_v51 = vld [vmem:[%s9282_s3 + $0x680] sm:$0xff] }
 0x117   :  { %341 = vmatprep.subr.mxu1 %v283_v50  ;;  %v582_v50 = vld [vmem:[%s9282_s3 + $0x2e0] sm:$0xff] }
 0x118   :  { %v292_v54 = vpop.f32.mrf.mxu0  ;;  %342 = vmatpush1.msra.mxu1 %v281_v48  ;;  %v578_v48 = vld [vmem:[%s9282_s3 + $0x2c0] sm:$0xff] }
 0x119   :  { %343 = vmatprep.subr.mxu1 %v279_v47  ;;  %v5693_v52 = vcombine.high %v578_v48, %v582_v50  ;;  %v702_v53 = vld [vmem:[%s9282_s3 + $0x6a0] sm:$0xff]  ;;  %v5692_v54 = vcombine.low %v578_v48, %v582_v50  ;;  %v619_v50 = vld [vmem:[%s9282_s3 + $0x408] sm:$0xff] }
 0x11a   :  { %344 = vmatpush1.msra.mxu1 %v277_v45  ;;  %v5812_v55 = vcombine.low %v698_v51, %v702_v53  ;;  %v5813_v56 = vcombine.high %v698_v51, %v702_v53  ;;  %v623_v51 = vld [vmem:[%s9282_s3 + $0x428] sm:$0xff] }
 0x11b   :  { %345 = vmatprep.subr.mxu1 %v273_v44  ;;  %v5708_v44 = vcombine.low %v594_v36, %v598_v37  ;;  %v5735_v53 = vcombine.high %v619_v50, %v623_v51 }
 0x11c   :  { %346 = vmatpush1.msra.mxu1 %v271_v41  ;;  %v590_v41 = vld [vmem:[%s9282_s3 + $0x320] sm:$0xff]  ;;  %2209 = vmatprep.subr.bf16.mxu0 %v5813_v56 }
 0x11d   :  { %347 = vmatprep.subr.mxu1 %v269_v40  ;;  %v586_v40 = vld [vmem:[%s9282_s3 + $0x300] sm:$0xff]  ;;  %2210 = vmatpush2.bf16.msra.mxu0 %v5812_v55  ;;  %v743_v55 = vld [vmem:[%s9282_s3 + $0x7e8] sm:$0xff] }
 0x11e   :  { %348 = vmatpush1.msra.mxu1 %v267_v39  ;;  %v5709_v39 = vcombine.high %v594_v36, %v598_v37  ;;  %v5701_v45 = vcombine.high %v586_v40, %v590_v41  ;;  %v5700_v47 = vcombine.low %v586_v40, %v590_v41 }
 0x11f   :  { %5577 = vmatmul.mubr.msk.f32.vlgmr.msra.gmra.mxu1 %vm294_vm1, %v30_v60  ;;  %2122 = vmatprep.subr.bf16.mxu1 %v5661_v59  ;;  %v690_v59 = vld [vmem:[%s9282_s3 + $0x640] sm:$0xff]  ;;  %v5685_v60 = vcombine.high %v570_v57, %v574_v58 }
 0x120   :  { %387 = vmatprep.mubr.f32.mxu1 %v9286_v49  ;;  %2123 = vmatpush1.bf16.msra.mxu1 %v5660_v61  ;;  %v694_v61 = vld [vmem:[%s9282_s3 + $0x660] sm:$0xff] }
 0x121   :  { %2124 = vmatprep.subr.bf16.mxu1 %v5653_v62  ;;  %v5684_v62 = vcombine.low %v570_v57, %v574_v58  ;;  %v5804_v63 = vcombine.low %v690_v59, %v694_v61  ;;  %v5805_v0 = vcombine.high %v690_v59, %v694_v61  ;;  %v731_v58 = vld [vmem:[%s9282_s3 + $0x788] sm:$0xff] }
 0x122   :  { %v735_v59 = vld [vmem:[%s9282_s3 + $0x7a8] sm:$0xff] }
 0x123   :  { %5578 = vmatmul.mubr.msk.f32.gmra.mxu1 %vm294_vm1, %v31_v1  ;;  %2211 = vmatprep.subr.bf16.mxu0 %v5805_v0  ;;  %v562_v1 = vld [vmem:[%s9282_s3 + $0x240] sm:$0xff]  ;;  %v5847_v61 = vcombine.high %v731_v58, %v735_v59 }
 0x124   :  { %393 = vmatprep.mubr.f32.mxu1 %v9286_v49  ;;  %2125 = vmatpush1.bf16.msra.mxu1 %v5652_v2  ;;  %v566_v2 = vld [vmem:[%s9282_s3 + $0x260] sm:$0xff] }
 0x125   :  { %2126 = vmatprep.subr.bf16.mxu1 %v5645_v3  ;;  %v682_v3 = vld [vmem:[%s9282_s3 + $0x600] sm:$0xff]  ;;  %2212 = vmatpush2.bf16.msra.mxu0 %v5804_v63  ;;  %v5677_v4 = vcombine.high %v562_v1, %v566_v2  ;;  %v727_v63 = vld [vmem:[%s9282_s3 + $0x768] sm:$0xff] }
 0x127   :  { %5579 = vmatmul.mubr.msk.f32.gmra.mxu1 %vm294_vm1, %v32_v6  ;;  %v5676_v6 = vcombine.low %v562_v1, %v566_v2  ;;  %v715_v2 = vld [vmem:[%s9282_s3 + $0x708] sm:$0xff] }
 0x128   :  { %399 = vmatprep.mubr.f32.mxu1 %v9286_v49  ;;  %2127 = vmatpush1.bf16.msra.mxu1 %v5644_v7  ;;  %v5796_v7 = vcombine.low %v682_v3, %v686_v5 }
 0x129   :  { %2128 = vmatprep.subr.bf16.mxu1 %v5637_v8  ;;  %v5797_v8 = vcombine.high %v682_v3, %v686_v5  ;;  %v719_v3 = vld [vmem:[%s9282_s3 + $0x728] sm:$0xff] }
 0x12a   :  { %v5831_v5 = vcombine.high %v715_v2, %v719_v3 }
 0x12b   :  { %5580 = vmatmul.mubr.msk.f32.gmra.mxu1 %vm294_vm1, %v33_v11  ;;  %2213 = vmatprep.subr.bf16.mxu0 %v5797_v8  ;;  %v675_v11 = vld [vmem:[%s9282_s3 + $0x5c8] sm:$0xff] }
 0x12c   :  { %405 = vmatprep.mubr.f32.mxu1 %v9286_v49  ;;  %2129 = vmatpush1.bf16.msra.mxu1 %v5636_v12  ;;  %v5669_v12 = vcombine.high %v554_v9, %v558_v10  ;;  %v699_v10 = vld [vmem:[%s9282_s3 + $0x688] sm:$0xff] }
 0x12d   :  { %2130 = vmatprep.subr.bf16.mxu1 %v5629_v13  ;;  %2214 = vmatpush2.bf16.msra.mxu0 %v5796_v7  ;;  %v679_v13 = vld [vmem:[%s9282_s3 + $0x5e8] sm:$0xff] }
 0x12e   :  { %v5790_v15 = vcombine.low %v675_v11, %v679_v13  ;;  %v711_v7 = vld [vmem:[%s9282_s3 + $0x6e8] sm:$0xff] }
 0x12f   :  { %5581 = vmatmul.mubr.msk.f32.gmra.mxu1 %vm294_vm1, %v34_v16  ;;  %v5791_v16 = vcombine.high %v675_v11, %v679_v13  ;;  %v703_v11 = vld [vmem:[%s9282_s3 + $0x6a8] sm:$0xff] }
 0x130   :  { %2131 = vmatpush1.bf16.msra.mxu1 %v5628_v18  ;;  %v7003_v18 = vld [vmem:[%s9282_s3 + $0x1c8] sm:$0xff]  ;;  %2216 = vmatmul.mubr.bf16.vlgmr.msra.gmra.mxu0 %v6759_v42  ;;  %v5815_v13 = vcombine.high %v699_v10, %v703_v11 }
 0x131   :  { %2132 = vmatprep.subr.bf16.mxu1 %v5621_v19  ;;  %2305 = vmatprep.subr.bf16.mxu0 %v5791_v16  ;;  %v7008_v19 = vld [vmem:[%s9282_s3 + $0x1e8] sm:$0xff] }
 0x132   :  { %v5663_v21 = vcombine.high %v7003_v18, %v7008_v19  ;;  %2306 = vmatpush1.bf16.msra.mxu0 %v5790_v15  ;;  %2225 = vmatprep.mubr.bf16.mxu0 %v6761_v43  ;;  %v691_v16 = vld [vmem:[%s9282_s3 + $0x648] sm:$0xff] }
 0x134   :  { %2133 = vmatpush1.bf16.msra.mxu1 %v5620_v22  ;;  %v671_v22 = vld [vmem:[%s9282_s3 + $0x5a8] sm:$0xff] }
 0x135   :  { %2134 = vmatprep.subr.bf16.mxu1 %v5613_v23  ;;  %v5662_v23 = vcombine.low %v7003_v18, %v7008_v19  ;;  %v5782_v24 = vcombine.low %v667_v20, %v671_v22  ;;  %v5783_v25 = vcombine.high %v667_v20, %v671_v22  ;;  %v695_v20 = vld [vmem:[%s9282_s3 + $0x668] sm:$0xff] }
 0x136   :  { %v5806_v22 = vcombine.low %v691_v16, %v695_v20  ;;  %v527_v18 = vld [vmem:[%s9282_s3 + $0x128] sm:$0xff] }
 0x137   :  { %2307 = vmatprep.subr.bf16.mxu0 %v5783_v25  ;;  %v683_v25 = vld [vmem:[%s9282_s3 + $0x608] sm:$0xff] }
 0x138   :  { %2135 = vmatpush1.bf16.msra.mxu1 %v5612_v26  ;;  %v659_v26 = vld [vmem:[%s9282_s3 + $0x548] sm:$0xff]  ;;  %2308 = vmatpush1.bf16.msra.mxu0 %v5782_v24  ;;  %v5807_v24 = vcombine.high %v691_v16, %v695_v20 }
 0x139   :  { %2136 = vmatprep.subr.bf16.mxu1 %v5605_v27  ;;  %v663_v27 = vld [vmem:[%s9282_s3 + $0x568] sm:$0xff]  ;;  %2226 = vmatmul.mubr.bf16.gmra.mxu0 %v6771_v46 }
 0x13a   :  { %v5774_v28 = vcombine.low %v659_v26, %v663_v27  ;;  %v5775_v29 = vcombine.high %v659_v26, %v663_v27  ;;  %v687_v26 = vld [vmem:[%s9282_s3 + $0x628] sm:$0xff] }
 0x13b   :  { %v5798_v27 = vcombine.low %v683_v25, %v687_v26 }
 0x13c   :  { %2137 = vmatpush1.bf16.msra.mxu1 %v5604_v30  ;;  %2309 = vmatprep.subr.bf16.mxu0 %v5775_v29  ;;  %v651_v30 = vld [vmem:[%s9282_s3 + $0x508] sm:$0xff]  ;;  %v676_v29 = vld [vmem:[%s9282_s3 + $0x5d0] sm:$0xff] }
 0x13d   :  { %2138 = vmatprep.subr.bf16.mxu1 %v5725_v31  ;;  %2310 = vmatpush1.bf16.msra.mxu0 %v5774_v28  ;;  %v655_v31 = vld [vmem:[%s9282_s3 + $0x528] sm:$0xff]  ;;  %v5799_v28 = vcombine.high %v683_v25, %v687_v26 }
 0x13e   :  { %v5766_v32 = vcombine.low %v651_v30, %v655_v31  ;;  %v5767_v33 = vcombine.high %v651_v30, %v655_v31  ;;  %v680_v30 = vld [vmem:[%s9282_s3 + $0x5f0] sm:$0xff] }
 0x13f   :  { %v5792_v31 = vcombine.low %v676_v29, %v680_v30 }
 0x140   :  { %2139 = vmatpush2.bf16.msra.mxu1 %v5724_v34  ;;  %2311 = vmatprep.subr.bf16.mxu0 %v5767_v33  ;;  %v643_v34 = vld [vmem:[%s9282_s3 + $0x4c8] sm:$0xff]  ;;  %v668_v33 = vld [vmem:[%s9282_s3 + $0x590] sm:$0xff] }
 0x141   :  { %2140 = vmatprep.subr.bf16.mxu1 %v5717_v35  ;;  %2312 = vmatpush1.bf16.msra.mxu0 %v5766_v32  ;;  %v647_v35 = vld [vmem:[%s9282_s3 + $0x4e8] sm:$0xff]  ;;  %v5793_v32 = vcombine.high %v676_v29, %v680_v30 }
 0x142   :  { %v5758_v36 = vcombine.low %v643_v34, %v647_v35  ;;  %v5759_v37 = vcombine.high %v643_v34, %v647_v35  ;;  %v672_v34 = vld [vmem:[%s9282_s3 + $0x5b0] sm:$0xff] }
 0x143   :  { %v5784_v35 = vcombine.low %v668_v33, %v672_v34 }
 0x144   :  { %2141 = vmatpush2.bf16.msra.mxu1 %v5716_v38  ;;  %2313 = vmatprep.subr.bf16.mxu0 %v5759_v37  ;;  %v635_v38 = vld [vmem:[%s9282_s3 + $0x488] sm:$0xff]  ;;  %v660_v37 = vld [vmem:[%s9282_s3 + $0x550] sm:$0xff] }
 0x145   :  { %2142 = vmatprep.subr.bf16.mxu1 %v5709_v39  ;;  %2314 = vmatpush1.bf16.msra.mxu0 %v5758_v36  ;;  %v639_v39 = vld [vmem:[%s9282_s3 + $0x4a8] sm:$0xff]  ;;  %v5785_v36 = vcombine.high %v668_v33, %v672_v34 }
 0x146   :  { %v5750_v40 = vcombine.low %v635_v38, %v639_v39  ;;  %v5751_v41 = vcombine.high %v635_v38, %v639_v39  ;;  %v664_v38 = vld [vmem:[%s9282_s3 + $0x570] sm:$0xff] }
 0x147   :  { %v5776_v39 = vcombine.low %v660_v37, %v664_v38 }
 0x148   :  { %2143 = vmatpush2.bf16.msra.mxu1 %v5708_v44  ;;  %2315 = vmatprep.subr.bf16.mxu0 %v5751_v41  ;;  %v627_v44 = vld [vmem:[%s9282_s3 + $0x448] sm:$0xff]  ;;  %v652_v41 = vld [vmem:[%s9282_s3 + $0x510] sm:$0xff] }
 0x149   :  { %2144 = vmatprep.subr.bf16.mxu1 %v5701_v45  ;;  %2316 = vmatpush1.bf16.msra.mxu0 %v5750_v40  ;;  %v631_v45 = vld [vmem:[%s9282_s3 + $0x468] sm:$0xff]  ;;  %v5777_v40 = vcombine.high %v660_v37, %v664_v38  ;;  %v688_v38 = vld [vmem:[%s9282_s3 + $0x630] sm:$0xff] }
 0x14a   :  { %v5743_v48 = vcombine.high %v627_v44, %v631_v45 }
 0x14c   :  { %2145 = vmatpush2.bf16.msra.mxu1 %v5700_v47  ;;  %v5742_v47 = vcombine.low %v627_v44, %v631_v45  ;;  %2317 = vmatprep.subr.bf16.mxu0 %v5743_v48  ;;  %v656_v44 = vld [vmem:[%s9282_s3 + $0x530] sm:$0xff] }
 0x14d   :  { %2146 = vmatprep.subr.bf16.mxu1 %v5693_v52  ;;  %v5734_v52 = vcombine.low %v619_v50, %v623_v51  ;;  %v5768_v45 = vcombine.low %v652_v41, %v656_v44  ;;  %v644_v48 = vld [vmem:[%s9282_s3 + $0x4d0] sm:$0xff] }
 0x14e   :  { %2318 = vmatpush1.bf16.msra.mxu0 %v5742_v47  ;;  %v5769_v47 = vcombine.high %v652_v41, %v656_v44  ;;  %v648_v50 = vld [vmem:[%s9282_s3 + $0x4f0] sm:$0xff]  ;;  %v677_v44 = vld [vmem:[%s9282_s3 + $0x5d8] sm:$0xff] }
 0x14f   :  { %2319 = vmatprep.subr.bf16.mxu0 %v5735_v53  ;;  %v5760_v51 = vcombine.low %v644_v48, %v648_v50  ;;  %v636_v53 = vld [vmem:[%s9282_s3 + $0x490] sm:$0xff] }
 0x150   :  { %2147 = vmatpush2.bf16.msra.mxu1 %v5692_v54  ;;  %v739_v54 = vld [vmem:[%s9282_s3 + $0x7c8] sm:$0xff] }
 0x151   :  { %2148 = vmatprep.subr.bf16.mxu1 %v5685_v60  ;;  %v5854_v56 = vcombine.low %v739_v54, %v743_v55  ;;  %v5855_v57 = vcombine.high %v739_v54, %v743_v55  ;;  %v5846_v60 = vcombine.low %v731_v58, %v735_v59  ;;  %v640_v54 = vld [vmem:[%s9282_s3 + $0x4b0] sm:$0xff] }
 0x152   :  { %2320 = vmatpush1.bf16.msra.mxu0 %v5734_v52  ;;  %v5761_v52 = vcombine.high %v644_v48, %v648_v50  ;;  %v5752_v55 = vcombine.low %v636_v53, %v640_v54  ;;  %v632_v58 = vld [vmem:[%s9282_s3 + $0x470] sm:$0xff]  ;;  %v539_v48 = vld [vmem:[%s9282_s3 + $0x188] sm:$0xff] }
 0x153   :  { %2321 = vmatprep.subr.bf16.mxu0 %v5855_v57  ;;  %v628_v57 = vld [vmem:[%s9282_s3 + $0x450] sm:$0xff]  ;;  %v543_v50 = vld [vmem:[%s9282_s3 + $0x1a8] sm:$0xff] }
 0x154   :  { %2149 = vmatpush2.bf16.msra.mxu1 %v5684_v62  ;;  %v723_v62 = vld [vmem:[%s9282_s3 + $0x748] sm:$0xff]  ;;  %v5744_v59 = vcombine.low %v628_v57, %v632_v58 }
 0x155   :  { %2150 = vmatprep.subr.bf16.mxu1 %v5677_v4  ;;  %v5838_v0 = vcombine.low %v723_v62, %v727_v63  ;;  %v5839_v1 = vcombine.high %v723_v62, %v727_v63  ;;  %v5830_v4 = vcombine.low %v715_v2, %v719_v3  ;;  %v624_v62 = vld [vmem:[%s9282_s3 + $0x430] sm:$0xff] }
 0x156   :  { %2322 = vmatpush2.bf16.msra.mxu0 %v5854_v56  ;;  %v5753_v56 = vcombine.high %v636_v53, %v640_v54  ;;  %v744_v2 = vld [vmem:[%s9282_s3 + $0x7f0] sm:$0xff] }
 0x157   :  { %2323 = vmatprep.subr.bf16.mxu0 %v5847_v61  ;;  %v620_v61 = vld [vmem:[%s9282_s3 + $0x410] sm:$0xff] }
 0x158   :  { %2151 = vmatpush2.bf16.msra.mxu1 %v5676_v6  ;;  %v707_v6 = vld [vmem:[%s9282_s3 + $0x6c8] sm:$0xff]  ;;  %v5736_v63 = vcombine.low %v620_v61, %v624_v62 }
 0x159   :  { %2152 = vmatprep.subr.bf16.mxu1 %v5669_v12  ;;  %v5822_v8 = vcombine.low %v707_v6, %v711_v7  ;;  %v5823_v9 = vcombine.high %v707_v6, %v711_v7  ;;  %v5814_v12 = vcombine.low %v699_v10, %v703_v11  ;;  %v736_v6 = vld [vmem:[%s9282_s3 + $0x7b0] sm:$0xff] }
 0x15a   :  { %2324 = vmatpush2.bf16.msra.mxu0 %v5846_v60  ;;  %v5745_v60 = vcombine.high %v628_v57, %v632_v58  ;;  %v728_v10 = vld [vmem:[%s9282_s3 + $0x770] sm:$0xff]  ;;  %v5655_v58 = vcombine.high %v539_v48, %v543_v50 }
 0x15b   :  { %2325 = vmatprep.subr.bf16.mxu0 %v5839_v1  ;;  %v740_v1 = vld [vmem:[%s9282_s3 + $0x7d0] sm:$0xff] }
 0x15c   :  { %2153 = vmatpush2.bf16.msra.mxu1 %v5668_v14  ;;  %v489_v14 = vld [vmem:[#allocation2 + $0x28] sm:$0x77]  ;;  %v5856_v3 = vcombine.low %v740_v1, %v744_v2 }
 0x15d   :  { %2244 = vmatprep.subr.bf16.mxu1 %v5663_v21  ;;  %v7095_v15 = vcombine.high %v489_v14, %v489_v14  ;;  %v7103_v21 = vcombine.low %v489_v14, %v489_v14  ;;  %v720_v14 = vld [vmem:[%s9282_s3 + $0x730] sm:$0xff] }
 0x15e   :  { %2326 = vmatpush2.bf16.msra.mxu0 %v5838_v0  ;;  %v5737_v0 = vcombine.high %v620_v61, %v624_v62  ;;  %v535_v61 = vld [vmem:[%s9282_s3 + $0x168] sm:$0xff] }
 0x15f   :  { %2327 = vmatprep.subr.bf16.mxu0 %v5831_v5  ;;  %2235 = vmatprep.mubr.bf16.mxu0 %v7095_v15  ;;  %v732_v5 = vld [vmem:[%s9282_s3 + $0x790] sm:$0xff] }
 0x160   :  { %2236 = vmatmul.mubr.bf16.gmra.mxu0 %v7103_v21  ;;  %v5848_v7 = vcombine.low %v732_v5, %v736_v6 }
 0x161   :  { %2337 = vmatprep.mubr.bf16.mxu0 %v6687_v17 }
 0x162   :  { %2328 = vmatpush2.bf16.msra.mxu0 %v5830_v4  ;;  %v5857_v4 = vcombine.high %v740_v1, %v744_v2  ;;  %v5654_v1 = vcombine.low %v539_v48, %v543_v50  ;;  %v661_v2 = vld [vmem:[%s9282_s3 + $0x558] sm:$0xff] }
 0x163   :  { %2329 = vmatprep.subr.bf16.mxu0 %v5823_v9  ;;  %v724_v9 = vld [vmem:[%s9282_s3 + $0x750] sm:$0xff]  ;;  %v629_v50 = vld [vmem:[%s9282_s3 + $0x458] sm:$0xff] }
 0x164   :  { %v5840_v11 = vcombine.low %v724_v9, %v728_v10 }
 0x166   :  { %2330 = vmatpush2.bf16.msra.mxu0 %v5822_v8  ;;  %v5849_v8 = vcombine.high %v732_v5, %v736_v6  ;;  %v665_v5 = vld [vmem:[%s9282_s3 + $0x578] sm:$0xff]  ;;  %v523_v6 = vld [vmem:[%s9282_s3 + $0x108] sm:$0xff] }
 0x167   :  { %2331 = vmatprep.subr.bf16.mxu0 %v5815_v13  ;;  %v716_v13 = vld [vmem:[%s9282_s3 + $0x710] sm:$0xff]  ;;  %v5778_v19 = vcombine.low %v661_v2, %v665_v5 }
 0x168   :  { %v5832_v16 = vcombine.low %v716_v13, %v720_v14  ;;  %v5833_v20 = vcombine.high %v716_v13, %v720_v14  ;;  %v5639_v13 = vcombine.high %v523_v6, %v527_v18  ;;  %v657_v14 = vld [vmem:[%s9282_s3 + $0x538] sm:$0xff] }
 0x16a   :  { %2332 = vmatpush2.bf16.msra.mxu0 %v5814_v12  ;;  %v5841_v12 = vcombine.high %v724_v9, %v728_v10 }
 0x16b   :  { %2333 = vmatprep.subr.bf16.mxu0 %v5807_v24  ;;  %v712_v24 = vld [vmem:[%s9282_s3 + $0x6f0] sm:$0xff] }
 0x16e   :  { %2334 = vmatpush2.bf16.msra.mxu0 %v5806_v22  ;;  %v708_v22 = vld [vmem:[%s9282_s3 + $0x6d0] sm:$0xff] }
 0x16f   :  { %2335 = vmatprep.subr.bf16.mxu0 %v5799_v28  ;;  %v5824_v25 = vcombine.low %v708_v22, %v712_v24  ;;  %v5825_v26 = vcombine.high %v708_v22, %v712_v24  ;;  %v704_v28 = vld [vmem:[%s9282_s3 + $0x6b0] sm:$0xff]  ;;  %v519_v22 = vld [vmem:[%s9282_s3 + $0xe8] sm:$0xff] }
 0x172   :  { %2336 = vmatpush2.bf16.msra.mxu0 %v5798_v27  ;;  %v700_v27 = vld [vmem:[%s9282_s3 + $0x690] sm:$0xff] }
 0x173   :  { %2427 = vmatprep.subr.bf16.mxu0 %v5793_v32  ;;  %v5816_v29 = vcombine.low %v700_v27, %v704_v28  ;;  %v5817_v30 = vcombine.high %v700_v27, %v704_v28  ;;  %v696_v32 = vld [vmem:[%s9282_s3 + $0x670] sm:$0xff]  ;;  %v645_v27 = vld [vmem:[%s9282_s3 + $0x4d8] sm:$0xff] }
 0x175   :  { %2338 = vmatmul.mubr.bf16.vlgmr.msra.gmra.mxu0 %v6759_v42 }
 0x176   :  { %2428 = vmatpush1.bf16.msra.mxu0 %v5792_v31  ;;  %2347 = vmatprep.mubr.bf16.mxu0 %v6761_v43  ;;  %v692_v31 = vld [vmem:[%s9282_s3 + $0x650] sm:$0xff] }
 0x177   :  { %2429 = vmatprep.subr.bf16.mxu0 %v5785_v36  ;;  %v5808_v33 = vcombine.low %v692_v31, %v696_v32  ;;  %v5809_v34 = vcombine.high %v692_v31, %v696_v32  ;;  %v684_v36 = vld [vmem:[%s9282_s3 + $0x610] sm:$0xff]  ;;  %v511_v31 = vld [vmem:[%s9282_s3 + $0xa8] sm:$0xff] }
 0x17a   :  { %2430 = vmatpush1.bf16.msra.mxu0 %v5784_v35 }
 0x17b   :  { %2431 = vmatprep.subr.bf16.mxu0 %v5777_v40  ;;  %v5801_v40 = vcombine.high %v684_v36, %v688_v38 }
 0x17d   :  { %2348 = vmatmul.mubr.bf16.gmra.mxu0 %v6771_v46 }
 0x17e   :  { %2432 = vmatpush1.bf16.msra.mxu0 %v5776_v39  ;;  %2357 = vmatprep.mubr.bf16.mxu0 %v7095_v15  ;;  %v5800_v39 = vcombine.low %v684_v36, %v688_v38  ;;  %v499_v38 = vld [vmem:[%s9282_s3 + $0x48] sm:$0xff] }
 0x17f   :  { %2433 = vmatprep.subr.bf16.mxu0 %v5769_v47  ;;  %v681_v47 = vld [vmem:[%s9282_s3 + $0x5f8] sm:$0xff] }
 0x182   :  { %2434 = vmatpush1.bf16.msra.mxu0 %v5768_v45 }
 0x183   :  { %2435 = vmatprep.subr.bf16.mxu0 %v5761_v52  ;;  %v5795_v52 = vcombine.high %v677_v44, %v681_v47 }
 0x185   :  { %2358 = vmatmul.mubr.bf16.gmra.mxu0 %v7103_v21 }
 0x186   :  { %2436 = vmatpush1.bf16.msra.mxu0 %v5760_v51  ;;  %2459 = vmatprep.mubr.bf16.mxu0 %v6687_v17  ;;  %v5794_v51 = vcombine.low %v677_v44, %v681_v47 }
 0x187   :  { %2437 = vmatprep.subr.bf16.mxu0 %v5753_v56  ;;  %v669_v56 = vld [vmem:[%s9282_s3 + $0x598] sm:$0xff] }
 0x18a   :  { %2438 = vmatpush1.bf16.msra.mxu0 %v5752_v55 }
 0x18b   :  { %2439 = vmatprep.subr.bf16.mxu0 %v5745_v60  ;;  %v531_v60 = vld [vmem:[%s9282_s3 + $0x148] sm:$0xff] }
 0x18c   :  { %v5646_v9 = vcombine.low %v531_v60, %v535_v61 }
 0x18e   :  { %2440 = vmatpush1.bf16.msra.mxu0 %v5744_v59  ;;  %v673_v59 = vld [vmem:[%s9282_s3 + $0x5b8] sm:$0xff] }
 0x18f   :  { %2441 = vmatprep.subr.bf16.mxu0 %v5737_v0  ;;  %v5786_v62 = vcombine.low %v669_v56, %v673_v59 }
 0x192   :  { %2442 = vmatpush1.bf16.msra.mxu0 %v5736_v63  ;;  %v5787_v63 = vcombine.high %v669_v56, %v673_v59  ;;  %v495_v56 = vld [vmem:[%s9282_s3 + $0x28] sm:$0xff] }
 0x193   :  { %2443 = vmatprep.subr.bf16.mxu0 %v5857_v4  ;;  %v5647_v4 = vcombine.high %v531_v60, %v535_v61  ;;  %v621_v60 = vld [vmem:[%s9282_s3 + $0x418] sm:$0xff] }
 0x196   :  { %2444 = vmatpush2.bf16.msra.mxu0 %v5856_v3 }
 0x197   :  { %2445 = vmatprep.subr.bf16.mxu0 %v5849_v8 }
 0x19a   :  { %2446 = vmatpush2.bf16.msra.mxu0 %v5848_v7 }
 0x19b   :  { %2447 = vmatprep.subr.bf16.mxu0 %v5841_v12 }
 0x19e   :  { %2448 = vmatpush2.bf16.msra.mxu0 %v5840_v11  ;;  %v653_v11 = vld [vmem:[%s9282_s3 + $0x518] sm:$0xff] }
 0x19f   :  { %2449 = vmatprep.subr.bf16.mxu0 %v5833_v20  ;;  %v515_v20 = vld [vmem:[%s9282_s3 + $0xc8] sm:$0xff]  ;;  %v5770_v24 = vcombine.low %v653_v11, %v657_v14 }
 0x1a0   :  { %v5631_v28 = vcombine.high %v515_v20, %v519_v22 }
 0x1a2   :  { %2450 = vmatpush2.bf16.msra.mxu0 %v5832_v16 }
 0x1a3   :  { %2451 = vmatprep.subr.bf16.mxu0 %v5825_v26  ;;  %v5638_v26 = vcombine.low %v523_v6, %v527_v18  ;;  %v603_v6 = vld [vmem:[%s9282_s3 + $0x388] sm:$0xff] }
 0x1a4   :  { %v607_v18 = vld [vmem:[%s9282_s3 + $0x3a8] sm:$0xff] }
 0x1a6   :  { %2452 = vmatpush2.bf16.msra.mxu0 %v5824_v25  ;;  %v5771_v25 = vcombine.high %v653_v11, %v657_v14  ;;  %v5719_v11 = vcombine.high %v603_v6, %v607_v18  ;;  %v599_v14 = vld [vmem:[%s9282_s3 + $0x368] sm:$0xff] }
 0x1a7   :  { %2453 = vmatprep.subr.bf16.mxu0 %v5817_v30  ;;  %v507_v30 = vld [vmem:[%s9282_s3 + $0x88] sm:$0xff] }
 0x1a8   :  { %v5623_v36 = vcombine.high %v507_v30, %v511_v31  ;;  %v5622_v48 = vcombine.low %v507_v30, %v511_v31 }
 0x1aa   :  { %2454 = vmatpush2.bf16.msra.mxu0 %v5816_v29  ;;  %v649_v29 = vld [vmem:[%s9282_s3 + $0x4f8] sm:$0xff] }
 0x1ab   :  { %2455 = vmatprep.subr.bf16.mxu0 %v5809_v34  ;;  %v5762_v32 = vcombine.low %v645_v27, %v649_v29  ;;  %v5630_v34 = vcombine.low %v515_v20, %v519_v22  ;;  %v5718_v22 = vcombine.low %v603_v6, %v607_v18  ;;  %v685_v18 = vld [vmem:[%s9282_s3 + $0x618] sm:$0xff] }
 0x1ae   :  { %2456 = vmatpush2.bf16.msra.mxu0 %v5808_v33  ;;  %v5763_v33 = vcombine.high %v645_v27, %v649_v29  ;;  %v587_v27 = vld [vmem:[%s9282_s3 + $0x308] sm:$0xff] }
 0x1af   :  { %2457 = vmatprep.subr.bf16.mxu0 %v5801_v40 }
 0x1b2   :  { %2458 = vmatpush2.bf16.msra.mxu0 %v5800_v39  ;;  %v503_v39 = vld [vmem:[%s9282_s3 + $0x68] sm:$0xff] }
 0x1b3   :  { %2549 = vmatprep.subr.bf16.mxu0 %v5795_v52  ;;  %v633_v52 = vld [vmem:[%s9282_s3 + $0x478] sm:$0xff]  ;;  %v5614_v59 = vcombine.low %v499_v38, %v503_v39 }
 0x1b5   :  { %2460 = vmatmul.mubr.bf16.vlgmr.msra.gmra.mxu0 %v6759_v42 }
 0x1b6   :  { %2550 = vmatpush1.bf16.msra.mxu0 %v5794_v51  ;;  %2469 = vmatprep.mubr.bf16.mxu0 %v6761_v43  ;;  %v5615_v51 = vcombine.high %v499_v38, %v503_v39 }
 0x1b7   :  { %2551 = vmatprep.subr.bf16.mxu0 %v5787_v63  ;;  %v615_v63 = vld [vmem:[%s9282_s3 + $0x3e8] sm:$0xff] }
 0x1ba   :  { %2552 = vmatpush1.bf16.msra.mxu0 %v5786_v62  ;;  %v625_v62 = vld [vmem:[%s9282_s3 + $0x438] sm:$0xff] }
 0x1bd   :  { %2470 = vmatmul.mubr.bf16.gmra.mxu0 %v6771_v46 }
 0x1be   :  { %2479 = vmatprep.mubr.bf16.mxu0 %v7095_v15 }
 0x1c5   :  { %2480 = vmatmul.mubr.bf16.gmra.mxu0 %v7103_v21 }
 0x1c6   :  { %2581 = vmatprep.mubr.bf16.mxu0 %v6687_v17  ;;  %v611_v17 = vld [vmem:[%s9282_s3 + $0x3c8] sm:$0xff] }
 0x1df   :  { %v383_v35 = vpop.f32.mrf.mxu1 }
 0x1e1   :  { %v385_v37 = vpop.f32.mrf.mxu1 }
 0x1e3   :  { %v389_v41 = vpop.f32.mrf.mxu1 }
 0x1e4   :  { %v7230_v55 = vpack.c.bf16 %v389_v41, %v383_v35  ;;  %v637_v35 = vld [vmem:[%s9282_s3 + $0x498] sm:$0xff] }
 0x1e5   :  { %v391_v45 = vpop.f32.mrf.mxu1 }
 0x1e6   :  { %v7228_v54 = vpack.c.bf16 %v391_v45, %v385_v37  ;;  %v641_v37 = vld [vmem:[%s9282_s3 + $0x4b8] sm:$0xff] }
 0x1e7   :  { %v395_v53 = vpop.f32.mrf.mxu1  ;;  %v5754_v40 = vcombine.low %v637_v35, %v641_v37  ;;  %v5755_v41 = vcombine.high %v637_v35, %v641_v37  ;;  %v579_v35 = vld [vmem:[%s9282_s3 + $0x2c8] sm:$0xff] }
 0x1e8   :  { %2154 = vmatprep.mubr.bf16.mxu1 %v7228_v54 }
 0x1e9   :  { %v397_v57 = vpop.f32.mrf.mxu1  ;;  %2155 = vmatmul.mubr.bf16.vlgmr.msra.gmra.mxu1 %v7230_v55 }
 0x1ea   :  { %2245 = vmatpush1.bf16.msra.mxu1 %v5662_v23  ;;  %v5779_v23 = vcombine.high %v661_v2, %v665_v5  ;;  %v745_v5 = vld [vmem:[%s9282_s3 + $0x7f8] sm:$0xff] }
 0x1eb   :  { %v401_v0 = vpop.f32.mrf.mxu1  ;;  %2246 = vmatprep.subr.bf16.mxu1 %v5655_v58  ;;  %v5747_v58 = vcombine.high %v629_v50, %v633_v52 }
 0x1ec   :  { %v7265_v10 = vpack.c.bf16 %v401_v0, %v395_v53  ;;  %2553 = vmatprep.subr.bf16.mxu0 %v5779_v23  ;;  %v491_v53 = vld [vmem:[%s9282_s3 + $0x8] sm:$0xff]  ;;  %v5738_v0 = vcombine.low %v621_v60, %v625_v62 }
 0x1ed   :  { %v403_v3 = vpop.f32.mrf.mxu1  ;;  %2554 = vmatpush1.bf16.msra.mxu0 %v5778_v19  ;;  %v5607_v61 = vcombine.high %v491_v53, %v495_v56  ;;  %v5606_v2 = vcombine.low %v491_v53, %v495_v56  ;;  %v701_v56 = vld [vmem:[%s9282_s3 + $0x698] sm:$0xff] }
 0x1ee   :  { %2247 = vmatpush1.bf16.msra.mxu1 %v5654_v1  ;;  %v7263_v8 = vpack.c.bf16 %v403_v3, %v397_v57  ;;  %2555 = vmatprep.subr.bf16.mxu0 %v5771_v25  ;;  %v5746_v57 = vcombine.low %v629_v50, %v633_v52  ;;  %v5739_v1 = vcombine.high %v621_v60, %v625_v62  ;;  %v741_v3 = vld [vmem:[%s9282_s3 + $0x7d8] sm:$0xff]  ;;  %v575_v50 = vld [vmem:[%s9282_s3 + $0x2a8] sm:$0xff] }
 0x1ef   :  { %v407_v7 = vpop.f32.mrf.mxu1  ;;  %2248 = vmatprep.subr.bf16.mxu1 %v5647_v4  ;;  %v5727_v4 = vcombine.high %v611_v17, %v615_v63  ;;  %v5858_v19 = vcombine.low %v741_v3, %v745_v5  ;;  %v5859_v23 = vcombine.high %v741_v3, %v745_v5  ;;  %v567_v60 = vld [vmem:[%s9282_s3 + $0x268] sm:$0xff] }
 0x1f0   :  { %2164 = vmatprep.mubr.bf16.mxu1 %v7263_v8  ;;  %v559_v3 = vld [vmem:[%s9282_s3 + $0x228] sm:$0xff] }
 0x1f1   :  { %v409_v12 = vpop.f32.mrf.mxu1  ;;  %2165 = vmatmul.mubr.bf16.gmra.mxu1 %v7265_v10  ;;  %2556 = vmatpush1.bf16.msra.mxu0 %v5770_v24  ;;  %v725_v24 = vld [vmem:[%s9282_s3 + $0x758] sm:$0xff] }
 0x1f2   :  { %v6253_v16 = vpack.c.bf16 %v409_v12, %v407_v7  ;;  %2249 = vmatpush1.bf16.msra.mxu1 %v5646_v9  ;;  %2557 = vmatprep.subr.bf16.mxu0 %v5763_v33  ;;  %v5726_v7 = vcombine.low %v611_v17, %v615_v63  ;;  %v733_v9 = vld [vmem:[%s9282_s3 + $0x798] sm:$0xff] }
 0x1f3   :  { %2250 = vmatprep.subr.bf16.mxu1 %v5639_v13  ;;  %v737_v12 = vld [vmem:[%s9282_s3 + $0x7b8] sm:$0xff]  ;;  %v595_v13 = vld [vmem:[%s9282_s3 + $0x348] sm:$0xff] }
 0x1f4   :  { %448 = vst [vmem:[#allocation2 + $0x48] sm:$0x77] %v6253_v16  ;;  %v5850_v16 = vcombine.low %v733_v9, %v737_v12  ;;  %v5851_v20 = vcombine.high %v733_v9, %v737_v12  ;;  %v5711_v25 = vcombine.high %v595_v13, %v599_v14  ;;  %v5710_v31 = vcombine.low %v595_v13, %v599_v14  ;;  %v693_v63 = vld [vmem:[%s9282_s3 + $0x658] sm:$0xff]  ;;  %v552_v9 = vld [vmem:[%s9282_s3 + $0x1f0] sm:$0xff] }
 0x1f5   :  { %2558 = vmatpush1.bf16.msra.mxu0 %v5762_v32  ;;  %v717_v32 = vld [vmem:[%s9282_s3 + $0x718] sm:$0xff] }
 0x1f6   :  { %2251 = vmatpush1.bf16.msra.mxu1 %v5638_v26  ;;  %2559 = vmatprep.subr.bf16.mxu0 %v5755_v41  ;;  %v729_v26 = vld [vmem:[%s9282_s3 + $0x778] sm:$0xff] }
 0x1f7   :  { %2252 = vmatprep.subr.bf16.mxu1 %v5631_v28  ;;  %v591_v28 = vld [vmem:[%s9282_s3 + $0x328] sm:$0xff]  ;;  %v5842_v29 = vcombine.low %v725_v24, %v729_v26  ;;  %v5843_v30 = vcombine.high %v725_v24, %v729_v26  ;;  %v536_v26 = vld [vmem:[%s9282_s3 + $0x170] sm:$0xff] }
 0x1f8   :  { %v5703_v33 = vcombine.high %v587_v27, %v591_v28  ;;  %v5702_v39 = vcombine.low %v587_v27, %v591_v28 }
 0x1f9   :  { %2560 = vmatpush1.bf16.msra.mxu0 %v5754_v40  ;;  %v709_v40 = vld [vmem:[%s9282_s3 + $0x6d8] sm:$0xff] }
 0x1fa   :  { %2253 = vmatpush1.bf16.msra.mxu1 %v5630_v34  ;;  %2561 = vmatprep.subr.bf16.mxu0 %v5747_v58  ;;  %v721_v34 = vld [vmem:[%s9282_s3 + $0x738] sm:$0xff] }
 0x1fb   :  { %v488_v44 = vld [vmem:[#allocation2 + $0x48] sm:$0x77]  ;;  %2254 = vmatprep.subr.bf16.mxu1 %v5623_v36  ;;  %v5834_v37 = vcombine.low %v717_v32, %v721_v34  ;;  %v5835_v38 = vcombine.high %v717_v32, %v721_v34  ;;  %v705_v58 = vld [vmem:[%s9282_s3 + $0x6b8] sm:$0xff]  ;;  %v520_v32 = vld [vmem:[%s9282_s3 + $0xf0] sm:$0xff] }
 0x1fc   :  { %v7308_v45 = vcombine.high %v488_v44, %v488_v44  ;;  %v7310_v47 = vcombine.low %v488_v44, %v488_v44  ;;  %v583_v36 = vld [vmem:[%s9282_s3 + $0x2e8] sm:$0xff]  ;;  %v713_v44 = vld [vmem:[%s9282_s3 + $0x6f8] sm:$0xff]  ;;  %v5819_v62 = vcombine.high %v701_v56, %v705_v58 }
 0x1fd   :  { %2562 = vmatpush1.bf16.msra.mxu0 %v5746_v57  ;;  %v5695_v41 = vcombine.high %v579_v35, %v583_v36  ;;  %v5827_v52 = vcombine.high %v709_v40, %v713_v44  ;;  %v5694_v53 = vcombine.low %v579_v35, %v583_v36  ;;  %v512_v35 = vld [vmem:[%s9282_s3 + $0xb0] sm:$0xff] }
 0x1fe   :  { %2174 = vmatprep.mubr.bf16.mxu1 %v7308_v45  ;;  %2255 = vmatpush1.bf16.msra.mxu1 %v5622_v48  ;;  %v571_v48 = vld [vmem:[%s9282_s3 + $0x288] sm:$0xff] }
 0x1ff   :  { %2175 = vmatmul.mubr.bf16.gmra.mxu1 %v7310_v47  ;;  %2256 = vmatprep.subr.bf16.mxu1 %v5615_v51  ;;  %v5826_v51 = vcombine.low %v709_v40, %v713_v44  ;;  %v5687_v57 = vcombine.high %v571_v48, %v575_v50  ;;  %v5686_v17 = vcombine.low %v571_v48, %v575_v50  ;;  %v612_v50 = vld [vmem:[%s9282_s3 + $0x3d0] sm:$0xff] }
 0x200   :  { %2276 = vmatprep.mubr.bf16.mxu1 %v7228_v54  ;;  %2563 = vmatprep.subr.bf16.mxu0 %v5739_v1  ;;  %v697_v1 = vld [vmem:[%s9282_s3 + $0x678] sm:$0xff] }
 0x201   :  { %2564 = vmatpush1.bf16.msra.mxu0 %v5738_v0  ;;  %v5811_v5 = vcombine.high %v693_v63, %v697_v1 }
 0x202   :  { %2257 = vmatpush1.bf16.msra.mxu1 %v5614_v59  ;;  %2565 = vmatprep.subr.bf16.mxu0 %v5859_v23  ;;  %v563_v59 = vld [vmem:[%s9282_s3 + $0x248] sm:$0xff]  ;;  %v689_v23 = vld [vmem:[%s9282_s3 + $0x638] sm:$0xff] }
 0x203   :  { %2258 = vmatprep.subr.bf16.mxu1 %v5607_v61  ;;  %v5818_v61 = vcombine.low %v701_v56, %v705_v58  ;;  %v5679_v0 = vcombine.high %v563_v59, %v567_v60  ;;  %v5678_v6 = vcombine.low %v563_v59, %v567_v60  ;;  %v5803_v12 = vcombine.high %v685_v18, %v689_v23  ;;  %v608_v58 = vld [vmem:[%s9282_s3 + $0x3b0] sm:$0xff] }
 0x205   :  { %2566 = vmatpush2.bf16.msra.mxu0 %v5858_v19 }
 0x206   :  { %2259 = vmatpush1.bf16.msra.mxu1 %v5606_v2  ;;  %2567 = vmatprep.subr.bf16.mxu0 %v5851_v20  ;;  %v555_v2 = vld [vmem:[%s9282_s3 + $0x208] sm:$0xff]  ;;  %v544_v20 = vld [vmem:[%s9282_s3 + $0x1b0] sm:$0xff] }
 0x207   :  { %2260 = vmatprep.subr.bf16.mxu1 %v5727_v4  ;;  %v5810_v4 = vcombine.low %v693_v63, %v697_v1  ;;  %v5671_v19 = vcombine.high %v555_v2, %v559_v3  ;;  %v5670_v13 = vcombine.low %v555_v2, %v559_v3  ;;  %v588_v2 = vld [vmem:[%s9282_s3 + $0x310] sm:$0xff] }
 0x208   :  { %v592_v3 = vld [vmem:[%s9282_s3 + $0x330] sm:$0xff] }
 0x209   :  { %2568 = vmatpush2.bf16.msra.mxu0 %v5850_v16  ;;  %v540_v16 = vld [vmem:[%s9282_s3 + $0x190] sm:$0xff] }
 0x20a   :  { %2261 = vmatpush2.bf16.msra.mxu1 %v5726_v7  ;;  %2569 = vmatprep.subr.bf16.mxu0 %v5843_v30  ;;  %v548_v7 = vld [vmem:[%s9282_s3 + $0x1d0] sm:$0xff]  ;;  %v5657_v24 = vcombine.high %v540_v16, %v544_v20  ;;  %v5656_v27 = vcombine.low %v540_v16, %v544_v20 }
 0x20b   :  { %2262 = vmatprep.subr.bf16.mxu1 %v5719_v11  ;;  %v5802_v11 = vcombine.low %v685_v18, %v689_v23  ;;  %v5665_v14 = vcombine.high %v548_v7, %v552_v9  ;;  %v580_v18 = vld [vmem:[%s9282_s3 + $0x2d0] sm:$0xff] }
 0x20c   :  { %v564_v20 = vld [vmem:[%s9282_s3 + $0x250] sm:$0xff] }
 0x20d   :  { %2570 = vmatpush2.bf16.msra.mxu0 %v5842_v29  ;;  %v528_v29 = vld [vmem:[%s9282_s3 + $0x130] sm:$0xff] }
 0x20e   :  { %2263 = vmatpush2.bf16.msra.mxu1 %v5718_v22  ;;  %2571 = vmatprep.subr.bf16.mxu0 %v5835_v38  ;;  %v5664_v22 = vcombine.low %v548_v7, %v552_v9  ;;  %v504_v38 = vld [vmem:[%s9282_s3 + $0x70] sm:$0xff]  ;;  %v5704_v7 = vcombine.low %v588_v2, %v592_v3 }
 0x20f   :  { %2264 = vmatprep.subr.bf16.mxu1 %v5711_v25  ;;  %v532_v25 = vld [vmem:[%s9282_s3 + $0x150] sm:$0xff] }
 0x210   :  { %v5649_v28 = vcombine.high %v532_v25, %v536_v26  ;;  %v5648_v30 = vcombine.low %v532_v25, %v536_v26 }
 0x211   :  { %2572 = vmatpush2.bf16.msra.mxu0 %v5834_v37  ;;  %v500_v37 = vld [vmem:[%s9282_s3 + $0x50] sm:$0xff] }
 0x212   :  { %2265 = vmatpush2.bf16.msra.mxu1 %v5710_v31  ;;  %2573 = vmatprep.subr.bf16.mxu0 %v5827_v52  ;;  %v516_v31 = vld [vmem:[%s9282_s3 + $0xd0] sm:$0xff]  ;;  %v5617_v40 = vcombine.high %v500_v37, %v504_v38  ;;  %v5616_v44 = vcombine.low %v500_v37, %v504_v38 }
 0x213   :  { %2266 = vmatprep.subr.bf16.mxu1 %v5703_v33  ;;  %v5633_v34 = vcombine.high %v516_v31, %v520_v32  ;;  %v5632_v36 = vcombine.low %v516_v31, %v520_v32  ;;  %v549_v31 = vld [vmem:[%s9282_s3 + $0x1d8] sm:$0xff] }
 0x214   :  { %v553_v32 = vld [vmem:[%s9282_s3 + $0x1f8] sm:$0xff] }
 0x215   :  { %2574 = vmatpush2.bf16.msra.mxu0 %v5826_v51  ;;  %v616_v51 = vld [vmem:[%s9282_s3 + $0x3f0] sm:$0xff]  ;;  %v5666_v38 = vcombine.low %v549_v31, %v553_v32 }
 0x216   :  { %2267 = vmatpush2.bf16.msra.mxu1 %v5702_v39  ;;  %2575 = vmatprep.subr.bf16.mxu0 %v5819_v62  ;;  %v5729_v56 = vcombine.high %v612_v50, %v616_v51  ;;  %v5728_v59 = vcombine.low %v612_v50, %v616_v51  ;;  %v596_v62 = vld [vmem:[%s9282_s3 + $0x350] sm:$0xff]  ;;  %v525_v51 = vld [vmem:[%s9282_s3 + $0x118] sm:$0xff] }
 0x217   :  { %2268 = vmatprep.subr.bf16.mxu1 %v5695_v41  ;;  %v496_v41 = vld [vmem:[%s9282_s3 + $0x30] sm:$0xff] }
 0x219   :  { %2576 = vmatpush2.bf16.msra.mxu0 %v5818_v61 }
 0x21a   :  { %2269 = vmatpush2.bf16.msra.mxu1 %v5694_v53  ;;  %2577 = vmatprep.subr.bf16.mxu0 %v5811_v5  ;;  %v7496_v53 = vpop.f32.mrf.mxu0 }
 0x21b   :  { %2270 = vmatprep.subr.bf16.mxu1 %v5687_v57  ;;  %v604_v57 = vld [vmem:[%s9282_s3 + $0x390] sm:$0xff] }
 0x21c   :  { %v7504_v60 = vpop.f32.mrf.mxu0  ;;  %v5721_v61 = vcombine.high %v604_v57, %v608_v58  ;;  %v5720_v63 = vcombine.low %v604_v57, %v608_v58 }
 0x21d   :  { %2578 = vmatpush2.bf16.msra.mxu0 %v5810_v4 }
 0x21e   :  { %2271 = vmatpush2.bf16.msra.mxu1 %v5686_v17  ;;  %2579 = vmatprep.subr.bf16.mxu0 %v5803_v12  ;;  %v600_v17 = vld [vmem:[%s9282_s3 + $0x370] sm:$0xff] }
 0x21f   :  { %2272 = vmatprep.subr.bf16.mxu1 %v5679_v0  ;;  %v7512_v0 = vpop.f32.mrf.mxu0  ;;  %v5713_v1 = vcombine.high %v596_v62, %v600_v17  ;;  %v5712_v4 = vcombine.low %v596_v62, %v600_v17  ;;  %v576_v12 = vld [vmem:[%s9282_s3 + $0x2b0] sm:$0xff] }
 0x221   :  { %2580 = vmatpush2.bf16.msra.mxu0 %v5802_v11  ;;  %v7520_v5 = vpop.f32.mrf.mxu0  ;;  %v572_v11 = vld [vmem:[%s9282_s3 + $0x290] sm:$0xff] }
 0x222   :  { %2273 = vmatpush2.bf16.msra.mxu1 %v5678_v6  ;;  %v5705_v6 = vcombine.high %v588_v2, %v592_v3  ;;  %v5689_v16 = vcombine.high %v572_v11, %v576_v12  ;;  %v5688_v25 = vcombine.low %v572_v11, %v576_v12  ;;  %v509_v2 = vld [vmem:[%s9282_s3 + $0x98] sm:$0xff] }
 0x223   :  { %2274 = vmatprep.subr.bf16.mxu1 %v5671_v19  ;;  %v584_v19 = vld [vmem:[%s9282_s3 + $0x2f0] sm:$0xff]  ;;  %v7528_v23 = vpop.f32.mrf.mxu0  ;;  %v513_v3 = vld [vmem:[%s9282_s3 + $0xb8] sm:$0xff] }
 0x224   :  { %2582 = vmatmul.mubr.bf16.vlgmr.msra.gmra.mxu0 %v6759_v42  ;;  %v524_v42 = vld [vmem:[%s9282_s3 + $0x110] sm:$0xff]  ;;  %v5697_v9 = vcombine.high %v580_v18, %v584_v19  ;;  %v5626_v12 = vcombine.low %v509_v2, %v513_v3 }
 0x225   :  { %2591 = vmatprep.mubr.bf16.mxu0 %v6761_v43  ;;  %v5641_v43 = vcombine.high %v524_v42, %v528_v29  ;;  %v5640_v33 = vcombine.low %v524_v42, %v528_v29 }
 0x226   :  { %2275 = vmatpush2.bf16.msra.mxu1 %v5670_v13  ;;  %v7536_v13 = vpop.f32.mrf.mxu0 }
 0x227   :  { %2366 = vmatprep.subr.bf16.mxu1 %v5665_v14  ;;  %v5696_v14 = vcombine.low %v580_v18, %v584_v19  ;;  %v5627_v18 = vcombine.high %v509_v2, %v513_v3  ;;  %v565_v2 = vld [vmem:[%s9282_s3 + $0x258] sm:$0xff] }
 0x228   :  { %v569_v3 = vld [vmem:[%s9282_s3 + $0x278] sm:$0xff] }
 0x229   :  { %2277 = vmatmul.mubr.bf16.vlgmr.msra.gmra.mxu1 %v7230_v55 }
 0x22a   :  { %2286 = vmatprep.mubr.bf16.mxu1 %v7263_v8  ;;  %2367 = vmatpush1.bf16.msra.mxu1 %v5664_v22  ;;  %v568_v22 = vld [vmem:[%s9282_s3 + $0x270] sm:$0xff] }
 0x22b   :  { %2368 = vmatprep.subr.bf16.mxu1 %v5657_v24  ;;  %v7544_v24 = vpop.f32.mrf.mxu0  ;;  %v5681_v26 = vcombine.high %v564_v20, %v568_v22  ;;  %v5680_v29 = vcombine.low %v564_v20, %v568_v22  ;;  %v493_v20 = vld [vmem:[%s9282_s3 + $0x18] sm:$0xff] }
 0x22c   :  { %2592 = vmatmul.mubr.bf16.gmra.mxu0 %v6771_v46  ;;  %v508_v46 = vld [vmem:[%s9282_s3 + $0x90] sm:$0xff]  ;;  %v497_v22 = vld [vmem:[%s9282_s3 + $0x38] sm:$0xff] }
 0x22d   :  { %2601 = vmatprep.mubr.bf16.mxu0 %v7095_v15  ;;  %v5625_v15 = vcombine.high %v508_v46, %v512_v35  ;;  %v5624_v39 = vcombine.low %v508_v46, %v512_v35  ;;  %v7552_v42 = vpop.f32.mrf.mxu0  ;;  %v5667_v35 = vcombine.high %v549_v31, %v553_v32 }
 0x22e   :  { %2369 = vmatpush1.bf16.msra.mxu1 %v5656_v27  ;;  %v556_v27 = vld [vmem:[%s9282_s3 + $0x210] sm:$0xff] }
 0x22f   :  { %2370 = vmatprep.subr.bf16.mxu1 %v5649_v28  ;;  %v560_v28 = vld [vmem:[%s9282_s3 + $0x230] sm:$0xff] }
 0x231   :  { %2287 = vmatmul.mubr.bf16.gmra.mxu1 %v7265_v10 }
 0x232   :  { %2296 = vmatprep.mubr.bf16.mxu1 %v7308_v45  ;;  %2371 = vmatpush1.bf16.msra.mxu1 %v5648_v30  ;;  %v7554_v30 = vpop.f32.mrf.mxu0 }
 0x233   :  { %2372 = vmatprep.subr.bf16.mxu1 %v5641_v43  ;;  %v5673_v43 = vcombine.high %v556_v27, %v560_v28 }
 0x234   :  { %2602 = vmatmul.mubr.bf16.gmra.mxu0 %v7103_v21  ;;  %v492_v21 = vld [vmem:[%s9282_s3 + $0x10] sm:$0xff] }
 0x235   :  { %3120 = vmatprep.mubr.f32.mxu0 %v9286_v49  ;;  %v5609_v48 = vcombine.high %v492_v21, %v496_v41  ;;  %v5608_v52 = vcombine.low %v492_v21, %v496_v41  ;;  %v533_v21 = vld [vmem:[%s9282_s3 + $0x158] sm:$0xff] }
 0x236   :  { %2373 = vmatpush1.bf16.msra.mxu1 %v5640_v33  ;;  %v7562_v33 = vpop.f32.mrf.mxu0  ;;  %v537_v41 = vld [vmem:[%s9282_s3 + $0x178] sm:$0xff] }
 0x237   :  { %2374 = vmatprep.subr.bf16.mxu1 %v5633_v34  ;;  %v5672_v34 = vcombine.low %v556_v27, %v560_v28  ;;  %v5651_v50 = vcombine.high %v533_v21, %v537_v41  ;;  %v5650_v57 = vcombine.low %v533_v21, %v537_v41  ;;  %v5611_v27 = vcombine.high %v493_v20, %v497_v22  ;;  %v617_v28 = vld [vmem:[%s9282_s3 + $0x3f8] sm:$0xff] }
 0x238   :  { %v2241_v46 = vpop.f32.mrf.mxu0  ;;  %v589_v21 = vld [vmem:[%s9282_s3 + $0x318] sm:$0xff] }
 0x239   :  { %2297 = vmatmul.mubr.bf16.gmra.mxu1 %v7310_v47  ;;  %v609_v46 = vld [vmem:[%s9282_s3 + $0x3b8] sm:$0xff] }
 0x23a   :  { %2375 = vmatpush1.bf16.msra.mxu1 %v5632_v36  ;;  %2398 = vmatprep.mubr.bf16.mxu1 %v7228_v54  ;;  %v541_v36 = vld [vmem:[%s9282_s3 + $0x198] sm:$0xff]  ;;  %v2242_v37 = vpop.f32.mrf.mxu0 }
 0x23b   :  { %2376 = vmatprep.subr.bf16.mxu1 %v5625_v15  ;;  %v545_v15 = vld [vmem:[%s9282_s3 + $0x1b8] sm:$0xff] }
 0x23c   :  { %v601_v37 = vld [vmem:[%s9282_s3 + $0x378] sm:$0xff] }
 0x23d   :  { %v593_v41 = vld [vmem:[%s9282_s3 + $0x338] sm:$0xff] }
 0x23e   :  { %2377 = vmatpush1.bf16.msra.mxu1 %v5624_v39  ;;  %v7570_v39 = vpop.f32.mrf.mxu0 }
 0x23f   :  { %2378 = vmatprep.subr.bf16.mxu1 %v5617_v40  ;;  %v5659_v40 = vcombine.high %v541_v36, %v545_v15 }
 0x242   :  { %2379 = vmatpush1.bf16.msra.mxu1 %v5616_v44  ;;  %v7579_v44 = vpop.f32.mrf.mxu0 }
 0x243   :  { %2380 = vmatprep.subr.bf16.mxu1 %v5609_v48  ;;  %v5658_v48 = vcombine.low %v541_v36, %v545_v15  ;;  %v597_v15 = vld [vmem:[%s9282_s3 + $0x358] sm:$0xff] }
 0x246   :  { %2381 = vmatpush1.bf16.msra.mxu1 %v5608_v52  ;;  %v529_v52 = vld [vmem:[%s9282_s3 + $0x138] sm:$0xff] }
 0x247   :  { %2382 = vmatprep.subr.bf16.mxu1 %v5729_v56  ;;  %v7588_v56 = vpop.f32.mrf.mxu0  ;;  %v5643_v58 = vcombine.high %v525_v51, %v529_v52  ;;  %v5642_v17 = vcombine.low %v525_v51, %v529_v52  ;;  %v581_v51 = vld [vmem:[%s9282_s3 + $0x2d8] sm:$0xff] }
 0x248   :  { %v585_v52 = vld [vmem:[%s9282_s3 + $0x2f8] sm:$0xff] }
 0x249   :  { %v7597_v62 = vpop.f32.mrf.mxu0 }
 0x24a   :  { %2383 = vmatpush2.bf16.msra.mxu1 %v5728_v59  ;;  %v517_v59 = vld [vmem:[%s9282_s3 + $0xd8] sm:$0xff] }
 0x24b   :  { %2384 = vmatprep.subr.bf16.mxu1 %v5721_v61  ;;  %v521_v61 = vld [vmem:[%s9282_s3 + $0xf8] sm:$0xff] }
 0x24e   :  { %2385 = vmatpush2.bf16.msra.mxu1 %v5720_v63  ;;  %v5635_v63 = vcombine.high %v517_v59, %v521_v61 }
 0x24f   :  { %2386 = vmatprep.subr.bf16.mxu1 %v5713_v1  ;;  %v7600_v1 = vpop.f32.mrf.mxu0 }
 0x252   :  { %2387 = vmatpush2.bf16.msra.mxu1 %v5712_v4  ;;  %v7608_v4 = vpop.f32.mrf.mxu0 }
 0x253   :  { %2388 = vmatprep.subr.bf16.mxu1 %v5705_v6  ;;  %v5634_v6 = vcombine.low %v517_v59, %v521_v61  ;;  %v573_v59 = vld [vmem:[%s9282_s3 + $0x298] sm:$0xff] }
 0x254   :  { %v7610_v19 = vpop.f32.mrf.mxu0  ;;  %v577_v61 = vld [vmem:[%s9282_s3 + $0x2b8] sm:$0xff] }
 0x256   :  { %2389 = vmatpush2.bf16.msra.mxu1 %v5704_v7  ;;  %v501_v7 = vld [vmem:[%s9282_s3 + $0x58] sm:$0xff]  ;;  %v7619_v11 = vpop.f32.mrf.mxu0 }
 0x257   :  { %2390 = vmatprep.subr.bf16.mxu1 %v5697_v9  ;;  %v505_v9 = vld [vmem:[%s9282_s3 + $0x78] sm:$0xff] }
 0x25a   :  { %2391 = vmatpush2.bf16.msra.mxu1 %v5696_v14  ;;  %v5619_v14 = vcombine.high %v501_v7, %v505_v9 }
 0x25b   :  { %2392 = vmatprep.subr.bf16.mxu1 %v5689_v16  ;;  %v7622_v16 = vpop.f32.mrf.mxu0 }
 0x25e   :  { %2393 = vmatpush2.bf16.msra.mxu1 %v5688_v25  ;;  %v5618_v25 = vcombine.low %v501_v7, %v505_v9  ;;  %v557_v7 = vld [vmem:[%s9282_s3 + $0x218] sm:$0xff] }
 0x25f   :  { %2394 = vmatprep.subr.bf16.mxu1 %v5681_v26  ;;  %v7630_v26 = vpop.f32.mrf.mxu0  ;;  %v561_v9 = vld [vmem:[%s9282_s3 + $0x238] sm:$0xff] }
 0x262   :  { %2395 = vmatpush2.bf16.msra.mxu1 %v5680_v29  ;;  %v2363_v29 = vpop.f32.mrf.mxu0 }
 0x263   :  { %2396 = vmatprep.subr.bf16.mxu1 %v5673_v43  ;;  %v5610_v43 = vcombine.low %v493_v20, %v497_v22  ;;  %v5674_v20 = vcombine.low %v557_v7, %v561_v9 }
 0x264   :  { %v2364_v31 = vpop.f32.mrf.mxu0 }
 0x266   :  { %2397 = vmatpush2.bf16.msra.mxu1 %v5672_v34  ;;  %v605_v34 = vld [vmem:[%s9282_s3 + $0x398] sm:$0xff] }
 0x267   :  { %2488 = vmatprep.subr.bf16.mxu1 %v5667_v35  ;;  %v5723_v36 = vcombine.high %v605_v34, %v609_v46 }
 0x269   :  { %2399 = vmatmul.mubr.bf16.vlgmr.msra.gmra.mxu1 %v7230_v55 }
 0x26a   :  { %2408 = vmatprep.mubr.bf16.mxu1 %v7263_v8  ;;  %2489 = vmatpush1.bf16.msra.mxu1 %v5666_v38  ;;  %v5722_v38 = vcombine.low %v605_v34, %v609_v46 }
 0x26b   :  { %2490 = vmatprep.subr.bf16.mxu1 %v5659_v40  ;;  %v5715_v40 = vcombine.high %v597_v15, %v601_v37 }
 0x26e   :  { %2491 = vmatpush1.bf16.msra.mxu1 %v5658_v48  ;;  %v5714_v48 = vcombine.low %v597_v15, %v601_v37 }
 0x26f   :  { %2492 = vmatprep.subr.bf16.mxu1 %v5651_v50  ;;  %v5707_v50 = vcombine.high %v589_v21, %v593_v41 }
 0x271   :  { %2409 = vmatmul.mubr.bf16.gmra.mxu1 %v7265_v10 }
 0x272   :  { %2418 = vmatprep.mubr.bf16.mxu1 %v7308_v45  ;;  %2493 = vmatpush1.bf16.msra.mxu1 %v5650_v57  ;;  %v5706_v57 = vcombine.low %v589_v21, %v593_v41  ;;  %v6327_v21 = vld [vmem:[%s9280_s2 + $0x164] ss:$8 sps:$4 sm:$0xff]  }
 0x273   :  { %2494 = vmatprep.subr.bf16.mxu1 %v5643_v58  ;;  %v5699_v58 = vcombine.high %v581_v51, %v585_v52 }
 0x275   :  { %v7680_v22 = vpop.f32.mrf.mxu0 }
 0x276   :  { %2495 = vmatpush1.bf16.msra.mxu1 %v5642_v17  ;;  %v5698_v17 = vcombine.low %v581_v51, %v585_v52 }
 0x277   :  { %2496 = vmatprep.subr.bf16.mxu1 %v5635_v63  ;;  %v5691_v63 = vcombine.high %v573_v59, %v577_v61 }
 0x279   :  { %2419 = vmatmul.mubr.bf16.gmra.mxu1 %v7310_v47 }
 0x27a   :  { %2497 = vmatpush1.bf16.msra.mxu1 %v5634_v6  ;;  %2520 = vmatprep.mubr.bf16.mxu1 %v7228_v54  ;;  %v613_v54 = vld [vmem:[%s9282_s3 + $0x3d8] sm:$0xff]  ;;  %v5690_v6 = vcombine.low %v573_v59, %v577_v61  ;;  %v6333_v59 = vld [vmem:[%s9280_s2 + $0x144] ss:$8 sps:$4 sm:$0xff]   ;;  %v6331_v61 = vld [vmem:[%s9280_s2 + $0x140] ss:$8 sps:$4 sm:$0xff]  }
 0x27b   :  { %2498 = vmatprep.subr.bf16.mxu1 %v5627_v18  ;;  %v5731_v32 = vcombine.high %v613_v54, %v617_v28  ;;  %v5730_v35 = vcombine.low %v613_v54, %v617_v28  ;;  %v5683_v18 = vcombine.high %v565_v2, %v569_v3 }
 0x27e   :  { %2499 = vmatpush1.bf16.msra.mxu1 %v5626_v12  ;;  %v5682_v12 = vcombine.low %v565_v2, %v569_v3  ;;  %v6339_v2 = vld [vmem:[%s9280_s2 + $0x124] ss:$8 sps:$4 sm:$0xff]   ;;  %v6337_v3 = vld [vmem:[%s9280_s2 + $0x120] ss:$8 sps:$4 sm:$0xff]  }
 0x27f   :  { %2500 = vmatprep.subr.bf16.mxu1 %v5619_v14  ;;  %v5675_v14 = vcombine.high %v557_v7, %v561_v9 }
 0x282   :  { %2501 = vmatpush1.bf16.msra.mxu1 %v5618_v25 }
 0x283   :  { %2502 = vmatprep.subr.bf16.mxu1 %v5611_v27  ;;  %v7686_v27 = vpop.f32.mrf.mxu0 }
 0x285   :  { %v7692_v29 = vpop.f32.mrf.mxu0 }
 0x286   :  { %2503 = vmatpush1.bf16.msra.mxu1 %v5610_v43  ;;  %9306 = vst [vmem:[#allocation3_spill] sm:$0xff] %v7692_v29 }
 0x287   :  { %2504 = vmatprep.subr.bf16.mxu1 %v5731_v32 }
 0x28a   :  { %2505 = vmatpush2.bf16.msra.mxu1 %v5730_v35 }
 0x28b   :  { %2506 = vmatprep.subr.bf16.mxu1 %v5723_v36 }
 0x28e   :  { %2507 = vmatpush2.bf16.msra.mxu1 %v5722_v38 }
 0x28f   :  { %2508 = vmatprep.subr.bf16.mxu1 %v5715_v40  ;;  %v6322_v40 = vld [vmem:[%s9280_s2 + $0x170] ss:$8 sps:$4 sm:$0xff]  }
 0x292   :  { %2509 = vmatpush2.bf16.msra.mxu1 %v5714_v48 }
 0x293   :  { %2510 = vmatprep.subr.bf16.mxu1 %v5707_v50  ;;  %v6325_v50 = vld [vmem:[%s9280_s2 + $0x160] ss:$8 sps:$4 sm:$0xff]  }
 0x296   :  { %2511 = vmatpush2.bf16.msra.mxu1 %v5706_v57  ;;  %v6330_v57 = vld [vmem:[%s9280_s2 + $0x154] ss:$8 sps:$4 sm:$0xff]  }
 0x297   :  { %2512 = vmatprep.subr.bf16.mxu1 %v5699_v58  ;;  %v6328_v58 = vld [vmem:[%s9280_s2 + $0x150] ss:$8 sps:$4 sm:$0xff]  }
 0x29a   :  { %2513 = vmatpush2.bf16.msra.mxu1 %v5698_v17  ;;  %v6336_v17 = vld [vmem:[%s9280_s2 + $0x134] ss:$8 sps:$4 sm:$0xff]  }
 0x29b   :  { %2514 = vmatprep.subr.bf16.mxu1 %v5691_v63  ;;  %v6334_v63 = vld [vmem:[%s9280_s2 + $0x130] ss:$8 sps:$4 sm:$0xff]  }
 0x29e   :  { %2515 = vmatpush2.bf16.msra.mxu1 %v5690_v6  ;;  %v6342_v6 = vld [vmem:[%s9280_s2 + $0x114] ss:$8 sps:$4 sm:$0xff]  }
 0x29f   :  { %2516 = vmatprep.subr.bf16.mxu1 %v5683_v18  ;;  %v6340_v18 = vld [vmem:[%s9280_s2 + $0x110] ss:$8 sps:$4 sm:$0xff]  }
 0x2a2   :  { %2517 = vmatpush2.bf16.msra.mxu1 %v5682_v12 }
 0x2a3   :  { %2518 = vmatprep.subr.bf16.mxu1 %v5675_v14  ;;  %v6345_v14 = vld [vmem:[%s9280_s2 + $0x104] ss:$8 sps:$4 sm:$0xff]  }
 0x2a6   :  { %2519 = vmatpush2.bf16.msra.mxu1 %v5674_v20 }
 0x2a9   :  { %2521 = vmatmul.mubr.bf16.vlgmr.msra.gmra.mxu1 %v7230_v55  ;;  %v7683_v25 = vpop.f32.mrf.mxu1  ;;  %v7700_v55 = vpop.f32.mrf.mxu0 }
 0x2aa   :  { %2530 = vmatprep.mubr.bf16.mxu1 %v7263_v8  ;;  %9307 = vst [vmem:[#allocation4_spill] sm:$0xff] %v7700_v55 }
 0x2ab   :  { %v7688_v54 = vpop.f32.mrf.mxu1  ;;  %v7704_v8 = vpop.f32.mrf.mxu0 }
 0x2ac   :  { %9308 = vst [vmem:[#allocation5_spill] sm:$0xff] %v7704_v8 }
 0x2ad   :  { %v7690_v28 = vpop.f32.mrf.mxu1  ;;  %v7706_v34 = vpop.f32.mrf.mxu0 }
 0x2ae   :  { %9309 = vst [vmem:[#allocation6_spill] sm:$0xff] %v7706_v34 }
 0x2af   :  { %v7694_v43 = vpop.f32.mrf.mxu1  ;;  %v7710_v35 = vpop.f32.mrf.mxu0 }
 0x2b0   :  { %9310 = vst [vmem:[#allocation7_spill] sm:$0xff] %v7710_v35 }
 0x2b1   :  { %2531 = vmatmul.mubr.bf16.gmra.mxu1 %v7265_v10  ;;  %v7697_v31 = vpop.f32.mrf.mxu1  ;;  %v7713_v36 = vpop.f32.mrf.mxu0 }
 0x2b2   :  { %2540 = vmatprep.mubr.bf16.mxu1 %v7308_v45  ;;  %9311 = vst [vmem:[#allocation8_spill] sm:$0xff] %v7713_v36 }
 0x2b3   :  { %v7702_v32 = vpop.f32.mrf.mxu1  ;;  %v7717_v15 = vpop.f32.mrf.mxu0 }
 0x2b4   :  { %9312 = vst [vmem:[#allocation9_spill] sm:$0xff] %v7717_v15 }
 0x2b5   :  { %v7708_v46 = vpop.f32.mrf.mxu1  ;;  %v7721_v37 = vpop.f32.mrf.mxu0 }
 0x2b6   :  { %9313 = vst [vmem:[#allocation10_spill] sm:$0xff] %v7721_v37 }
 0x2b7   :  { %v7715_v10 = vpop.f32.mrf.mxu1  ;;  %v2485_v41 = vpop.f32.mrf.mxu0 }
 0x2b9   :  { %2541 = vmatmul.mubr.bf16.gmra.mxu1 %v7310_v47  ;;  %v6324_v47 = vld [vmem:[%s9280_s2 + $0x174] ss:$8 sps:$4 sm:$0xff]   ;;  %v2486_v51 = vpop.f32.mrf.mxu0 }
 0x2ba   :  { %2989 = vmatprep.subr.bf16.mxu1 %v6324_v47  ;;  %v6343_v47 = vld [vmem:[%s9280_s2 + $0x100] ss:$8 sps:$4 sm:$0xff]  }
 0x2bb   :  { %2990 = vmatpush1.bf16.msra.mxu1 %v6322_v40 }
 0x2bc   :  { %2991 = vmatprep.subr.bf16.mxu1 %v6327_v21 }
 0x2bf   :  { %v7719_v45 = vpop.f32.mrf.mxu1  ;;  %2992 = vmatpush1.bf16.msra.mxu1 %v6325_v50 }
 0x2c0   :  { %2993 = vmatprep.subr.bf16.mxu1 %v6330_v57 }
 0x2c1   :  { %v7723_v38 = vpop.f32.mrf.mxu1 }
 0x2c3   :  { %v2180_v48 = vpop.f32.mrf.mxu1  ;;  %2994 = vmatpush1.bf16.msra.mxu1 %v6328_v58 }
 0x2c4   :  { %2995 = vmatprep.subr.bf16.mxu1 %v6333_v59  ;;  %v6348_v48 = vld [vmem:[%s9280_s2 + $0x1f4] ss:$8 sps:$4 sm:$0xff]   ;;  %v6351_v59 = vld [vmem:[%s9280_s2 + $0x1e4] ss:$8 sps:$4 sm:$0xff]  }
 0x2c5   :  { %v2181_v52 = vpop.f32.mrf.mxu1 }
 0x2c6   :  { %v6346_v52 = vld [vmem:[%s9280_s2 + $0x1f0] ss:$8 sps:$4 sm:$0xff]  }
 0x2c7   :  { %2996 = vmatpush1.bf16.msra.mxu1 %v6331_v61 }
 0x2c8   :  { %2997 = vmatprep.subr.bf16.mxu1 %v6336_v17  ;;  %v6349_v17 = vld [vmem:[%s9280_s2 + $0x1e0] ss:$8 sps:$4 sm:$0xff]  }
 0x2cb   :  { %2998 = vmatpush1.bf16.msra.mxu1 %v6334_v63 }
 0x2cc   :  { %2999 = vmatprep.subr.bf16.mxu1 %v6339_v2 }
 0x2cf   :  { %3000 = vmatpush1.bf16.msra.mxu1 %v6337_v3  ;;  %v6354_v3 = vld [vmem:[%s9280_s2 + $0x1d4] ss:$8 sps:$4 sm:$0xff]  }
 0x2d0   :  { %3001 = vmatprep.subr.bf16.mxu1 %v6342_v6 }
 0x2d3   :  { %3002 = vmatpush1.bf16.msra.mxu1 %v6340_v18  ;;  %v6352_v18 = vld [vmem:[%s9280_s2 + $0x1d0] ss:$8 sps:$4 sm:$0xff]  }
 0x2d4   :  { %3003 = vmatprep.subr.bf16.mxu1 %v6345_v14 }
 0x2d7   :  { %3004 = vmatpush1.bf16.msra.mxu1 %v6343_v47 }
 0x2d8   :  { %3005 = vmatprep.subr.bf16.mxu1 %v6348_v48 }
 0x2db   :  { %3006 = vmatpush2.bf16.msra.mxu1 %v6346_v52  ;;  %v6357_v52 = vld [vmem:[%s9280_s2 + $0x1c4] ss:$8 sps:$4 sm:$0xff]  }
 0x2dc   :  { %3007 = vmatprep.subr.bf16.mxu1 %v6351_v59 }
 0x2df   :  { %3008 = vmatpush2.bf16.msra.mxu1 %v6349_v17  ;;  %v6355_v17 = vld [vmem:[%s9280_s2 + $0x1c0] ss:$8 sps:$4 sm:$0xff]  }
 0x2e0   :  { %3009 = vmatprep.subr.bf16.mxu1 %v6354_v3 }
 0x2e3   :  { %3010 = vmatpush2.bf16.msra.mxu1 %v6352_v18  ;;  %v6360_v18 = vld [vmem:[%s9280_s2 + $0x1b4] ss:$8 sps:$4 sm:$0xff]  }
 0x2e4   :  { %v7767_v7 = vpop.f32.mrf.mxu0  ;;  %3011 = vmatprep.subr.bf16.mxu1 %v6357_v52  ;;  %v6367_v52 = vld [vmem:[%s9280_s2 + $0x180] ss:$8 sps:$4 sm:$0xff]  }
 0x2e6   :  { %v7771_v12 = vpop.f32.mrf.mxu0 }
 0x2e7   :  { %3012 = vmatpush2.bf16.msra.mxu1 %v6355_v17  ;;  %v748_v17 = vlaneseq }
 0x2e8   :  { %v7778_v40 = vpop.f32.mrf.mxu0  ;;  %3013 = vmatprep.subr.bf16.mxu1 %v6360_v18 }
 0x2e9   :  { %v7769_v9 = vpop.f32.mrf.mxu1  ;;  %9314 = vst [vmem:[#allocation11_spill] sm:$0xff] %v7778_v40 }
 0x2ea   :  { %v7785_v41 = vpop.f32.mrf.mxu0 }
 0x2eb   :  { %v7776_v20 = vpop.f32.mrf.mxu1  ;;  %9315 = vst [vmem:[#allocation12_spill] sm:$0xff] %v7785_v41 }
 0x2ec   :  { %v7792_v51 = vpop.f32.mrf.mxu0 }
 0x2ed   :  { %v7783_v21 = vpop.f32.mrf.mxu1  ;;  %9316 = vst [vmem:[#allocation13_spill] sm:$0xff] %v7792_v51 }
 0x2ee   :  { %v7799_v58 = vpop.f32.mrf.mxu0 }
 0x2ef   :  { %v7790_v50 = vpop.f32.mrf.mxu1  ;;  %9317 = vst [vmem:[#allocation14_spill] sm:$0xff] %v7799_v58 }
 0x2f0   :  { %v7809_v63 = vpop.f32.mrf.mxu0 }
 0x2f1   :  { %v7797_v57 = vpop.f32.mrf.mxu1  ;;  %9318 = vst [vmem:[#allocation15_spill] sm:$0xff] %v7809_v63 }
 0x2f2   :  { %v7821_v14 = vpop.f32.mrf.mxu0 }
 0x2f3   :  { %v7804_v61 = vpop.f32.mrf.mxu1  ;;  %9319 = vst [vmem:[#allocation16_spill] sm:$0xff] %v7821_v14 }
 0x2f4   :  { %v7825_v48 = vpop.f32.mrf.mxu0 }
 0x2f5   :  { %v7811_v2 = vpop.f32.mrf.mxu1  ;;  %9320 = vst [vmem:[#allocation17_spill] sm:$0xff] %v7825_v48  ;;  %v6358_v48 = vld [vmem:[%s9280_s2 + $0x1b0] ss:$8 sps:$4 sm:$0xff]  }
 0x2f6   :  { %v7835_v49 = vpop.f32.mrf.mxu0  ;;  %3014 = vmatpush2.bf16.msra.mxu1 %v6358_v48  ;;  %v6369_v48 = vld [vmem:[%s9280_s2 + $0x184] ss:$8 sps:$4 sm:$0xff]  }
 0x2f7   :  { %v7816_v6 = vpop.f32.mrf.mxu1  ;;  %9321 = vst [vmem:[#allocation18_spill] sm:$0xff] %v7835_v49  ;;  %v6363_v49 = vld [vmem:[%s9280_s2 + $0x1a4] ss:$8 sps:$4 sm:$0xff]  }
 0x2f8   :  { %v2607_v3 = vpop.f32.mrf.mxu0  ;;  %3015 = vmatprep.subr.bf16.mxu1 %v6363_v49 }
 0x2f9   :  { %v7823_v47 = vpop.f32.mrf.mxu1 }
 0x2fa   :  { %v2608_v36 = vpop.f32.mrf.mxu0 }
 0x2fb   :  { %v7830_v59 = vpop.f32.mrf.mxu1  ;;  %v6366_v36 = vld [vmem:[%s9280_s2 + $0x194] ss:$8 sps:$4 sm:$0xff]  }
 0x2fd   :  { %v2302_v37 = vpop.f32.mrf.mxu1 }
 0x2fe   :  { %v6361_v37 = vld [vmem:[%s9280_s2 + $0x1a0] ss:$8 sps:$4 sm:$0xff]  }
 0x2ff   :  { %v2303_v15 = vpop.f32.mrf.mxu1  ;;  %3016 = vmatpush2.bf16.msra.mxu1 %v6361_v37  ;;  %v7867_v37 = vshrl.u32 %v748_v17, 7 }
 0x300   :  { %v6364_v15 = vld [vmem:[%s9280_s2 + $0x190] ss:$8 sps:$4 sm:$0xff]   ;;  %3017 = vmatprep.subr.bf16.mxu1 %v6366_v36  ;;  %v7877_v36 = vld [vmem:[%s9284_s4] sm:$0xff] }
 0x303   :  { %3018 = vmatpush2.bf16.msra.mxu1 %v6364_v15  ;;  %v9288_v15 = vsub.s32 0, %v7867_v37 }
 0x304   :  { %3019 = vmatprep.subr.bf16.mxu1 %v6369_v48 }
 0x305   :  { %v751_v17 = vrot.slane %v7877_v36, %v9288_v15 }
 0x307   :  { %3020 = vmatpush2.bf16.msra.mxu1 %v6367_v52  ;;  %v9289_v52 = vsub.s32 1, %v7867_v37  ;;  %v2157_v51 = vadd.f32 %v7683_v25, %v751_v17  ;;  %v2161_v41 = vadd.f32 %v7690_v28, %v751_v17 }
 0x309   :  { %v755_v8 = vrot.slane %v7877_v36, %v9289_v52  ;;  %v2167_v52 = vadd.f32 %v7697_v31, %v751_v17  ;;  %v2222_v25 = vadd.f32 %v7512_v0, %v2161_v41  ;;  %v2177_v31 = vadd.f32 %v7719_v45, %v751_v17 }
 0x30b   :  { %v2163_v15 = vadd.f32 %v7694_v43, %v755_v8  ;;  %v2228_v28 = vadd.f32 %v7528_v23, %v2167_v52  ;;  %v2173_v43 = vadd.f32 %v7715_v10, %v755_v8  ;;  %v5862_v0 = vmul.f32 -1.442695, %v2222_v25 }
 0x30c   :  { %v2238_v41 = vadd.f32 %v7554_v30, %v2177_v31 }
 0x30d   :  { %v2234_v10 = vadd.f32 %v7552_v42, %v2173_v43 }
 0x329   :  { %v7861_v49 = vpop.f32.mrf.mxu1 }
 0x32b   :  { %v7863_v3 = vpop.f32.mrf.mxu1 }
 0x32d   :  { %v7865_v18 = vpop.f32.mrf.mxu1 }
 0x32f   :  { %v7869_v14 = vpop.f32.mrf.mxu1 }
 0x331   :  { %v7871_v35 = vpop.f32.mrf.mxu1 }
 0x332   :  { %9322 = vst [vmem:[#allocation19_spill] sm:$0xff] %v7871_v35 }
 0x333   :  { %v7879_v48 = vpop.f32.mrf.mxu1 }
 0x334   :  { %9323 = vst [vmem:[#allocation20_spill] sm:$0xff] %v7879_v48  ;;  %v2159_v48 = vadd.f32 %v7688_v54, %v755_v8  ;;  %v2224_v54 = vadd.f32 %v7520_v5, %v2163_v15 }
 0x335   :  { %v7882_v63 = vpop.f32.mrf.mxu1 }
 0x336   :  { %9324 = vst [vmem:[#allocation21_spill] sm:$0xff] %v7882_v63  ;;  %v2218_v63 = vadd.f32 %v7496_v53, %v2157_v51  ;;  %v2220_v29 = vadd.f32 %v7504_v60, %v2159_v48  ;;  %v2171_v53 = vadd.f32 %v7708_v46, %v751_v17  ;;  %v9294_v60 = vsub.s32 3, %v7867_v37 }
 0x337   :  { %v7887_v34 = vpop.f32.mrf.mxu1  ;;  %v5864_v46 = vmul.f32 -1.442695, %v2228_v28 }
 0x338   :  { %9325 = vst [vmem:[#allocation22_spill] sm:$0xff] %v7887_v34  ;;  %v5860_v40 = vmul.f32 -1.442695, %v2218_v63  ;;  %v2232_v23 = vadd.f32 %v7544_v24, %v2171_v53  ;;  %v7924_v45 = vrot.slane %v7877_v36, %v9294_v60 }
 0x339   :  { %v7892_v58 = vpop.f32.mrf.mxu1 }
 0x33a   :  { %9326 = vst [vmem:[#allocation23_spill] sm:$0xff] %v7892_v58  ;;  %v9295_v58 = vsub.s32 2, %v7867_v37  ;;  %6374 = vpow2.f32 %v5860_v40  ;;  %v5866_v24 = vmul.f32 -1.442695, %v2232_v23  ;;  %v2281_v42 = vadd.f32 %v7776_v20, %v7924_v45 }
 0x33b   :  { %v7895_v35 = vpop.f32.mrf.mxu1 }
 0x33c   :  { %9327 = vst [vmem:[#allocation24_spill] sm:$0xff] %v7895_v35  ;;  %v2169_v35 = vadd.f32 %v7702_v32, %v755_v8  ;;  %v2179_v32 = vadd.f32 %v7723_v38, %v755_v8  ;;  %v5868_v38 = vmul.f32 -1.442695, %v2238_v41 }
 0x33d   :  { %v2424_v55 = vpop.f32.mrf.mxu1 }
 0x33e   :  { %v5861_v55 = vmul.f32 -1.442695, %v2220_v29  ;;  %v2230_v5 = vadd.f32 %v7536_v13, %v2169_v35  ;;  %v5863_v29 = vmul.f32 -1.442695, %v2224_v54  ;;  %v2240_v13 = vadd.f32 %v7562_v33, %v2179_v32 }
 0x33f   :  { %v2425_v34 = vpop.f32.mrf.mxu1  ;;  %v5867_v35 = vmul.f32 -1.442695, %v2234_v10  ;;  %v2342_v33 = vadd.f32 %v7579_v44, %v2281_v42 }
 0x340   :  { %v7915_v34 = vrot.slane %v7877_v36, %v9295_v58  ;;  %6376 = vpow2.f32 %v5861_v55  ;;  %v5865_v40 = vmul.f32 -1.442695, %v2230_v5  ;;  %v5869_v51 = vmul.f32 -1.442695, %v2240_v13 }
 0x341   :  { %6378 = vpow2.f32 %v5862_v0  ;;  %v5871_v52 = vmul.f32 -1.442695, %v2342_v33 }
 0x342   :  { %v2279_v8 = vadd.f32 %v7769_v9, %v7915_v34  ;;  %6380 = vpow2.f32 %v5863_v29  ;;  %v2283_v30 = vadd.f32 %v7783_v21, %v7915_v34  ;;  %v2285_v9 = vadd.f32 %v7790_v50, %v7924_v45 }
 0x343   :  { %6382 = vpow2.f32 %v5864_v46  ;;  %v2289_v25 = vadd.f32 %v7797_v57, %v7915_v34  ;;  %v2293_v32 = vadd.f32 %v7811_v2, %v7915_v34  ;;  %v2299_v13 = vadd.f32 %v7823_v47, %v7915_v34 }
 0x344   :  { %6384 = vpow2.f32 %v5865_v40  ;;  %v2340_v63 = vadd.f32 %v7570_v39, %v2279_v8  ;;  %v2344_v20 = vadd.f32 %v7588_v56, %v2283_v30  ;;  %v2346_v39 = vadd.f32 %v7597_v62, %v2285_v9 }
 0x345   :  { %6386 = vpow2.f32 %v5866_v24  ;;  %v2350_v43 = vadd.f32 %v7600_v1, %v2289_v25  ;;  %v2291_v62 = vadd.f32 %v7804_v61, %v7924_v45  ;;  %v2295_v1 = vadd.f32 %v7816_v6, %v7924_v45 }
 0x346   :  { %6388 = vpow2.f32 %v5867_v35  ;;  %v5870_v15 = vmul.f32 -1.442695, %v2340_v63  ;;  %v5872_v44 = vmul.f32 -1.442695, %v2344_v20  ;;  %v5873_v28 = vmul.f32 -1.442695, %v2346_v39 }
 0x347   :  { %6390 = vpow2.f32 %v5868_v38  ;;  %v6375_v48 = vpop.eup %6374  ;;  %v5874_v23 = vmul.f32 -1.442695, %v2350_v43  ;;  %v2352_v61 = vadd.f32 %v7608_v4, %v2291_v62  ;;  %v2354_v2 = vadd.f32 %v7610_v19, %v2293_v32 }
 0x348   :  { %6392 = vpow2.f32 %v5869_v51  ;;  %v2640_v21 = vadd.f32 1.0, %v6375_v48  ;;  %v2356_v35 = vadd.f32 %v7619_v11, %v2295_v1  ;;  %v2301_v6 = vadd.f32 %v7830_v59, %v7924_v45 }
 0x349   :  { %6394 = vpow2.f32 %v5870_v15  ;;  %v9293_v38 = vsub.s32 4, %v7867_v37  ;;  %v9292_v4 = vsub.s32 6, %v7867_v37  ;;  %v5875_v47 = vmul.f32 -1.442695, %v2352_v61  ;;  %v9328_v61 = vld [vmem:[#allocation11_spill] sm:$0xff] }
 0x34a   :  { %6396 = vpow2.f32 %v5871_v52  ;;  %v2360_v34 = vadd.f32 %v7622_v16, %v2299_v13  ;;  %v9291_v19 = vsub.s32 5, %v7867_v37  ;;  %v5876_v63 = vmul.f32 -1.442695, %v2354_v2  ;;  %v9329_v2 = vld [vmem:[#allocation3_spill] sm:$0xff] }
 0x34b   :  { %6398 = vrcp.f32 %v2640_v21  ;;  %v9290_v11 = vsub.s32 7, %v7867_v37  ;;  %v5877_v59 = vmul.f32 -1.442695, %v2356_v35  ;;  %v2362_v45 = vadd.f32 %v7630_v26, %v2301_v6 }
 0x34c   :  { %6400 = vpow2.f32 %v5872_v44  ;;  %v7965_v9 = vrot.slane %v7877_v36, %v9293_v38  ;;  %v7970_v16 = vrot.slane %v7877_v36, %v9292_v4  ;;  %v5878_v48 = vmul.f32 -1.442695, %v2360_v34  ;;  %v9331_v34 = vld [vmem:[#allocation4_spill] sm:$0xff] }
 0x34d   :  { %v6377_v17 = vpop.eup %6376  ;;  %v7975_v20 = vrot.slane %v7877_v36, %v9291_v19  ;;  %v5879_v25 = vmul.f32 -1.442695, %v2362_v45  ;;  %v9333_v45 = vld [vmem:[#allocation20_spill] sm:$0xff] }
 0x34e   :  { %v6379_v54 = vpop.eup %6378  ;;  %v2641_v55 = vadd.f32 1.0, %v6377_v17  ;;  %v7980_v17 = vrot.slane %v7877_v36, %v9290_v11  ;;  %v2401_v44 = vadd.f32 %v7861_v49, %v7965_v9  ;;  %v2405_v49 = vadd.f32 %v7865_v18, %v7965_v9 }
 0x34f   :  { %v6381_v53 = vpop.eup %6380  ;;  %v2642_v56 = vadd.f32 1.0, %v6379_v54 }
 0x350   :  { %v6383_v50 = vpop.eup %6382  ;;  %v2643_v0 = vadd.f32 1.0, %v6381_v53  ;;  %6402 = vrcp.f32 %v2641_v55  ;;  %v2462_v32 = vadd.f32 %v7680_v22, %v2401_v44 }
 0x351   :  { %v6385_v31 = vpop.eup %6384  ;;  %v2644_v5 = vadd.f32 1.0, %v6383_v50  ;;  %6404 = vpow2.f32 %v5873_v28  ;;  %v2403_v28 = vadd.f32 %v7863_v3, %v7975_v20 }
 0x352   :  { %v6387_v57 = vpop.eup %6386  ;;  %6406 = vrcp.f32 %v2642_v56  ;;  %v2645_v10 = vadd.f32 1.0, %v6385_v31 }
 0x353   :  { %v6389_v29 = vpop.eup %6388  ;;  %6408 = vrcp.f32 %v2643_v0  ;;  %v2646_v40 = vadd.f32 1.0, %v6387_v57 }
 0x354   :  { %v6391_v46 = vpop.eup %6390  ;;  %6410 = vrcp.f32 %v2644_v5  ;;  %v2647_v8 = vadd.f32 1.0, %v6389_v29 }
 0x355   :  { %v6393_v41 = vpop.eup %6392  ;;  %v2648_v24 = vadd.f32 1.0, %v6391_v46  ;;  %6412 = vpow2.f32 %v5874_v23  ;;  %v2407_v46 = vadd.f32 %v7869_v14, %v7975_v20  ;;  %v9330_v14 = vld [vmem:[#allocation12_spill] sm:$0xff] }
 0x356   :  { %6414 = vrcp.f32 %v2645_v10  ;;  %v2649_v42 = vadd.f32 1.0, %v6393_v41  ;;  %v6395_v51 = vpop.eup %6394 }
 0x357   :  { %6416 = vrcp.f32 %v2646_v40  ;;  %v6397_v30 = vpop.eup %6396  ;;  %v2700_v33 = vadd.f32 1.0, %v6395_v51 }
 0x358   :  { %6418 = vrcp.f32 %v2647_v8  ;;  %v6399_v15 = vpop.eup %6398  ;;  %v2701_v52 = vadd.f32 1.0, %v6397_v30  ;;  %v9332_v30 = vld [vmem:[#allocation19_spill] sm:$0xff] }
 0x359   :  { %6420 = vrcp.f32 %v2648_v24  ;;  %v6401_v26 = vpop.eup %6400  ;;  %v2466_v24 = vadd.f32 %v9329_v2, %v2405_v49 }
 0x35a   :  { %6422 = vrcp.f32 %v2649_v42  ;;  %v2702_v50 = vadd.f32 1.0, %v6401_v26 }
 0x35b   :  { %6424 = vpow2.f32 %v5875_v47 }
 0x35c   :  { %6426 = vpow2.f32 %v5876_v63  ;;  %v2468_v63 = vadd.f32 %v9331_v34, %v2407_v46  ;;  %v9343_v34 = vld [vmem:[#allocation16_spill] sm:$0xff] }
 0x35d   :  { %v6403_v39 = vpop.eup %6402  ;;  %6428 = vpow2.f32 %v5877_v59  ;;  %v2411_v59 = vadd.f32 %v9332_v30, %v7965_v9 }
 0x35e   :  { %v6405_v54 = vpop.eup %6404  ;;  %6430 = vrcp.f32 %v2700_v33  ;;  %v2413_v33 = vadd.f32 %v9333_v45, %v7975_v20 }
 0x35f   :  { %v6407_v55 = vpop.eup %6406  ;;  %6432 = vpow2.f32 %v5878_v48  ;;  %v2703_v62 = vadd.f32 1.0, %v6405_v54  ;;  %v9334_v54 = vld [vmem:[#allocation21_spill] sm:$0xff] }
 0x360   :  { %v6409_v36 = vpop.eup %6408  ;;  %6434 = vrcp.f32 %v2701_v52  ;;  %v2415_v44 = vadd.f32 %v9334_v54, %v7965_v9 }
 0x361   :  { %v6411_v0 = vpop.eup %6410  ;;  %6436 = vpow2.f32 %v5879_v25 }
 0x362   :  { %v6413_v5 = vpop.eup %6412  ;;  %6438 = vrcp.f32 %v2702_v50 }
 0x363   :  { %v6415_v1 = vpop.eup %6414  ;;  %6440 = vrcp.f32 %v2703_v62 }
 0x364   :  { %v6417_v41 = vpop.eup %6416 }
 0x365   :  { %v6419_v8 = vpop.eup %6418 }
 0x366   :  { %v8000_v6 = vpop.eup %6420 }
 0x367   :  { %v8003_v47 = vpop.eup %6422 }
 0x368   :  { %v6425_v26 = vpop.eup %6424 }
 0x369   :  { %v2522_v21 = vpop.f32.mrf.mxu1 }
 0x36a   :  { %v2523_v53 = vadd.f32 %v2522_v21, %v7970_v16  ;;  %v6427_v21 = vpop.eup %6426 }
 0x36b   :  { %v2524_v43 = vpop.f32.mrf.mxu1  ;;  %v2706_v30 = vadd.f32 1.0, %v6427_v21  ;;  %v9347_v21 = vld [vmem:[#allocation9_spill] sm:$0xff] }
 0x36c   :  { %v2584_v56 = vadd.f32 %v7767_v7, %v2523_v53  ;;  %v2525_v31 = vadd.f32 %v2524_v43, %v7980_v17  ;;  %v2464_v7 = vadd.f32 %v7686_v27, %v2403_v28  ;;  %v9335_v53 = vld [vmem:[#allocation13_spill] sm:$0xff]  ;;  %v6429_v28 = vpop.eup %6428 }
 0x36d   :  { %v2526_v57 = vpop.f32.mrf.mxu1  ;;  %v6431_v49 = vpop.eup %6430 }
 0x36e   :  { %v2730_v29 = vmul.f32 %v6399_v15, %v2584_v56  ;;  %v2586_v3 = vadd.f32 %v7771_v12, %v2525_v31  ;;  %v2527_v23 = vadd.f32 %v2526_v57, %v7970_v16  ;;  %v2704_v12 = vadd.f32 1.0, %v6413_v5  ;;  %v9336_v56 = vld [vmem:[#allocation14_spill] sm:$0xff]  ;;  %v9337_v57 = vld [vmem:[#allocation5_spill] sm:$0xff]  ;;  %v6433_v46 = vpop.eup %6432 }
 0x36f   :  { %v2528_v10 = vpop.f32.mrf.mxu1  ;;  %v9338_v5 = vld [vmem:[#allocation6_spill] sm:$0xff] }
 0x370   :  { %v2740_v40 = vadd.f32 %v2730_v29, %v2462_v32  ;;  %v2731_v18 = vmul.f32 %v6403_v39, %v2586_v3  ;;  %v2588_v13 = vadd.f32 %v9328_v61, %v2527_v23  ;;  %v2529_v22 = vadd.f32 %v2528_v10, %v7980_v17  ;;  %v9339_v29 = vld [vmem:[#allocation22_spill] sm:$0xff] }
 0x371   :  { %v2532_v35 = vpop.f32.mrf.mxu1  ;;  %v2474_v32 = vadd.f32 %v9338_v5, %v2413_v33  ;;  %v2417_v3 = vadd.f32 %v9339_v29, %v7975_v20  ;;  %v6575_v29 = vld [vmem:[%s9281_s0 + $0x8] sm:$0xff] }
 0x372   :  { %6442 = vtanh.f32 %v2740_v40  ;;  %v2741_v27 = vadd.f32 %v2731_v18, %v2464_v7  ;;  %v2732_v42 = vmul.f32 %v6407_v55, %v2588_v13  ;;  %v2590_v51 = vadd.f32 %v9330_v14, %v2529_v22  ;;  %v9340_v40 = vld [vmem:[#allocation15_spill] sm:$0xff]  ;;  %v6435_v13 = vpop.eup %6434 }
 0x373   :  { %v2533_v15 = vadd.f32 %v2532_v35, %v7970_v16  ;;  %v2534_v48 = vpop.f32.mrf.mxu1  ;;  %v2705_v22 = vadd.f32 1.0, %v6425_v26  ;;  %v6437_v14 = vpop.eup %6436 }
 0x374   :  { %6444 = vtanh.f32 %v2741_v27  ;;  %v2742_v52 = vadd.f32 %v2732_v42, %v2466_v24  ;;  %v2733_v39 = vmul.f32 %v6409_v36, %v2590_v51  ;;  %v2535_v25 = vadd.f32 %v2534_v48, %v7980_v17  ;;  %v9342_v24 = vld [vmem:[#allocation23_spill] sm:$0xff] }
 0x375   :  { %6446 = vrcp.f32 %v2704_v12  ;;  %v2594_v55 = vadd.f32 %v9335_v53, %v2533_v15  ;;  %v2536_v50 = vpop.f32.mrf.mxu1  ;;  %v2472_v36 = vadd.f32 %v9337_v57, %v2411_v59  ;;  %v9341_v12 = vld [vmem:[#allocation7_spill] sm:$0xff]  ;;  %v2421_v35 = vadd.f32 %v9342_v24, %v7965_v9  ;;  %v9344_v59 = vld [vmem:[#allocation8_spill] sm:$0xff]  ;;  %v6439_v15 = vpop.eup %6438 }
 0x376   :  { %6448 = vtanh.f32 %v2742_v52  ;;  %v2743_v43 = vadd.f32 %v2733_v39, %v2468_v63  ;;  %v2596_v31 = vadd.f32 %v9336_v56, %v2535_v25  ;;  %v2537_v62 = vadd.f32 %v2536_v50, %v7970_v16  ;;  %v9345_v52 = vld [vmem:[#allocation17_spill] sm:$0xff]  ;;  %v9346_v25 = vld [vmem:[#allocation24_spill] sm:$0xff] }
 0x377   :  { %v2734_v23 = vmul.f32 %v6411_v0, %v2594_v55  ;;  %v2538_v7 = vpop.f32.mrf.mxu1  ;;  %v2476_v2 = vadd.f32 %v9341_v12, %v2415_v44  ;;  %v2478_v45 = vadd.f32 %v9344_v59, %v2417_v3  ;;  %v2707_v39 = vadd.f32 1.0, %v6429_v28  ;;  %v6577_v12 = vld [vmem:[%s9281_s0 + $0x18] sm:$0xff] }
 0x378   :  { %6450 = vtanh.f32 %v2743_v43  ;;  %v2735_v10 = vmul.f32 %v6415_v1, %v2596_v31  ;;  %v2598_v18 = vadd.f32 %v9340_v40, %v2537_v62  ;;  %v2539_v61 = vadd.f32 %v2538_v7, %v7980_v17  ;;  %v6576_v40 = vld [vmem:[%s9281_s0 + $0x10] sm:$0xff] }
 0x379   :  { %v2744_v27 = vadd.f32 %v2734_v23, %v2472_v36  ;;  %v2542_v42 = vpop.f32.mrf.mxu1  ;;  %v2482_v53 = vadd.f32 %v9347_v21, %v2421_v35  ;;  %v2708_v62 = vadd.f32 1.0, %v6433_v46  ;;  %v9349_v36 = vld [vmem:[#allocation10_spill] sm:$0xff]  ;;  %v2709_v46 = vadd.f32 1.0, %v6437_v14 }
 0x37a   :  { %v2745_v51 = vadd.f32 %v2735_v10, %v2474_v32  ;;  %v2736_v0 = vmul.f32 %v6417_v41, %v2598_v18  ;;  %v2600_v63 = vadd.f32 %v9343_v34, %v2539_v61  ;;  %v2543_v1 = vadd.f32 %v2542_v42, %v7970_v16  ;;  %v6441_v16 = vpop.eup %6440 }
 0x37b   :  { %6452 = vtanh.f32 %v2744_v27  ;;  %v2544_v33 = vpop.f32.mrf.mxu1  ;;  %v2423_v41 = vadd.f32 %v9346_v25, %v7975_v20  ;;  %v6574_v20 = vld [vmem:[%s9281_s0] sm:$0xff] }
 0x37c   :  { %6454 = vtanh.f32 %v2745_v51  ;;  %v2746_v48 = vadd.f32 %v2736_v0, %v2476_v2  ;;  %v2737_v26 = vmul.f32 %v6419_v8, %v2600_v63  ;;  %v2604_v9 = vadd.f32 %v9345_v52, %v2543_v1  ;;  %v9348_v8 = vld [vmem:[#allocation18_spill] sm:$0xff] }
 0x37d   :  { %6456 = vrcp.f32 %v2705_v22  ;;  %v2545_v54 = vadd.f32 %v2544_v33, %v7980_v17  ;;  %v2546_v44 = vpop.f32.mrf.mxu1  ;;  %v2484_v5 = vadd.f32 %v9349_v36, %v2423_v41  ;;  %v6579_v63 = vld [vmem:[%s9281_s0 + $0x28] sm:$0xff]  ;;  %v6581_v41 = vld [vmem:[%s9281_s0 + $0x38] sm:$0xff] }
 0x37e   :  { %6458 = vtanh.f32 %v2746_v48  ;;  %v2747_v55 = vadd.f32 %v2737_v26, %v2478_v45  ;;  %v2738_v50 = vmul.f32 %v8000_v6, %v2604_v9  ;;  %v6580_v48 = vld [vmem:[%s9281_s0 + $0x30] sm:$0xff] }
 0x37f   :  { %v6443_v43 = vpop.eup %6442  ;;  %6460 = vrcp.f32 %v2706_v30  ;;  %v2606_v56 = vadd.f32 %v9348_v8, %v2545_v54  ;;  %v2547_v31 = vpop.f32.mrf.mxu1 }
 0x380   :  { %v2760_v28 = vsub.f32 %v6574_v20, %v6443_v43  ;;  %6462 = vtanh.f32 %v2747_v55  ;;  %v2748_v17 = vadd.f32 %v2738_v50, %v2482_v53  ;;  %v6582_v50 = vld [vmem:[%s9281_s0 + $0x40] sm:$0x3f]  ;;  %v6583_v20 = vld [vmem:[%s9281_s0 + $0x48] sm:$0x3f] }
 0x381   :  { %v6445_v57 = vpop.eup %6444  ;;  %6464 = vrcp.f32 %v2707_v39  ;;  %v2739_v32 = vmul.f32 %v8003_v47, %v2606_v56 }
 0x382   :  { %v6447_v6 = vpop.eup %6446  ;;  %6466 = vtanh.f32 %v2748_v17  ;;  %v2761_v3 = vsub.f32 %v6575_v29, %v6445_v57  ;;  %v2770_v23 = vmul.f32 %v6431_v49, %v2760_v28 }
 0x383   :  { %v6449_v7 = vpop.eup %6448  ;;  %v2749_v10 = vadd.f32 %v2739_v32, %v2484_v5  ;;  %6468 = vrcp.f32 %v2708_v62 }
 0x384   :  { %v2762_v18 = vsub.f32 %v6576_v40, %v6449_v7  ;;  %v2771_v61 = vmul.f32 %v6435_v13, %v2761_v3  ;;  %v8047_v22 = vadd.f32 %v6443_v43, %v2770_v23  ;;  %v6578_v13 = vld [vmem:[%s9281_s0 + $0x20] sm:$0xff] }
 0x385   :  { %v6451_v47 = vpop.eup %6450  ;;  %6470 = vtanh.f32 %v2749_v10 }
 0x386   :  { %9350 = vst [vmem:[#allocation11_spill] sm:$0xff] %v8047_v22  ;;  %v2763_v2 = vsub.f32 %v6577_v12, %v6451_v47  ;;  %v2772_v49 = vmul.f32 %v6439_v15, %v2762_v18  ;;  %v8052_v24 = vadd.f32 %v6445_v57, %v2771_v61  ;;  %6472 = vrcp.f32 %v2709_v46 }
 0x388   :  { %9351 = vst [vmem:[#allocation3_spill] sm:$0xff] %v8052_v24  ;;  %v6453_v35 = vpop.eup %6452  ;;  %v2773_v27 = vmul.f32 %v6441_v16, %v2763_v2  ;;  %v8054_v42 = vadd.f32 %v6449_v7, %v2772_v49 }
 0x389   :  { %v6455_v14 = vpop.eup %6454  ;;  %v2764_v51 = vsub.f32 %v6578_v13, %v6453_v35  ;;  %v3417_v13 = vld [vmem:[%s9282_s3 + $0x5e0] sm:$0xff] }
 0x38a   :  { %9352 = vst [vmem:[#allocation12_spill] sm:$0xff] %v8054_v42  ;;  %v6457_v0 = vpop.eup %6456  ;;  %v8059_v34 = vadd.f32 %v6451_v47, %v2773_v27  ;;  %v2765_v1 = vsub.f32 %v6579_v63, %v6455_v14  ;;  %v8073_v9 = vpack.c.bf16 %v8054_v42, %v8047_v22 }
 0x38b   :  { %v6459_v30 = vpop.eup %6458  ;;  %v2774_v59 = vmul.f32 %v6447_v6, %v2764_v51  ;;  %v3405_v51 = vld [vmem:[%s9282_s3 + $0x580] sm:$0xff] }
 0x38c   :  { %9353 = vst [vmem:[#allocation4_spill] sm:$0xff] %v8059_v34  ;;  %v6461_v45 = vpop.eup %6460  ;;  %v8066_v33 = vpack.c.bf16 %v8059_v34, %v8052_v24  ;;  %v2775_v15 = vmul.f32 %v6457_v0, %v2765_v1  ;;  %v2766_v26 = vsub.f32 %v6580_v48, %v6459_v30  ;;  %v3409_v0 = vld [vmem:[%s9282_s3 + $0x5a0] sm:$0xff]  ;;  %v9360_v48 = vmov 0.0  }
 0x38d   :  { %v6463_v52 = vpop.eup %6462  ;;  %v8075_v39 = vadd.f32 %v6453_v35, %v2774_v59  ;;  %v3397_v59 = vld [vmem:[%s9282_s3 + $0x540] sm:$0xff] }
 0x38e   :  { %v6465_v25 = vpop.eup %6464  ;;  %3021 = vmatprep.mubr.bf16.mxu1 %v8066_v33  ;;  %v2767_v54 = vsub.f32 %v6581_v41, %v6463_v52  ;;  %v8081_v44 = vadd.f32 %v6455_v14, %v2775_v15  ;;  %v2776_v16 = vmul.f32 %v6461_v45, %v2766_v26  ;;  %v3413_v14 = vld [vmem:[%s9282_s3 + $0x5c0] sm:$0xff]  ;;  %v6149_v26 = vcombine.low %v3405_v51, %v3409_v0 }
 0x38f   :  { %9354 = vst [vmem:[#allocation19_spill] sm:$0xff] %v8075_v39  ;;  %v6467_v21 = vpop.eup %6466  ;;  %3022 = vmatmul.mubr.bf16.vlgmr.msra.gmra.mxu1 %v8073_v9  ;;  %v6158_v63 = vcombine.high %v3413_v14, %v3417_v13  ;;  %v6157_v1 = vcombine.low %v3413_v14, %v3417_v13  ;;  %v3401_v45 = vld [vmem:[%s9282_s3 + $0x560] sm:$0xff] }
 0x390   :  { %9355 = vst [vmem:[#allocation20_spill] sm:$0xff] %v8081_v44  ;;  %v2777_v53 = vmul.f32 %v6465_v25, %v2767_v54  ;;  %v8084_v55 = vadd.f32 %v6459_v30, %v2776_v16  ;;  %v2768_v43 = vsub.f32 %v6582_v50, %v6467_v21  ;;  %v6469_v8 = vpop.eup %6468  ;;  %v6150_v30 = vcombine.high %v3405_v51, %v3409_v0  ;;  %v6584_v15 = vld [vmem:[%s9283_s1] sm:$0xff]  ;;  %v6585_v54 = vld [vmem:[%s9283_s1 + $0x8] sm:$0xff] }
 0x391   :  { %v3389_v25 = vld [vmem:[%s9282_s3 + $0x500] sm:$0xff]  ;;  %v6141_v16 = vcombine.low %v3397_v59, %v3401_v45 }
 0x392   :  { %9356 = vst [vmem:[#allocation21_spill] sm:$0xff] %v8084_v55  ;;  %v6471_v56 = vpop.eup %6470  ;;  %v8089_v31 = vadd.f32 %v6463_v52, %v2777_v53  ;;  %v2778_v62 = vmul.f32 %v6469_v8, %v2768_v43  ;;  %v8102_v5 = vpack.c.bf16 %v8084_v55, %v8075_v39  ;;  %v6142_v52 = vcombine.high %v3397_v59, %v3401_v45  ;;  %v3393_v41 = vld [vmem:[%s9282_s3 + $0x520] sm:$0xff]  ;;  %v6586_v43 = vld [vmem:[%s9283_s1 + $0x10] sm:$0xff] }
 0x393   :  { %v2769_v28 = vsub.f32 %v6583_v20, %v6471_v56  ;;  %v6473_v17 = vpop.eup %6472  ;;  %v3381_v53 = vld [vmem:[%s9282_s3 + $0x4c0] sm:$0xff]  ;;  %v6133_v8 = vcombine.low %v3389_v25, %v3393_v41 }
 0x394   :  { %9357 = vst [vmem:[#allocation13_spill] sm:$0xff] %v8089_v31  ;;  %v8096_v57 = vpack.c.bf16 %v8089_v31, %v8081_v44  ;;  %v8098_v36 = vadd.f32 %v6467_v21, %v2778_v62  ;;  %v6134_v21 = vcombine.high %v3389_v25, %v3393_v41  ;;  %v3385_v50 = vld [vmem:[%s9282_s3 + $0x4e0] sm:$0xff] }
 0x395   :  { %v2779_v32 = vmul.f32 %v6473_v17, %v2769_v28  ;;  %v6126_v62 = vcombine.high %v3381_v53, %v3385_v50  ;;  %v3289_v20 = vld [vmem:[%s9282_s3 + $0x1e0] sm:$0xff] }
 0x396   :  { %9358 = vst [vmem:[#allocation14_spill] sm:$0xff] %v8098_v36  ;;  %3031 = vmatprep.mubr.bf16.mxu1 %v8096_v57  ;;  %v2794_v23 = vpack.c.bf16 %v8098_v36, %v8098_v36  ;;  %v3373_v28 = vld [vmem:[%s9282_s3 + $0x480] sm:$0xff] }
 0x397   :  { %3032 = vmatmul.mubr.bf16.gmra.mxu1 %v8102_v5  ;;  %v8106_v6 = vadd.f32 %v6471_v56, %v2779_v32  ;;  %v3285_v56 = vld [vmem:[%s9282_s3 + $0x1c0] sm:$0xff] }
 0x398   :  { %v3377_v17 = vld [vmem:[%s9282_s3 + $0x4a0] sm:$0xff]  ;;  %v6029_v32 = vcombine.low %v3285_v56, %v3289_v20 }
 0x399   :  { %9359 = vst [vmem:[#allocation5_spill] sm:$0xff] %v8106_v6  ;;  %v2795_v29 = vpack.c.bf16 %v8106_v6, %v8106_v6  ;;  %v6268_v3 = vpack.c.bf16 %v8106_v6, %v8098_v36  ;;  %v3357_v14 = vld [vmem:[%s9282_s3 + $0x400] sm:$0xff] }
 0x39a   :  { %v3361_v13 = vld [vmem:[%s9282_s3 + $0x420] sm:$0xff] }
 0x39b   :  { %3041 = vmatprep.mubr.bf16.mxu1 %v2795_v29  ;;  %3218 = vst [vmem:[#allocation2 + $0x28] sm:$0x77] %v6268_v3  ;;  %v6030_v29 = vcombine.high %v3285_v56, %v3289_v20  ;;  %v6587_v3 = vld [vmem:[%s9283_s1 + $0x18] sm:$0xff]  ;;  %v3265_v59 = vld [vmem:[%s9282_s3 + $0x120] sm:$0xff] }
 0x39c   :  { %v3477_v45 = vld [vmem:[%s9282_s3 + $0x7c0] sm:$0xff] }
 0x39d   :  { %4861 = vmatprep.subr.bf16.mxu1 %v6030_v29  ;;  %v3253_v25 = vld [vmem:[%s9282_s3 + $0xc0] sm:$0xff] }
 0x39e   :  { %4862 = vmatpush1.bf16.msra.mxu1 %v6029_v32  ;;  %v3461_v20 = vld [vmem:[%s9282_s3 + $0x740] sm:$0xff] }
 0x39f   :  { %3042 = vmatmul.mubr.bf16.gmra.mxu1 %v2794_v23  ;;  %v6125_v23 = vcombine.low %v3381_v53, %v3385_v50 }
 0x44f   :  { %v3023_v7 = vpop.f32.mrf.mxu1 }
 0x451   :  { %v3025_v46 = vpop.f32.mrf.mxu1 }
 0x453   :  { %v3027_v10 = vpop.f32.mrf.mxu1 }
 0x455   :  { %v3029_v40 = vpop.f32.mrf.mxu1 }
 0x457   :  { %v3033_v18 = vpop.f32.mrf.mxu1 }
 0x459   :  { %v3035_v61 = vpop.f32.mrf.mxu1 }
 0x45b   :  { %v3037_v47 = vpop.f32.mrf.mxu1 }
 0x45d   :  { %v3039_v12 = vpop.f32.mrf.mxu1 }
 0x45f   :  { %v3043_v2 = vpop.f32.mrf.mxu1 }
 0x461   :  { %v3045_v49 = vpop.f32.mrf.mxu1 }
 0x462   :  { %5944 = vmatprep.subr.msk.mxu0 %vm310_vm0, %v3045_v49  ;;  %v3269_v49 = vld [vmem:[%s9282_s3 + $0x140] sm:$0xff] }
 0x463   :  { %v3047_v35 = vpop.f32.mrf.mxu1  ;;  %5945 = vmatpush1.msk.msra.mxu0 %vm310_vm0, %v3043_v2  ;;  %v6117_v2 = vcombine.low %v3373_v28, %v3377_v17 }
 0x464   :  { %3080 = vmatprep.subr.mxu0 %v3039_v12  ;;  %v6588_v12 = vld [vmem:[%s9283_s1 + $0x20] sm:$0x3f] }
 0x465   :  { %v3048_v27 = vpop.f32.mrf.mxu1  ;;  %3081 = vmatpush1.msra.mxu0 %v3037_v47 }
 0x466   :  { %3082 = vmatprep.subr.mxu0 %v3035_v61  ;;  %v3369_v61 = vld [vmem:[%s9282_s3 + $0x460] sm:$0xff] }
 0x467   :  { %3083 = vmatpush1.msra.mxu0 %v3033_v18  ;;  %v3365_v18 = vld [vmem:[%s9282_s3 + $0x440] sm:$0xff] }
 0x468   :  { %3084 = vmatprep.subr.mxu0 %v3029_v40  ;;  %v6110_v35 = vcombine.high %v3365_v18, %v3369_v61  ;;  %v3273_v27 = vld [vmem:[%s9282_s3 + $0x160] sm:$0xff] }
 0x469   :  { %3085 = vmatpush1.msra.mxu0 %v3027_v10  ;;  %v6118_v10 = vcombine.high %v3373_v28, %v3377_v17  ;;  %v6013_v51 = vcombine.low %v3269_v49, %v3273_v27  ;;  %v6014_v0 = vcombine.high %v3269_v49, %v3273_v27  ;;  %v3465_v28 = vld [vmem:[%s9282_s3 + $0x760] sm:$0xff] }
 0x46a   :  { %3086 = vmatprep.subr.mxu0 %v3025_v46  ;;  %v3281_v46 = vld [vmem:[%s9282_s3 + $0x1a0] sm:$0xff] }
 0x46b   :  { %3087 = vmatpush1.msra.mxu0 %v3023_v7  ;;  %v3277_v7 = vld [vmem:[%s9282_s3 + $0x180] sm:$0xff] }
 0x46c   :  { %5946 = vmatmul.mubr.msk.f32.vlgmr.msra.gmra.mxu0 %vm294_vm1, %v6584_v15  ;;  %4922 = vmatprep.subr.bf16.mxu0 %v6158_v63  ;;  %v6022_v40 = vcombine.high %v3277_v7, %v3281_v46  ;;  %v6021_v47 = vcombine.low %v3277_v7, %v3281_v46  ;;  %v6109_v63 = vcombine.low %v3365_v18, %v3369_v61  ;;  %v3481_v15 = vld [vmem:[%s9282_s3 + $0x7e0] sm:$0xff] }
 0x46d   :  { %4923 = vmatpush1.bf16.msra.mxu0 %v6157_v1  ;;  %3126 = vmatprep.mubr.f32.mxu0 %v9360_v48  ;;  %v3261_v1 = vld [vmem:[%s9282_s3 + $0x100] sm:$0xff]  ;;  %v6222_v41 = vcombine.high %v3477_v45, %v3481_v15  ;;  %v6205_v61 = vcombine.low %v3461_v20, %v3465_v28 }
 0x46e   :  { %4924 = vmatprep.subr.bf16.mxu0 %v6150_v30  ;;  %4863 = vmatprep.subr.bf16.mxu1 %v6022_v40  ;;  %v6102_v30 = vcombine.high %v3357_v14, %v3361_v13  ;;  %v3241_v7 = vld [vmem:[%s9282_s3 + $0x60] sm:$0xff] }
 0x46f   :  { %4864 = vmatpush1.bf16.msra.mxu1 %v6021_v47  ;;  %v3453_v46 = vld [vmem:[%s9282_s3 + $0x700] sm:$0xff] }
 0x470   :  { %5947 = vmatmul.mubr.msk.f32.gmra.mxu0 %vm294_vm1, %v6585_v54  ;;  %4865 = vmatprep.subr.bf16.mxu1 %v6014_v0  ;;  %v3257_v54 = vld [vmem:[%s9282_s3 + $0xe0] sm:$0xff] }
 0x471   :  { %4925 = vmatpush1.bf16.msra.mxu0 %v6149_v26  ;;  %3132 = vmatprep.mubr.f32.mxu0 %v9360_v48  ;;  %v6006_v26 = vcombine.high %v3261_v1, %v3265_v59  ;;  %v5997_v53 = vcombine.low %v3253_v25, %v3257_v54  ;;  %v5998_v50 = vcombine.high %v3253_v25, %v3257_v54  ;;  %v3229_v47 = vld [vmem:[%s9282_s3] sm:$0xff] }
 0x472   :  { %4926 = vmatprep.subr.bf16.mxu0 %v6142_v52  ;;  %v6101_v52 = vcombine.low %v3357_v14, %v3361_v13  ;;  %v3445_v49 = vld [vmem:[%s9282_s3 + $0x6c0] sm:$0xff] }
 0x473   :  { %4866 = vmatpush1.bf16.msra.mxu1 %v6013_v51  ;;  %v3349_v51 = vld [vmem:[%s9282_s3 + $0x3c0] sm:$0xff] }
 0x474   :  { %5948 = vmatmul.mubr.msk.f32.gmra.mxu0 %vm294_vm1, %v6586_v43  ;;  %4867 = vmatprep.subr.bf16.mxu1 %v6006_v26  ;;  %v6221_v43 = vcombine.low %v3477_v45, %v3481_v15  ;;  %v3429_v25 = vld [vmem:[%s9282_s3 + $0x640] sm:$0xff] }
 0x475   :  { %4927 = vmatpush1.bf16.msra.mxu0 %v6141_v16  ;;  %3138 = vmatprep.mubr.f32.mxu0 %v9360_v48  ;;  %v3469_v16 = vld [vmem:[%s9282_s3 + $0x780] sm:$0xff] }
 0x476   :  { %4928 = vmatprep.subr.bf16.mxu0 %v6134_v21  ;;  %v3473_v21 = vld [vmem:[%s9282_s3 + $0x7a0] sm:$0xff] }
 0x477   :  { %v6214_v56 = vcombine.high %v3469_v16, %v3473_v21  ;;  %v6213_v29 = vcombine.low %v3469_v16, %v3473_v21 }
 0x478   :  { %5949 = vmatmul.mubr.msk.f32.gmra.mxu0 %vm294_vm1, %v6587_v3  ;;  %v3237_v3 = vld [vmem:[%s9282_s3 + $0x40] sm:$0xff] }
 0x479   :  { %4929 = vmatpush1.bf16.msra.mxu0 %v6133_v8  ;;  %3144 = vmatprep.mubr.f32.mxu0 %v9360_v48  ;;  %v6005_v48 = vcombine.low %v3261_v1, %v3265_v59  ;;  %v3245_v8 = vld [vmem:[%s9282_s3 + $0x80] sm:$0xff]  ;;  %v5981_v40 = vcombine.low %v3237_v3, %v3241_v7  ;;  %v5982_v18 = vcombine.high %v3237_v3, %v3241_v7  ;;  %v3414_v3 = vld [vmem:[%s9282_s3 + $0x5c8] sm:$0xff] }
 0x47a   :  { %4930 = vmatprep.subr.bf16.mxu0 %v6126_v62  ;;  %v3249_v62 = vld [vmem:[%s9282_s3 + $0xa0] sm:$0xff] }
 0x47b   :  { %4868 = vmatpush1.bf16.msra.mxu1 %v6005_v48  ;;  %v5989_v17 = vcombine.low %v3245_v8, %v3249_v62  ;;  %v5990_v32 = vcombine.high %v3245_v8, %v3249_v62  ;;  %v3437_v1 = vld [vmem:[%s9282_s3 + $0x680] sm:$0xff] }
 0x47c   :  { %5950 = vmatmul.mubr.msk.f32.gmra.mxu0 %vm294_vm1, %v6588_v12  ;;  %4869 = vmatprep.subr.bf16.mxu1 %v5998_v50  ;;  %v3341_v48 = vld [vmem:[%s9282_s3 + $0x380] sm:$0xff] }
 0x47d   :  { %4931 = vmatpush1.bf16.msra.mxu0 %v6125_v23  ;;  %4954 = vmatprep.mubr.bf16.mxu0 %v8066_v33  ;;  %v6206_v23 = vcombine.high %v3461_v20, %v3465_v28  ;;  %v3421_v8 = vld [vmem:[%s9282_s3 + $0x600] sm:$0xff] }
 0x47e   :  { %4932 = vmatprep.subr.bf16.mxu0 %v6118_v10  ;;  %v3457_v10 = vld [vmem:[%s9282_s3 + $0x720] sm:$0xff] }
 0x47f   :  { %4870 = vmatpush1.bf16.msra.mxu1 %v5997_v53  ;;  %v6198_v12 = vcombine.high %v3453_v46, %v3457_v10  ;;  %v6197_v13 = vcombine.low %v3453_v46, %v3457_v10  ;;  %v3333_v53 = vld [vmem:[%s9282_s3 + $0x340] sm:$0xff] }
 0x480   :  { %4871 = vmatprep.subr.bf16.mxu1 %v5990_v32 }
 0x481   :  { %4933 = vmatpush1.bf16.msra.mxu0 %v6117_v2  ;;  %v3233_v2 = vld [vmem:[%s9282_s3 + $0x20] sm:$0xff] }
 0x482   :  { %4934 = vmatprep.subr.bf16.mxu0 %v6110_v35  ;;  %v3449_v35 = vld [vmem:[%s9282_s3 + $0x6e0] sm:$0xff]  ;;  %v5973_v27 = vcombine.low %v3229_v47, %v3233_v2  ;;  %v5974_v14 = vcombine.high %v3229_v47, %v3233_v2  ;;  %v3406_v47 = vld [vmem:[%s9282_s3 + $0x588] sm:$0xff] }
 0x483   :  { %4872 = vmatpush1.bf16.msra.mxu1 %v5989_v17  ;;  %v6190_v0 = vcombine.high %v3445_v49, %v3449_v35  ;;  %v6189_v15 = vcombine.low %v3445_v49, %v3449_v35  ;;  %v3325_v17 = vld [vmem:[%s9282_s3 + $0x300] sm:$0xff] }
 0x484   :  { %4873 = vmatprep.subr.bf16.mxu1 %v5982_v18 }
 0x485   :  { %4935 = vmatpush1.bf16.msra.mxu0 %v6109_v63  ;;  %v3353_v63 = vld [vmem:[%s9282_s3 + $0x3e0] sm:$0xff] }
 0x486   :  { %4936 = vmatprep.subr.bf16.mxu0 %v6102_v30  ;;  %v3441_v30 = vld [vmem:[%s9282_s3 + $0x6a0] sm:$0xff]  ;;  %v6093_v59 = vcombine.low %v3349_v51, %v3353_v63  ;;  %v6094_v45 = vcombine.high %v3349_v51, %v3353_v63  ;;  %v3402_v63 = vld [vmem:[%s9282_s3 + $0x568] sm:$0xff] }
 0x487   :  { %4874 = vmatpush1.bf16.msra.mxu1 %v5981_v40  ;;  %v6182_v26 = vcombine.high %v3437_v1, %v3441_v30  ;;  %v6181_v21 = vcombine.low %v3437_v1, %v3441_v30  ;;  %v3317_v40 = vld [vmem:[%s9282_s3 + $0x2c0] sm:$0xff] }
 0x488   :  { %4875 = vmatprep.subr.bf16.mxu1 %v5974_v14  ;;  %v3313_v14 = vld [vmem:[%s9282_s3 + $0x2a0] sm:$0xff] }
 0x489   :  { %4937 = vmatpush1.bf16.msra.mxu0 %v6101_v52  ;;  %v3345_v52 = vld [vmem:[%s9282_s3 + $0x3a0] sm:$0xff] }
 0x48a   :  { %4938 = vmatprep.subr.bf16.mxu0 %v6222_v41  ;;  %v3433_v41 = vld [vmem:[%s9282_s3 + $0x660] sm:$0xff]  ;;  %v6085_v54 = vcombine.low %v3341_v48, %v3345_v52  ;;  %v6086_v16 = vcombine.high %v3341_v48, %v3345_v52  ;;  %v3394_v52 = vld [vmem:[%s9282_s3 + $0x528] sm:$0xff] }
 0x48b   :  { %4876 = vmatpush1.bf16.msra.mxu1 %v5973_v27  ;;  %v6174_v50 = vcombine.high %v3429_v25, %v3433_v41  ;;  %v6173_v28 = vcombine.low %v3429_v25, %v3433_v41  ;;  %v3309_v27 = vld [vmem:[%s9282_s3 + $0x280] sm:$0xff]  ;;  %v3228_v41 = vld [vmem:[#allocation2 + $0x28] sm:$0x77] }
 0x48c   :  { %4877 = vmatprep.subr.bf16.mxu1 %v6094_v45  ;;  %v6054_v51 = vcombine.high %v3309_v27, %v3313_v14  ;;  %v6053_v1 = vcombine.low %v3309_v27, %v3313_v14  ;;  %v3305_v45 = vld [vmem:[%s9282_s3 + $0x260] sm:$0xff]  ;;  %v3478_v14 = vld [vmem:[%s9282_s3 + $0x7c8] sm:$0xff] }
 0x48d   :  { %4939 = vmatpush2.bf16.msra.mxu0 %v6221_v43  ;;  %v3337_v43 = vld [vmem:[%s9282_s3 + $0x360] sm:$0xff] }
 0x48e   :  { %4940 = vmatprep.subr.bf16.mxu0 %v6214_v56  ;;  %v3425_v56 = vld [vmem:[%s9282_s3 + $0x620] sm:$0xff]  ;;  %v6077_v62 = vcombine.low %v3333_v53, %v3337_v43  ;;  %v6078_v20 = vcombine.high %v3333_v53, %v3337_v43  ;;  %v8359_v43 = vcombine.high %v3228_v41, %v3228_v41 }
 0x48f   :  { %4878 = vmatpush2.bf16.msra.mxu1 %v6093_v59  ;;  %v6166_v32 = vcombine.high %v3421_v8, %v3425_v56  ;;  %v6165_v10 = vcombine.low %v3421_v8, %v3425_v56  ;;  %v3301_v59 = vld [vmem:[%s9282_s3 + $0x240] sm:$0xff]  ;;  %v3382_v8 = vld [vmem:[%s9282_s3 + $0x4c8] sm:$0xff] }
 0x490   :  { %4879 = vmatprep.subr.bf16.mxu1 %v6086_v16  ;;  %v6046_v48 = vcombine.high %v3301_v59, %v3305_v45  ;;  %v6045_v25 = vcombine.low %v3301_v59, %v3305_v45  ;;  %v3293_v16 = vld [vmem:[%s9282_s3 + $0x200] sm:$0xff]  ;;  %v3386_v56 = vld [vmem:[%s9282_s3 + $0x4e8] sm:$0xff] }
 0x491   :  { %4941 = vmatpush2.bf16.msra.mxu0 %v6213_v29  ;;  %v3329_v29 = vld [vmem:[%s9282_s3 + $0x320] sm:$0xff]  ;;  %v3462_v45 = vld [vmem:[%s9282_s3 + $0x748] sm:$0xff] }
 0x492   :  { %4942 = vmatprep.subr.bf16.mxu0 %v6206_v23  ;;  %v3418_v23 = vld [vmem:[%s9282_s3 + $0x5e8] sm:$0xff]  ;;  %v6069_v7 = vcombine.low %v3325_v17, %v3329_v29  ;;  %v6070_v46 = vcombine.high %v3325_v17, %v3329_v29 }
 0x493   :  { %4880 = vmatpush2.bf16.msra.mxu1 %v6085_v54  ;;  %v6160_v18 = vcombine.high %v3414_v3, %v3418_v23  ;;  %v6159_v35 = vcombine.low %v3414_v3, %v3418_v23  ;;  %v8377_v17 = vld [vmem:[%s9282_s3 + $0x1e8] sm:$0xff] }
 0x494   :  { %4881 = vmatprep.subr.bf16.mxu1 %v6078_v20  ;;  %v3374_v3 = vld [vmem:[%s9282_s3 + $0x488] sm:$0xff] }
 0x495   :  { %4943 = vmatpush2.bf16.msra.mxu0 %v6205_v61  ;;  %v3321_v61 = vld [vmem:[%s9282_s3 + $0x2e0] sm:$0xff]  ;;  %v3378_v23 = vld [vmem:[%s9282_s3 + $0x4a8] sm:$0xff] }
 0x496   :  { %4944 = vmatprep.subr.bf16.mxu0 %v6198_v12  ;;  %v3410_v12 = vld [vmem:[%s9282_s3 + $0x5a8] sm:$0xff]  ;;  %v6061_v2 = vcombine.low %v3317_v40, %v3321_v61  ;;  %v6062_v49 = vcombine.high %v3317_v40, %v3321_v61  ;;  %v6120_v40 = vcombine.high %v3374_v3, %v3378_v23 }
 0x497   :  { %4882 = vmatpush2.bf16.msra.mxu1 %v6077_v62  ;;  %v6151_v30 = vcombine.low %v3406_v47, %v3410_v12  ;;  %v3370_v61 = vld [vmem:[%s9282_s3 + $0x468] sm:$0xff] }
 0x498   :  { %4883 = vmatprep.subr.bf16.mxu1 %v6070_v46  ;;  %v6127_v46 = vcombine.low %v3382_v8, %v3386_v56 }
 0x499   :  { %4945 = vmatpush2.bf16.msra.mxu0 %v6197_v13  ;;  %v6152_v13 = vcombine.high %v3406_v47, %v3410_v12  ;;  %v6119_v47 = vcombine.low %v3374_v3, %v3378_v23 }
 0x49a   :  { %4946 = vmatprep.subr.bf16.mxu0 %v6190_v0  ;;  %v3398_v0 = vld [vmem:[%s9282_s3 + $0x548] sm:$0xff] }
 0x49b   :  { %4884 = vmatpush2.bf16.msra.mxu1 %v6069_v7  ;;  %v6143_v54 = vcombine.low %v3398_v0, %v3402_v63 }
 0x49c   :  { %4885 = vmatprep.subr.bf16.mxu1 %v6062_v49  ;;  %v3362_v49 = vld [vmem:[%s9282_s3 + $0x428] sm:$0xff] }
 0x49d   :  { %4947 = vmatpush2.bf16.msra.mxu0 %v6189_v15  ;;  %v6144_v15 = vcombine.high %v3398_v0, %v3402_v63  ;;  %v3470_v63 = vld [vmem:[%s9282_s3 + $0x788] sm:$0xff] }
 0x49e   :  { %4948 = vmatprep.subr.bf16.mxu0 %v6182_v26  ;;  %v3390_v26 = vld [vmem:[%s9282_s3 + $0x508] sm:$0xff] }
 0x49f   :  { %4886 = vmatpush2.bf16.msra.mxu1 %v6061_v2  ;;  %v6136_v53 = vcombine.high %v3390_v26, %v3394_v52  ;;  %v6135_v20 = vcombine.low %v3390_v26, %v3394_v52  ;;  %v3358_v2 = vld [vmem:[%s9282_s3 + $0x408] sm:$0xff] }
 0x4a0   :  { %4887 = vmatprep.subr.bf16.mxu1 %v6054_v51  ;;  %v6104_v27 = vcombine.high %v3358_v2, %v3362_v49  ;;  %v6103_v51 = vcombine.low %v3358_v2, %v3362_v49  ;;  %v3454_v52 = vld [vmem:[%s9282_s3 + $0x708] sm:$0xff] }
 0x4a1   :  { %4949 = vmatpush2.bf16.msra.mxu0 %v6181_v21  ;;  %v3297_v21 = vld [vmem:[%s9282_s3 + $0x220] sm:$0xff] }
 0x4a2   :  { %4950 = vmatprep.subr.bf16.mxu0 %v6174_v50  ;;  %v6038_v50 = vcombine.high %v3293_v16, %v3297_v21  ;;  %v6037_v62 = vcombine.low %v3293_v16, %v3297_v21  ;;  %v3446_v16 = vld [vmem:[%s9282_s3 + $0x6c8] sm:$0xff] }
 0x4a3   :  { %4888 = vmatpush2.bf16.msra.mxu1 %v6053_v1  ;;  %v3474_v1 = vld [vmem:[%s9282_s3 + $0x7a8] sm:$0xff] }
 0x4a4   :  { %4889 = vmatprep.subr.bf16.mxu1 %v6046_v48  ;;  %v6216_v59 = vcombine.high %v3470_v63, %v3474_v1  ;;  %v6215_v48 = vcombine.low %v3470_v63, %v3474_v1  ;;  %v3450_v21 = vld [vmem:[%s9282_s3 + $0x6e8] sm:$0xff] }
 0x4a5   :  { %4951 = vmatpush2.bf16.msra.mxu0 %v6173_v28  ;;  %v8372_v28 = vld [vmem:[%s9282_s3 + $0x1c8] sm:$0xff] }
 0x4a6   :  { %4952 = vmatprep.subr.bf16.mxu0 %v6166_v32  ;;  %v6128_v32 = vcombine.high %v3382_v8, %v3386_v56  ;;  %v6032_v29 = vcombine.high %v8372_v28, %v8377_v17  ;;  %v6031_v7 = vcombine.low %v8372_v28, %v8377_v17  ;;  %v3438_v8 = vld [vmem:[%s9282_s3 + $0x688] sm:$0xff] }
 0x4a7   :  { %4890 = vmatpush2.bf16.msra.mxu1 %v6045_v25  ;;  %v3458_v25 = vld [vmem:[%s9282_s3 + $0x728] sm:$0xff] }
 0x4a8   :  { %4891 = vmatprep.subr.bf16.mxu1 %v6038_v50  ;;  %v6192_v50 = vcombine.high %v3446_v16, %v3450_v21  ;;  %v3442_v56 = vld [vmem:[%s9282_s3 + $0x6a8] sm:$0xff] }
 0x4a9   :  { %4953 = vmatpush2.bf16.msra.mxu0 %v6165_v10  ;;  %v8389_v10 = vcombine.low %v3228_v41, %v3228_v41  ;;  %v6183_v3 = vcombine.low %v3438_v8, %v3442_v56  ;;  %v3262_v28 = vld [vmem:[%s9282_s3 + $0x108] sm:$0xff] }
 0x4aa   :  { %5044 = vmatprep.subr.bf16.mxu0 %v6160_v18  ;;  %v3366_v18 = vld [vmem:[%s9282_s3 + $0x448] sm:$0xff] }
 0x4ab   :  { %4892 = vmatpush2.bf16.msra.mxu1 %v6037_v62  ;;  %v6112_v12 = vcombine.high %v3366_v18, %v3370_v61  ;;  %v6191_v62 = vcombine.low %v3446_v16, %v3450_v21  ;;  %v3266_v17 = vld [vmem:[%s9282_s3 + $0x128] sm:$0xff] }
 0x4ac   :  { %4955 = vmatmul.mubr.bf16.vlgmr.msra.gmra.mxu0 %v8073_v9  ;;  %4983 = vmatprep.subr.bf16.mxu1 %v6032_v29  ;;  %v3434_v29 = vld [vmem:[%s9282_s3 + $0x668] sm:$0xff] }
 0x4ad   :  { %4964 = vmatprep.mubr.bf16.mxu0 %v8096_v57  ;;  %5045 = vmatpush1.bf16.msra.mxu0 %v6159_v35  ;;  %v6111_v35 = vcombine.low %v3366_v18, %v3370_v61 }
 0x4ae   :  { %5046 = vmatprep.subr.bf16.mxu0 %v6152_v13  ;;  %v3482_v13 = vld [vmem:[%s9282_s3 + $0x7e8] sm:$0xff] }
 0x4af   :  { %v6224_v0 = vcombine.high %v3478_v14, %v3482_v13 }
 0x4b1   :  { %5047 = vmatpush1.bf16.msra.mxu0 %v6151_v30  ;;  %v6223_v30 = vcombine.low %v3478_v14, %v3482_v13 }
 0x4b2   :  { %5048 = vmatprep.subr.bf16.mxu0 %v6144_v15  ;;  %v3466_v15 = vld [vmem:[%s9282_s3 + $0x768] sm:$0xff] }
 0x4b3   :  { %v6208_v26 = vcombine.high %v3462_v45, %v3466_v15  ;;  %v6207_v41 = vcombine.low %v3462_v45, %v3466_v15 }
 0x4b4   :  { %4965 = vmatmul.mubr.bf16.gmra.mxu0 %v8102_v5 }
 0x4b5   :  { %4974 = vmatprep.mubr.bf16.mxu0 %v8359_v43  ;;  %5049 = vmatpush1.bf16.msra.mxu0 %v6143_v54  ;;  %v6200_v54 = vcombine.high %v3454_v52, %v3458_v25 }
 0x4b6   :  { %5050 = vmatprep.subr.bf16.mxu0 %v6136_v53  ;;  %v6199_v53 = vcombine.low %v3454_v52, %v3458_v25 }
 0x4b9   :  { %5051 = vmatpush1.bf16.msra.mxu0 %v6135_v20  ;;  %v6184_v20 = vcombine.high %v3438_v8, %v3442_v56 }
 0x4ba   :  { %5052 = vmatprep.subr.bf16.mxu0 %v6128_v32  ;;  %v3430_v32 = vld [vmem:[%s9282_s3 + $0x648] sm:$0xff] }
 0x4bb   :  { %v6176_v23 = vcombine.high %v3430_v32, %v3434_v29  ;;  %v6175_v18 = vcombine.low %v3430_v32, %v3434_v29 }
 0x4bc   :  { %4975 = vmatmul.mubr.bf16.gmra.mxu0 %v8389_v10 }
 0x4bd   :  { %5053 = vmatpush1.bf16.msra.mxu0 %v6127_v46  ;;  %5076 = vmatprep.mubr.bf16.mxu0 %v8066_v33  ;;  %v3422_v46 = vld [vmem:[%s9282_s3 + $0x608] sm:$0xff] }
 0x4be   :  { %5054 = vmatprep.subr.bf16.mxu0 %v6120_v40  ;;  %v3426_v40 = vld [vmem:[%s9282_s3 + $0x628] sm:$0xff] }
 0x4bf   :  { %v6168_v61 = vcombine.high %v3422_v46, %v3426_v40  ;;  %v6167_v2 = vcombine.low %v3422_v46, %v3426_v40 }
 0x4c1   :  { %5055 = vmatpush1.bf16.msra.mxu0 %v6119_v47  ;;  %v3415_v47 = vld [vmem:[%s9282_s3 + $0x5d0] sm:$0xff] }
 0x4c2   :  { %5056 = vmatprep.subr.bf16.mxu0 %v6112_v12  ;;  %v3419_v12 = vld [vmem:[%s9282_s3 + $0x5f0] sm:$0xff] }
 0x4c3   :  { %v6162_v49 = vcombine.high %v3415_v47, %v3419_v12  ;;  %v6161_v14 = vcombine.low %v3415_v47, %v3419_v12 }
 0x4c5   :  { %5057 = vmatpush1.bf16.msra.mxu0 %v6111_v35  ;;  %v3407_v35 = vld [vmem:[%s9282_s3 + $0x590] sm:$0xff] }
 0x4c6   :  { %5058 = vmatprep.subr.bf16.mxu0 %v6104_v27  ;;  %v3411_v27 = vld [vmem:[%s9282_s3 + $0x5b0] sm:$0xff] }
 0x4c7   :  { %v6154_v13 = vcombine.high %v3407_v35, %v3411_v27  ;;  %v6153_v63 = vcombine.low %v3407_v35, %v3411_v27 }
 0x4c9   :  { %5059 = vmatpush1.bf16.msra.mxu0 %v6103_v51  ;;  %v3399_v51 = vld [vmem:[%s9282_s3 + $0x550] sm:$0xff] }
 0x4ca   :  { %5060 = vmatprep.subr.bf16.mxu0 %v6224_v0  ;;  %v3403_v0 = vld [vmem:[%s9282_s3 + $0x570] sm:$0xff] }
 0x4cb   :  { %v6146_v1 = vcombine.high %v3399_v51, %v3403_v0  ;;  %v6145_v45 = vcombine.low %v3399_v51, %v3403_v0 }
 0x4cd   :  { %5061 = vmatpush2.bf16.msra.mxu0 %v6223_v30  ;;  %v3391_v30 = vld [vmem:[%s9282_s3 + $0x510] sm:$0xff] }
 0x4ce   :  { %5062 = vmatprep.subr.bf16.mxu0 %v6216_v59  ;;  %v3395_v59 = vld [vmem:[%s9282_s3 + $0x530] sm:$0xff] }
 0x4cf   :  { %v6138_v15 = vcombine.high %v3391_v30, %v3395_v59  ;;  %v6137_v52 = vcombine.low %v3391_v30, %v3395_v59 }
 0x4d1   :  { %5063 = vmatpush2.bf16.msra.mxu0 %v6215_v48  ;;  %v3383_v48 = vld [vmem:[%s9282_s3 + $0x4d0] sm:$0xff] }
 0x4d2   :  { %5064 = vmatprep.subr.bf16.mxu0 %v6208_v26  ;;  %v3387_v26 = vld [vmem:[%s9282_s3 + $0x4f0] sm:$0xff] }
 0x4d3   :  { %v6130_v25 = vcombine.high %v3383_v48, %v3387_v26  ;;  %v6129_v16 = vcombine.low %v3383_v48, %v3387_v26 }
 0x4d5   :  { %5065 = vmatpush2.bf16.msra.mxu0 %v6207_v41  ;;  %v3375_v41 = vld [vmem:[%s9282_s3 + $0x490] sm:$0xff] }
 0x4d6   :  { %5066 = vmatprep.subr.bf16.mxu0 %v6200_v54  ;;  %v3379_v54 = vld [vmem:[%s9282_s3 + $0x4b0] sm:$0xff] }
 0x4d7   :  { %v6122_v21 = vcombine.high %v3375_v41, %v3379_v54  ;;  %v6121_v8 = vcombine.low %v3375_v41, %v3379_v54 }
 0x4d9   :  { %5067 = vmatpush2.bf16.msra.mxu0 %v6199_v53  ;;  %v3367_v53 = vld [vmem:[%s9282_s3 + $0x450] sm:$0xff] }
 0x4da   :  { %5068 = vmatprep.subr.bf16.mxu0 %v6192_v50  ;;  %v3371_v50 = vld [vmem:[%s9282_s3 + $0x470] sm:$0xff] }
 0x4db   :  { %v6114_v56 = vcombine.high %v3367_v53, %v3371_v50  ;;  %v6113_v32 = vcombine.low %v3367_v53, %v3371_v50 }
 0x4dd   :  { %5069 = vmatpush2.bf16.msra.mxu0 %v6191_v62  ;;  %v3359_v62 = vld [vmem:[%s9282_s3 + $0x410] sm:$0xff] }
 0x4de   :  { %5070 = vmatprep.subr.bf16.mxu0 %v6184_v20  ;;  %v3363_v20 = vld [vmem:[%s9282_s3 + $0x430] sm:$0xff] }
 0x4df   :  { %v6106_v29 = vcombine.high %v3359_v62, %v3363_v20  ;;  %v6105_v46 = vcombine.low %v3359_v62, %v3363_v20 }
 0x4e1   :  { %5071 = vmatpush2.bf16.msra.mxu0 %v6183_v3  ;;  %v3479_v3 = vld [vmem:[%s9282_s3 + $0x7d0] sm:$0xff] }
 0x4e2   :  { %5072 = vmatprep.subr.bf16.mxu0 %v6176_v23  ;;  %v3483_v23 = vld [vmem:[%s9282_s3 + $0x7f0] sm:$0xff] }
 0x4e3   :  { %v6226_v40 = vcombine.high %v3479_v3, %v3483_v23  ;;  %v6225_v47 = vcombine.low %v3479_v3, %v3483_v23 }
 0x4e5   :  { %5073 = vmatpush2.bf16.msra.mxu0 %v6175_v18  ;;  %v3471_v18 = vld [vmem:[%s9282_s3 + $0x790] sm:$0xff] }
 0x4e6   :  { %5074 = vmatprep.subr.bf16.mxu0 %v6168_v61  ;;  %v3475_v61 = vld [vmem:[%s9282_s3 + $0x7b0] sm:$0xff] }
 0x4e7   :  { %v6218_v12 = vcombine.high %v3471_v18, %v3475_v61  ;;  %v6217_v35 = vcombine.low %v3471_v18, %v3475_v61 }
 0x4e9   :  { %5075 = vmatpush2.bf16.msra.mxu0 %v6167_v2  ;;  %v3463_v2 = vld [vmem:[%s9282_s3 + $0x750] sm:$0xff] }
 0x4ea   :  { %5166 = vmatprep.subr.bf16.mxu0 %v6162_v49  ;;  %v3467_v49 = vld [vmem:[%s9282_s3 + $0x770] sm:$0xff] }
 0x4eb   :  { %v6210_v27 = vcombine.high %v3463_v2, %v3467_v49  ;;  %v6209_v51 = vcombine.low %v3463_v2, %v3467_v49  ;;  %v3392_v2 = vld [vmem:[%s9282_s3 + $0x518] sm:$0xff] }
 0x4ec   :  { %5077 = vmatmul.mubr.bf16.vlgmr.msra.gmra.mxu0 %v8073_v9  ;;  %v3396_v49 = vld [vmem:[%s9282_s3 + $0x538] sm:$0xff] }
 0x4ed   :  { %5086 = vmatprep.mubr.bf16.mxu0 %v8096_v57  ;;  %5167 = vmatpush1.bf16.msra.mxu0 %v6161_v14  ;;  %v3455_v14 = vld [vmem:[%s9282_s3 + $0x710] sm:$0xff] }
 0x4ee   :  { %5168 = vmatprep.subr.bf16.mxu0 %v6154_v13  ;;  %v3459_v13 = vld [vmem:[%s9282_s3 + $0x730] sm:$0xff] }
 0x4ef   :  { %v6202_v0 = vcombine.high %v3455_v14, %v3459_v13  ;;  %v6201_v30 = vcombine.low %v3455_v14, %v3459_v13  ;;  %v6140_v13 = vcombine.high %v3392_v2, %v3396_v49 }
 0x4f1   :  { %5169 = vmatpush1.bf16.msra.mxu0 %v6153_v63  ;;  %v3447_v63 = vld [vmem:[%s9282_s3 + $0x6d0] sm:$0xff] }
 0x4f2   :  { %5170 = vmatprep.subr.bf16.mxu0 %v6146_v1  ;;  %v3451_v1 = vld [vmem:[%s9282_s3 + $0x6f0] sm:$0xff] }
 0x4f3   :  { %v6194_v59 = vcombine.high %v3447_v63, %v3451_v1  ;;  %v6193_v48 = vcombine.low %v3447_v63, %v3451_v1  ;;  %v3388_v63 = vld [vmem:[%s9282_s3 + $0x4f8] sm:$0xff]  ;;  %v3282_v1 = vld [vmem:[%s9282_s3 + $0x1a8] sm:$0xff] }
 0x4f4   :  { %5087 = vmatmul.mubr.bf16.gmra.mxu0 %v8102_v5 }
 0x4f5   :  { %5096 = vmatprep.mubr.bf16.mxu0 %v8359_v43  ;;  %5171 = vmatpush1.bf16.msra.mxu0 %v6145_v45  ;;  %v3439_v45 = vld [vmem:[%s9282_s3 + $0x690] sm:$0xff] }
 0x4f6   :  { %5172 = vmatprep.subr.bf16.mxu0 %v6138_v15  ;;  %v3443_v15 = vld [vmem:[%s9282_s3 + $0x6b0] sm:$0xff] }
 0x4f7   :  { %v6186_v26 = vcombine.high %v3439_v45, %v3443_v15  ;;  %v6185_v41 = vcombine.low %v3439_v45, %v3443_v15 }
 0x4f9   :  { %5173 = vmatpush1.bf16.msra.mxu0 %v6137_v52  ;;  %v3431_v52 = vld [vmem:[%s9282_s3 + $0x650] sm:$0xff] }
 0x4fa   :  { %5174 = vmatprep.subr.bf16.mxu0 %v6130_v25  ;;  %v3435_v25 = vld [vmem:[%s9282_s3 + $0x670] sm:$0xff] }
 0x4fb   :  { %v6178_v54 = vcombine.high %v3431_v52, %v3435_v25  ;;  %v6177_v53 = vcombine.low %v3431_v52, %v3435_v25  ;;  %v3376_v25 = vld [vmem:[%s9282_s3 + $0x498] sm:$0xff] }
 0x4fc   :  { %5097 = vmatmul.mubr.bf16.gmra.mxu0 %v8389_v10 }
 0x4fd   :  { %5175 = vmatpush1.bf16.msra.mxu0 %v6129_v16  ;;  %5198 = vmatprep.mubr.bf16.mxu0 %v8066_v33  ;;  %v3423_v16 = vld [vmem:[%s9282_s3 + $0x610] sm:$0xff] }
 0x4fe   :  { %5176 = vmatprep.subr.bf16.mxu0 %v6122_v21  ;;  %v3427_v21 = vld [vmem:[%s9282_s3 + $0x630] sm:$0xff] }
 0x4ff   :  { %v6170_v50 = vcombine.high %v3423_v16, %v3427_v21  ;;  %v6169_v62 = vcombine.low %v3423_v16, %v3427_v21  ;;  %v3270_v16 = vld [vmem:[%s9282_s3 + $0x148] sm:$0xff] }
 0x500   :  { %v3274_v21 = vld [vmem:[%s9282_s3 + $0x168] sm:$0xff] }
 0x501   :  { %5177 = vmatpush1.bf16.msra.mxu0 %v6121_v8  ;;  %v3416_v8 = vld [vmem:[%s9282_s3 + $0x5d8] sm:$0xff] }
 0x502   :  { %5178 = vmatprep.subr.bf16.mxu0 %v6114_v56  ;;  %v3420_v56 = vld [vmem:[%s9282_s3 + $0x5f8] sm:$0xff] }
 0x503   :  { %v6164_v20 = vcombine.high %v3416_v8, %v3420_v56  ;;  %v6163_v3 = vcombine.low %v3416_v8, %v3420_v56 }
 0x505   :  { %5179 = vmatpush1.bf16.msra.mxu0 %v6113_v32  ;;  %v3408_v32 = vld [vmem:[%s9282_s3 + $0x598] sm:$0xff] }
 0x506   :  { %5180 = vmatprep.subr.bf16.mxu0 %v6106_v29  ;;  %v3412_v29 = vld [vmem:[%s9282_s3 + $0x5b8] sm:$0xff] }
 0x507   :  { %v6156_v23 = vcombine.high %v3408_v32, %v3412_v29  ;;  %v6155_v61 = vcombine.low %v3408_v32, %v3412_v29  ;;  %v6016_v32 = vcombine.high %v3270_v16, %v3274_v21 }
 0x509   :  { %5181 = vmatpush1.bf16.msra.mxu0 %v6105_v46  ;;  %v3400_v46 = vld [vmem:[%s9282_s3 + $0x558] sm:$0xff] }
 0x50a   :  { %5182 = vmatprep.subr.bf16.mxu0 %v6226_v40  ;;  %v3404_v40 = vld [vmem:[%s9282_s3 + $0x578] sm:$0xff] }
 0x50d   :  { %5183 = vmatpush2.bf16.msra.mxu0 %v6225_v47 }
 0x50e   :  { %5184 = vmatprep.subr.bf16.mxu0 %v6218_v12  ;;  %v6148_v12 = vcombine.high %v3400_v46, %v3404_v40 }
 0x511   :  { %5185 = vmatpush2.bf16.msra.mxu0 %v6217_v35 }
 0x512   :  { %5186 = vmatprep.subr.bf16.mxu0 %v6210_v27  ;;  %v6147_v27 = vcombine.low %v3400_v46, %v3404_v40 }
 0x515   :  { %5187 = vmatpush2.bf16.msra.mxu0 %v6209_v51  ;;  %v3278_v51 = vld [vmem:[%s9282_s3 + $0x188] sm:$0xff] }
 0x516   :  { %5188 = vmatprep.subr.bf16.mxu0 %v6202_v0  ;;  %v3384_v0 = vld [vmem:[%s9282_s3 + $0x4d8] sm:$0xff]  ;;  %v6024_v52 = vcombine.high %v3278_v51, %v3282_v1  ;;  %v6023_v56 = vcombine.low %v3278_v51, %v3282_v1  ;;  %v3250_v1 = vld [vmem:[%s9282_s3 + $0xa8] sm:$0xff] }
 0x517   :  { %v3484_v51 = vld [vmem:[%s9282_s3 + $0x7f8] sm:$0xff] }
 0x519   :  { %5189 = vmatpush2.bf16.msra.mxu0 %v6201_v30 }
 0x51a   :  { %5190 = vmatprep.subr.bf16.mxu0 %v6194_v59  ;;  %v6139_v59 = vcombine.low %v3392_v2, %v3396_v49  ;;  %v3254_v2 = vld [vmem:[%s9282_s3 + $0xc8] sm:$0xff] }
 0x51b   :  { %v3258_v49 = vld [vmem:[%s9282_s3 + $0xe8] sm:$0xff] }
 0x51d   :  { %5191 = vmatpush2.bf16.msra.mxu0 %v6193_v48 }
 0x51e   :  { %5192 = vmatprep.subr.bf16.mxu0 %v6186_v26  ;;  %v6132_v26 = vcombine.high %v3384_v0, %v3388_v63 }
 0x521   :  { %5193 = vmatpush2.bf16.msra.mxu0 %v6185_v41  ;;  %v3380_v41 = vld [vmem:[%s9282_s3 + $0x4b8] sm:$0xff] }
 0x522   :  { %5194 = vmatprep.subr.bf16.mxu0 %v6178_v54  ;;  %v6124_v8 = vcombine.high %v3376_v25, %v3380_v41 }
 0x525   :  { %5195 = vmatpush2.bf16.msra.mxu0 %v6177_v53  ;;  %v6131_v53 = vcombine.low %v3384_v0, %v3388_v63  ;;  %v6000_v0 = vcombine.high %v3254_v2, %v3258_v49  ;;  %v3246_v63 = vld [vmem:[%s9282_s3 + $0x88] sm:$0xff] }
 0x526   :  { %5196 = vmatprep.subr.bf16.mxu0 %v6170_v50 }
 0x529   :  { %5197 = vmatpush2.bf16.msra.mxu0 %v6169_v62  ;;  %v3368_v62 = vld [vmem:[%s9282_s3 + $0x458] sm:$0xff] }
 0x52a   :  { %5288 = vmatprep.subr.bf16.mxu0 %v6164_v20  ;;  %v3372_v20 = vld [vmem:[%s9282_s3 + $0x478] sm:$0xff] }
 0x52b   :  { %v6116_v40 = vcombine.high %v3368_v62, %v3372_v20 }
 0x52c   :  { %v3122_v18 = vpop.f32.mrf.mxu0  ;;  %5199 = vmatmul.mubr.bf16.vlgmr.msra.gmra.mxu0 %v8073_v9 }
 0x52d   :  { %5208 = vmatprep.mubr.bf16.mxu0 %v8096_v57  ;;  %5289 = vmatpush1.bf16.msra.mxu0 %v6163_v3 }
 0x52e   :  { %v3124_v47 = vpop.f32.mrf.mxu0  ;;  %5290 = vmatprep.subr.bf16.mxu0 %v6156_v23 }
 0x530   :  { %v3128_v35 = vpop.f32.mrf.mxu0 }
 0x531   :  { %5291 = vmatpush1.bf16.msra.mxu0 %v6155_v61  ;;  %v8595_v45 = vpack.c.bf16 %v3128_v35, %v3122_v18  ;;  %v6015_v18 = vcombine.low %v3270_v16, %v3274_v21  ;;  %v6115_v35 = vcombine.low %v3368_v62, %v3372_v20  ;;  %v3242_v16 = vld [vmem:[%s9282_s3 + $0x68] sm:$0xff]  ;;  %v3464_v62 = vld [vmem:[%s9282_s3 + $0x758] sm:$0xff] }
 0x532   :  { %v3130_v14 = vpop.f32.mrf.mxu0  ;;  %5292 = vmatprep.subr.bf16.mxu0 %v6148_v12  ;;  %v6008_v12 = vcombine.high %v3262_v28, %v3266_v17  ;;  %v3468_v20 = vld [vmem:[%s9282_s3 + $0x778] sm:$0xff] }
 0x533   :  { %v8597_v15 = vpack.c.bf16 %v3130_v14, %v3124_v47  ;;  %v3360_v47 = vld [vmem:[%s9282_s3 + $0x418] sm:$0xff]  ;;  %v6007_v14 = vcombine.low %v3262_v28, %v3266_v17  ;;  %v3234_v28 = vld [vmem:[%s9282_s3 + $0x28] sm:$0xff] }
 0x534   :  { %v3134_v30 = vpop.f32.mrf.mxu0  ;;  %5209 = vmatmul.mubr.bf16.gmra.mxu0 %v8102_v5 }
 0x535   :  { %5218 = vmatprep.mubr.bf16.mxu0 %v8359_v43  ;;  %5293 = vmatpush1.bf16.msra.mxu0 %v6147_v27 }
 0x536   :  { %v3136_v48 = vpop.f32.mrf.mxu0  ;;  %5294 = vmatprep.subr.bf16.mxu0 %v6140_v13  ;;  %4893 = vmatprep.mubr.bf16.mxu1 %v8597_v15  ;;  %v3480_v13 = vld [vmem:[%s9282_s3 + $0x7d8] sm:$0xff] }
 0x537   :  { %4894 = vmatmul.mubr.bf16.vlgmr.msra.gmra.mxu1 %v8595_v45  ;;  %v6227_v21 = vcombine.low %v3480_v13, %v3484_v51 }
 0x538   :  { %v3140_v54 = vpop.f32.mrf.mxu0  ;;  %4984 = vmatpush1.bf16.msra.mxu1 %v6031_v7  ;;  %v6123_v7 = vcombine.low %v3376_v25, %v3380_v41  ;;  %v5992_v25 = vcombine.high %v3246_v63, %v3250_v1 }
 0x539   :  { %5295 = vmatpush1.bf16.msra.mxu0 %v6139_v59  ;;  %4985 = vmatprep.subr.bf16.mxu1 %v6024_v52  ;;  %v8632_v23 = vpack.c.bf16 %v3140_v54, %v3134_v30  ;;  %v6228_v59 = vcombine.high %v3480_v13, %v3484_v51  ;;  %v3476_v52 = vld [vmem:[%s9282_s3 + $0x7b8] sm:$0xff]  ;;  %v3238_v54 = vld [vmem:[%s9282_s3 + $0x48] sm:$0xff] }
 0x53a   :  { %v3142_v50 = vpop.f32.mrf.mxu0  ;;  %5296 = vmatprep.subr.bf16.mxu0 %v6132_v26  ;;  %v3472_v26 = vld [vmem:[%s9282_s3 + $0x798] sm:$0xff]  ;;  %v3342_v13 = vld [vmem:[%s9282_s3 + $0x388] sm:$0xff] }
 0x53b   :  { %v8630_v3 = vpack.c.bf16 %v3142_v50, %v3136_v48  ;;  %v5999_v48 = vcombine.low %v3254_v2, %v3258_v49  ;;  %v6219_v17 = vcombine.low %v3472_v26, %v3476_v52  ;;  %v3346_v51 = vld [vmem:[%s9282_s3 + $0x3a8] sm:$0xff] }
 0x53c   :  { %5219 = vmatmul.mubr.bf16.gmra.mxu0 %v8389_v10  ;;  %v3146_v29 = vpop.f32.mrf.mxu0  ;;  %4986 = vmatpush1.bf16.msra.mxu1 %v6023_v56  ;;  %v5991_v56 = vcombine.low %v3246_v63, %v3250_v1 }
 0x53d   :  { %5297 = vmatpush1.bf16.msra.mxu0 %v6131_v53  ;;  %5320 = vmatprep.mubr.bf16.mxu0 %v8066_v33  ;;  %v3364_v33 = vld [vmem:[%s9282_s3 + $0x438] sm:$0xff] }
 0x53e   :  { %5298 = vmatprep.subr.bf16.mxu0 %v6124_v8  ;;  %v3148_v46 = vpop.f32.mrf.mxu0  ;;  %4903 = vmatprep.mubr.bf16.mxu1 %v8630_v3  ;;  %v6108_v27 = vcombine.high %v3360_v47, %v3364_v33  ;;  %v6107_v30 = vcombine.low %v3360_v47, %v3364_v33  ;;  %v6220_v8 = vcombine.high %v3472_v26, %v3476_v52  ;;  %v3350_v47 = vld [vmem:[%s9282_s3 + $0x3c8] sm:$0xff] }
 0x53f   :  { %v6263_v61 = vpack.c.bf16 %v3148_v46, %v3146_v29  ;;  %4987 = vmatprep.subr.bf16.mxu1 %v6016_v32  ;;  %4904 = vmatmul.mubr.bf16.gmra.mxu1 %v8632_v23  ;;  %v5984_v32 = vcombine.high %v3238_v54, %v3242_v16  ;;  %v3230_v29 = vld [vmem:[%s9282_s3 + $0x8] sm:$0xff]  ;;  %v5983_v46 = vcombine.low %v3238_v54, %v3242_v16  ;;  %v3432_v16 = vld [vmem:[%s9282_s3 + $0x658] sm:$0xff] }
 0x540   :  { %4988 = vmatpush1.bf16.msra.mxu1 %v6015_v18  ;;  %v3460_v18 = vld [vmem:[%s9282_s3 + $0x738] sm:$0xff]  ;;  %v3354_v33 = vld [vmem:[%s9282_s3 + $0x3e8] sm:$0xff]  ;;  %v5975_v49 = vcombine.low %v3230_v29, %v3234_v28  ;;  %v6087_v54 = vcombine.low %v3342_v13, %v3346_v51 }
 0x541   :  { %5299 = vmatpush1.bf16.msra.mxu0 %v6123_v7  ;;  %3187 = vst [vmem:[#allocation2 + $0x48] sm:$0x77] %v6263_v61  ;;  %4989 = vmatprep.subr.bf16.mxu1 %v6008_v12  ;;  %v6212_v7 = vcombine.high %v3464_v62, %v3468_v20  ;;  %v5976_v61 = vcombine.high %v3230_v29, %v3234_v28  ;;  %v3334_v26 = vld [vmem:[%s9282_s3 + $0x348] sm:$0xff]  ;;  %v3424_v28 = vld [vmem:[%s9282_s3 + $0x618] sm:$0xff] }
 0x542   :  { %5300 = vmatprep.subr.bf16.mxu0 %v6116_v40  ;;  %v3456_v40 = vld [vmem:[%s9282_s3 + $0x718] sm:$0xff]  ;;  %v6211_v12 = vcombine.low %v3464_v62, %v3468_v20  ;;  %v6095_v1 = vcombine.low %v3350_v47, %v3354_v33  ;;  %v3338_v52 = vld [vmem:[%s9282_s3 + $0x368] sm:$0xff] }
 0x543   :  { %v6204_v2 = vcombine.high %v3456_v40, %v3460_v18  ;;  %v3330_v62 = vld [vmem:[%s9282_s3 + $0x328] sm:$0xff]  ;;  %v6079_v29 = vcombine.low %v3334_v26, %v3338_v52 }
 0x544   :  { %4990 = vmatpush1.bf16.msra.mxu1 %v6007_v14  ;;  %v6096_v14 = vcombine.high %v3350_v47, %v3354_v33 }
 0x545   :  { %5301 = vmatpush1.bf16.msra.mxu0 %v6115_v35  ;;  %4991 = vmatprep.subr.bf16.mxu1 %v6000_v0  ;;  %v3448_v35 = vld [vmem:[%s9282_s3 + $0x6d8] sm:$0xff]  ;;  %v6203_v0 = vcombine.low %v3456_v40, %v3460_v18  ;;  %v3322_v40 = vld [vmem:[%s9282_s3 + $0x2e8] sm:$0xff] }
 0x546   :  { %5302 = vmatprep.subr.bf16.mxu0 %v6108_v27  ;;  %v3452_v27 = vld [vmem:[%s9282_s3 + $0x6f8] sm:$0xff] }
 0x547   :  { %v6196_v63 = vcombine.high %v3448_v35, %v3452_v27 }
 0x548   :  { %v3227_v41 = vld [vmem:[#allocation2 + $0x48] sm:$0x77]  ;;  %4992 = vmatpush1.bf16.msra.mxu1 %v5999_v48  ;;  %v6088_v48 = vcombine.high %v3342_v13, %v3346_v51 }
 0x549   :  { %5303 = vmatpush1.bf16.msra.mxu0 %v6107_v30  ;;  %v8672_v53 = vcombine.high %v3227_v41, %v3227_v41  ;;  %v8674_v50 = vcombine.low %v3227_v41, %v3227_v41  ;;  %4993 = vmatprep.subr.bf16.mxu1 %v5992_v25  ;;  %v3440_v30 = vld [vmem:[%s9282_s3 + $0x698] sm:$0xff]  ;;  %v6195_v25 = vcombine.low %v3448_v35, %v3452_v27  ;;  %v3306_v13 = vld [vmem:[%s9282_s3 + $0x268] sm:$0xff] }
 0x54a   :  { %5304 = vmatprep.subr.bf16.mxu0 %v6228_v59  ;;  %v3444_v59 = vld [vmem:[%s9282_s3 + $0x6b8] sm:$0xff] }
 0x54b   :  { %4913 = vmatprep.mubr.bf16.mxu1 %v8672_v53  ;;  %v6188_v41 = vcombine.high %v3440_v30, %v3444_v59  ;;  %v6187_v20 = vcombine.low %v3440_v30, %v3444_v59  ;;  %v3298_v30 = vld [vmem:[%s9282_s3 + $0x228] sm:$0xff] }
 0x54c   :  { %4914 = vmatmul.mubr.bf16.gmra.mxu1 %v8674_v50 }
 0x54d   :  { %5305 = vmatpush2.bf16.msra.mxu0 %v6227_v21  ;;  %5015 = vmatprep.mubr.bf16.mxu1 %v8597_v15  ;;  %v3436_v21 = vld [vmem:[%s9282_s3 + $0x678] sm:$0xff] }
 0x54e   :  { %5306 = vmatprep.subr.bf16.mxu0 %v6220_v8  ;;  %4994 = vmatpush1.bf16.msra.mxu1 %v5991_v56  ;;  %v6080_v8 = vcombine.high %v3334_v26, %v3338_v52  ;;  %v3326_v56 = vld [vmem:[%s9282_s3 + $0x308] sm:$0xff]  ;;  %v6179_v18 = vcombine.low %v3432_v16, %v3436_v21 }
 0x54f   :  { %4995 = vmatprep.subr.bf16.mxu1 %v5984_v32  ;;  %v6180_v32 = vcombine.high %v3432_v16, %v3436_v21  ;;  %v6071_v47 = vcombine.low %v3326_v56, %v3330_v62  ;;  %v3279_v21 = vld [vmem:[%s9282_s3 + $0x190] sm:$0xff] }
 0x551   :  { %5307 = vmatpush2.bf16.msra.mxu0 %v6219_v17  ;;  %v3428_v17 = vld [vmem:[%s9282_s3 + $0x638] sm:$0xff] }
 0x552   :  { %5308 = vmatprep.subr.bf16.mxu0 %v6212_v7  ;;  %4996 = vmatpush1.bf16.msra.mxu1 %v5983_v46  ;;  %v6072_v7 = vcombine.high %v3326_v56, %v3330_v62  ;;  %v3318_v46 = vld [vmem:[%s9282_s3 + $0x2c8] sm:$0xff] }
 0x553   :  { %4997 = vmatprep.subr.bf16.mxu1 %v5976_v61  ;;  %v6172_v61 = vcombine.high %v3424_v28, %v3428_v17  ;;  %v6064_v33 = vcombine.high %v3318_v46, %v3322_v40  ;;  %v6063_v35 = vcombine.low %v3318_v46, %v3322_v40  ;;  %v3263_v46 = vld [vmem:[%s9282_s3 + $0x110] sm:$0xff] }
 0x554   :  { %v3267_v40 = vld [vmem:[%s9282_s3 + $0x130] sm:$0xff] }
 0x555   :  { %5309 = vmatpush2.bf16.msra.mxu0 %v6211_v12  ;;  %v3310_v12 = vld [vmem:[%s9282_s3 + $0x288] sm:$0xff] }
 0x556   :  { %5310 = vmatprep.subr.bf16.mxu0 %v6204_v2  ;;  %4998 = vmatpush1.bf16.msra.mxu1 %v5975_v49  ;;  %v3314_v2 = vld [vmem:[%s9282_s3 + $0x2a8] sm:$0xff]  ;;  %v6171_v49 = vcombine.low %v3424_v28, %v3428_v17 }
 0x557   :  { %4999 = vmatprep.subr.bf16.mxu1 %v6096_v14  ;;  %v6056_v27 = vcombine.high %v3310_v12, %v3314_v2  ;;  %v3302_v14 = vld [vmem:[%s9282_s3 + $0x248] sm:$0xff]  ;;  %v6055_v51 = vcombine.low %v3310_v12, %v3314_v2  ;;  %v3255_v12 = vld [vmem:[%s9282_s3 + $0xd0] sm:$0xff] }
 0x559   :  { %5311 = vmatpush2.bf16.msra.mxu0 %v6203_v0  ;;  %v6048_v0 = vcombine.high %v3302_v14, %v3306_v13 }
 0x55a   :  { %5312 = vmatprep.subr.bf16.mxu0 %v6196_v63  ;;  %5000 = vmatpush2.bf16.msra.mxu1 %v6095_v1  ;;  %v3294_v1 = vld [vmem:[%s9282_s3 + $0x208] sm:$0xff] }
 0x55b   :  { %5001 = vmatprep.subr.bf16.mxu1 %v6088_v48  ;;  %v6047_v48 = vcombine.low %v3302_v14, %v3306_v13  ;;  %v6040_v26 = vcombine.high %v3294_v1, %v3298_v30  ;;  %v3251_v14 = vld [vmem:[%s9282_s3 + $0xb0] sm:$0xff] }
 0x55d   :  { %5313 = vmatpush2.bf16.msra.mxu0 %v6195_v25  ;;  %v3291_v25 = vld [vmem:[%s9282_s3 + $0x1f0] sm:$0xff] }
 0x55e   :  { %5314 = vmatprep.subr.bf16.mxu0 %v6188_v41  ;;  %5002 = vmatpush2.bf16.msra.mxu1 %v6087_v54 }
 0x55f   :  { %5003 = vmatprep.subr.bf16.mxu1 %v6080_v8  ;;  %v3283_v8 = vld [vmem:[%s9282_s3 + $0x1b0] sm:$0xff] }
 0x561   :  { %5315 = vmatpush2.bf16.msra.mxu0 %v6187_v20  ;;  %v6026_v20 = vcombine.high %v3279_v21, %v3283_v8 }
 0x562   :  { %5316 = vmatprep.subr.bf16.mxu0 %v6180_v32  ;;  %5004 = vmatpush2.bf16.msra.mxu1 %v6079_v29  ;;  %v3275_v29 = vld [vmem:[%s9282_s3 + $0x170] sm:$0xff] }
 0x563   :  { %5005 = vmatprep.subr.bf16.mxu1 %v6072_v7 }
 0x565   :  { %5317 = vmatpush2.bf16.msra.mxu0 %v6179_v18 }
 0x566   :  { %5318 = vmatprep.subr.bf16.mxu0 %v6172_v61  ;;  %5006 = vmatpush2.bf16.msra.mxu1 %v6071_v47  ;;  %v6010_v47 = vcombine.high %v3263_v46, %v3267_v40 }
 0x567   :  { %5007 = vmatprep.subr.bf16.mxu1 %v6064_v33 }
 0x569   :  { %5319 = vmatpush2.bf16.msra.mxu0 %v6171_v49  ;;  %v6009_v49 = vcombine.low %v3263_v46, %v3267_v40  ;;  %v3339_v46 = vld [vmem:[%s9282_s3 + $0x370] sm:$0xff] }
 0x56a   :  { %5008 = vmatpush2.bf16.msra.mxu1 %v6063_v35 }
 0x56b   :  { %5009 = vmatprep.subr.bf16.mxu1 %v6056_v27  ;;  %v3247_v27 = vld [vmem:[%s9282_s3 + $0x90] sm:$0xff] }
 0x56c   :  { %v8763_v63 = vpop.f32.mrf.mxu0  ;;  %5321 = vmatmul.mubr.bf16.vlgmr.msra.gmra.mxu0 %v8073_v9  ;;  %v3287_v9 = vld [vmem:[%s9282_s3 + $0x1d0] sm:$0xff] }
 0x56d   :  { %5330 = vmatprep.mubr.bf16.mxu0 %v8096_v57  ;;  %v6039_v57 = vcombine.low %v3294_v1, %v3298_v30  ;;  %v6034_v54 = vcombine.high %v3287_v9, %v3291_v25  ;;  %v6033_v62 = vcombine.low %v3287_v9, %v3291_v25  ;;  %v3243_v1 = vld [vmem:[%s9282_s3 + $0x70] sm:$0xff]  ;;  %v5993_v30 = vcombine.low %v3247_v27, %v3251_v14 }
 0x56e   :  { %v8773_v59 = vpop.f32.mrf.mxu0  ;;  %5010 = vmatpush2.bf16.msra.mxu1 %v6055_v51  ;;  %v5994_v51 = vcombine.high %v3247_v27, %v3251_v14  ;;  %v3235_v9 = vld [vmem:[%s9282_s3 + $0x30] sm:$0xff] }
 0x56f   :  { %5011 = vmatprep.subr.bf16.mxu1 %v6048_v0  ;;  %v3239_v0 = vld [vmem:[%s9282_s3 + $0x50] sm:$0xff] }
 0x570   :  { %v8775_v52 = vpop.f32.mrf.mxu0  ;;  %v5985_v25 = vcombine.low %v3239_v0, %v3243_v1  ;;  %v3311_v14 = vld [vmem:[%s9282_s3 + $0x290] sm:$0xff] }
 0x572   :  { %v8783_v41 = vpop.f32.mrf.mxu0  ;;  %5012 = vmatpush2.bf16.msra.mxu1 %v6047_v48  ;;  %v5986_v48 = vcombine.high %v3239_v0, %v3243_v1  ;;  %v3303_v1 = vld [vmem:[%s9282_s3 + $0x250] sm:$0xff] }
 0x573   :  { %5013 = vmatprep.subr.bf16.mxu1 %v6040_v26  ;;  %v3231_v26 = vld [vmem:[%s9282_s3 + $0x10] sm:$0xff] }
 0x574   :  { %v8785_v16 = vpop.f32.mrf.mxu0  ;;  %5331 = vmatmul.mubr.bf16.gmra.mxu0 %v8102_v5  ;;  %v3271_v5 = vld [vmem:[%s9282_s3 + $0x150] sm:$0xff] }
 0x575   :  { %5340 = vmatprep.mubr.bf16.mxu0 %v8359_v43  ;;  %v6025_v43 = vcombine.low %v3279_v21, %v3283_v8  ;;  %v6018_v17 = vcombine.high %v3271_v5, %v3275_v29  ;;  %v6017_v61 = vcombine.low %v3271_v5, %v3275_v29  ;;  %v3355_v21 = vld [vmem:[%s9282_s3 + $0x3f0] sm:$0xff]  ;;  %v5977_v8 = vcombine.low %v3231_v26, %v3235_v9 }
 0x576   :  { %v8795_v56 = vpop.f32.mrf.mxu0  ;;  %5014 = vmatpush2.bf16.msra.mxu1 %v6039_v57  ;;  %v5978_v57 = vcombine.high %v3231_v26, %v3235_v9  ;;  %v3347_v5 = vld [vmem:[%s9282_s3 + $0x3b0] sm:$0xff] }
 0x577   :  { %5105 = vmatprep.subr.bf16.mxu1 %v6034_v54  ;;  %v3351_v54 = vld [vmem:[%s9282_s3 + $0x3d0] sm:$0xff] }
 0x578   :  { %v8797_v32 = vpop.f32.mrf.mxu0  ;;  %v6097_v29 = vcombine.low %v3351_v54, %v3355_v21 }
 0x579   :  { %5016 = vmatmul.mubr.bf16.vlgmr.msra.gmra.mxu1 %v8595_v45 }
 0x57a   :  { %v8806_v28 = vpop.f32.mrf.mxu0  ;;  %5025 = vmatprep.mubr.bf16.mxu1 %v8630_v3  ;;  %5106 = vmatpush1.bf16.msra.mxu1 %v6033_v62  ;;  %v6098_v62 = vcombine.high %v3351_v54, %v3355_v21 }
 0x57b   :  { %5107 = vmatprep.subr.bf16.mxu1 %v6026_v20  ;;  %v3343_v20 = vld [vmem:[%s9282_s3 + $0x390] sm:$0xff] }
 0x57c   :  { %v8809_v7 = vpop.f32.mrf.mxu0  ;;  %5341 = vmatmul.mubr.bf16.gmra.mxu0 %v8389_v10  ;;  %v3259_v10 = vld [vmem:[%s9282_s3 + $0xf0] sm:$0xff]  ;;  %v6089_v40 = vcombine.low %v3343_v20, %v3347_v5 }
 0x57d   :  { %v6002_v35 = vcombine.high %v3255_v12, %v3259_v10  ;;  %v6001_v13 = vcombine.low %v3255_v12, %v3259_v10 }
 0x57e   :  { %v8818_v18 = vpop.f32.mrf.mxu0  ;;  %5108 = vmatpush1.bf16.msra.mxu1 %v6025_v43  ;;  %v6090_v43 = vcombine.high %v3343_v20, %v3347_v5  ;;  %v3288_v20 = vld [vmem:[%s9282_s3 + $0x1d8] sm:$0xff] }
 0x57f   :  { %5109 = vmatprep.subr.bf16.mxu1 %v6018_v17  ;;  %v3335_v17 = vld [vmem:[%s9282_s3 + $0x350] sm:$0xff]  ;;  %v3292_v5 = vld [vmem:[%s9282_s3 + $0x1f8] sm:$0xff] }
 0x580   :  { %v4980_v33 = vpop.f32.mrf.mxu0  ;;  %v6081_v12 = vcombine.low %v3335_v17, %v3339_v46 }
 0x581   :  { %5026 = vmatmul.mubr.bf16.gmra.mxu1 %v8632_v23  ;;  %v3331_v33 = vld [vmem:[%s9282_s3 + $0x330] sm:$0xff] }
 0x582   :  { %v4981_v2 = vpop.f32.mrf.mxu0  ;;  %5035 = vmatprep.mubr.bf16.mxu1 %v8672_v53  ;;  %5110 = vmatpush1.bf16.msra.mxu1 %v6017_v61  ;;  %v6082_v61 = vcombine.high %v3335_v17, %v3339_v46  ;;  %v6036_v17 = vcombine.high %v3288_v20, %v3292_v5 }
 0x583   :  { %5111 = vmatprep.subr.bf16.mxu1 %v6010_v47  ;;  %v3327_v47 = vld [vmem:[%s9282_s3 + $0x310] sm:$0xff] }
 0x584   :  { %v6074_v10 = vcombine.high %v3327_v47, %v3331_v33  ;;  %v3319_v2 = vld [vmem:[%s9282_s3 + $0x2d0] sm:$0xff] }
 0x586   :  { %5112 = vmatpush1.bf16.msra.mxu1 %v6009_v49  ;;  %v3323_v49 = vld [vmem:[%s9282_s3 + $0x2f0] sm:$0xff] }
 0x587   :  { %5113 = vmatprep.subr.bf16.mxu1 %v6002_v35  ;;  %v6073_v35 = vcombine.low %v3327_v47, %v3331_v33  ;;  %v6066_v27 = vcombine.high %v3319_v2, %v3323_v49  ;;  %v6035_v33 = vcombine.low %v3288_v20, %v3292_v5  ;;  %v3248_v5 = vld [vmem:[%s9282_s3 + $0x98] sm:$0xff] }
 0x589   :  { %5036 = vmatmul.mubr.bf16.gmra.mxu1 %v8674_v50 }
 0x58a   :  { %5114 = vmatpush1.bf16.msra.mxu1 %v6001_v13  ;;  %5137 = vmatprep.mubr.bf16.mxu1 %v8597_v15  ;;  %v3315_v13 = vld [vmem:[%s9282_s3 + $0x2b0] sm:$0xff] }
 0x58b   :  { %5115 = vmatprep.subr.bf16.mxu1 %v5994_v51  ;;  %v6065_v51 = vcombine.low %v3319_v2, %v3323_v49  ;;  %v6058_v0 = vcombine.high %v3311_v14, %v3315_v13  ;;  %v3272_v2 = vld [vmem:[%s9282_s3 + $0x158] sm:$0xff] }
 0x58c   :  { %v3276_v49 = vld [vmem:[%s9282_s3 + $0x178] sm:$0xff] }
 0x58e   :  { %5116 = vmatpush1.bf16.msra.mxu1 %v5993_v30  ;;  %v3307_v30 = vld [vmem:[%s9282_s3 + $0x270] sm:$0xff] }
 0x58f   :  { %5117 = vmatprep.subr.bf16.mxu1 %v5986_v48  ;;  %v6057_v48 = vcombine.low %v3311_v14, %v3315_v13  ;;  %v6050_v26 = vcombine.high %v3303_v1, %v3307_v30  ;;  %v6049_v21 = vcombine.low %v3303_v1, %v3307_v30  ;;  %v6020_v14 = vcombine.high %v3272_v2, %v3276_v49 }
 0x590   :  { %v6019_v30 = vcombine.low %v3272_v2, %v3276_v49  ;;  %v3232_v49 = vld [vmem:[%s9282_s3 + $0x18] sm:$0xff] }
 0x592   :  { %5118 = vmatpush1.bf16.msra.mxu1 %v5985_v25  ;;  %v3295_v25 = vld [vmem:[%s9282_s3 + $0x210] sm:$0xff] }
 0x593   :  { %5119 = vmatprep.subr.bf16.mxu1 %v5978_v57  ;;  %v3299_v57 = vld [vmem:[%s9282_s3 + $0x230] sm:$0xff] }
 0x596   :  { %5120 = vmatpush1.bf16.msra.mxu1 %v5977_v8  ;;  %v6042_v8 = vcombine.high %v3295_v25, %v3299_v57 }
 0x597   :  { %5121 = vmatprep.subr.bf16.mxu1 %v6098_v62 }
 0x59a   :  { %5122 = vmatpush2.bf16.msra.mxu1 %v6097_v29 }
 0x59b   :  { %5123 = vmatprep.subr.bf16.mxu1 %v6090_v43  ;;  %v6041_v43 = vcombine.low %v3295_v25, %v3299_v57  ;;  %v3256_v25 = vld [vmem:[%s9282_s3 + $0xd8] sm:$0xff] }
 0x59c   :  { %v3260_v57 = vld [vmem:[%s9282_s3 + $0xf8] sm:$0xff] }
 0x59d   :  { %v6004_v20 = vcombine.high %v3256_v25, %v3260_v57 }
 0x59e   :  { %5124 = vmatpush2.bf16.msra.mxu1 %v6089_v40  ;;  %v3280_v40 = vld [vmem:[%s9282_s3 + $0x198] sm:$0xff] }
 0x59f   :  { %5125 = vmatprep.subr.bf16.mxu1 %v6082_v61  ;;  %v3284_v61 = vld [vmem:[%s9282_s3 + $0x1b8] sm:$0xff] }
 0x5a2   :  { %5126 = vmatpush2.bf16.msra.mxu1 %v6081_v12  ;;  %v6028_v12 = vcombine.high %v3280_v40, %v3284_v61 }
 0x5a3   :  { %5127 = vmatprep.subr.bf16.mxu1 %v6074_v10 }
 0x5a6   :  { %5128 = vmatpush2.bf16.msra.mxu1 %v6073_v35 }
 0x5a7   :  { %5129 = vmatprep.subr.bf16.mxu1 %v6066_v27  ;;  %v6027_v27 = vcombine.low %v3280_v40, %v3284_v61  ;;  %v3240_v61 = vld [vmem:[%s9282_s3 + $0x58] sm:$0xff] }
 0x5aa   :  { %5130 = vmatpush2.bf16.msra.mxu1 %v6065_v51  ;;  %v3264_v51 = vld [vmem:[%s9282_s3 + $0x118] sm:$0xff] }
 0x5ab   :  { %5131 = vmatprep.subr.bf16.mxu1 %v6058_v0  ;;  %v3268_v0 = vld [vmem:[%s9282_s3 + $0x138] sm:$0xff] }
 0x5ac   :  { %v8890_v9 = vpop.f32.mrf.mxu0 }
 0x5ae   :  { %v8898_v54 = vpop.f32.mrf.mxu0  ;;  %5132 = vmatpush2.bf16.msra.mxu1 %v6057_v48  ;;  %v6012_v48 = vcombine.high %v3264_v51, %v3268_v0 }
 0x5af   :  { %5133 = vmatprep.subr.bf16.mxu1 %v6050_v26 }
 0x5b0   :  { %v8900_v62 = vpop.f32.mrf.mxu0 }
 0x5b2   :  { %v8908_v29 = vpop.f32.mrf.mxu0  ;;  %5134 = vmatpush2.bf16.msra.mxu1 %v6049_v21 }
 0x5b3   :  { %5135 = vmatprep.subr.bf16.mxu1 %v6042_v8  ;;  %v6011_v8 = vcombine.low %v3264_v51, %v3268_v0  ;;  %v3352_v0 = vld [vmem:[%s9282_s3 + $0x3d8] sm:$0xff] }
 0x5b4   :  { %v8910_v46 = vpop.f32.mrf.mxu0 }
 0x5b6   :  { %v8918_v47 = vpop.f32.mrf.mxu0  ;;  %5136 = vmatpush2.bf16.msra.mxu1 %v6041_v43  ;;  %v3252_v43 = vld [vmem:[%s9282_s3 + $0xb8] sm:$0xff] }
 0x5b7   :  { %5227 = vmatprep.subr.bf16.mxu1 %v6036_v17  ;;  %v6003_v17 = vcombine.low %v3256_v25, %v3260_v57  ;;  %v5996_v40 = vcombine.high %v3248_v5, %v3252_v43  ;;  %v3348_v25 = vld [vmem:[%s9282_s3 + $0x3b8] sm:$0xff] }
 0x5b8   :  { %v8920_v10 = vpop.f32.mrf.mxu0 }
 0x5b9   :  { %5138 = vmatmul.mubr.bf16.vlgmr.msra.gmra.mxu1 %v8595_v45 }
 0x5ba   :  { %v8929_v35 = vpop.f32.mrf.mxu0  ;;  %5147 = vmatprep.mubr.bf16.mxu1 %v8630_v3  ;;  %5228 = vmatpush1.bf16.msra.mxu1 %v6035_v33  ;;  %v3244_v33 = vld [vmem:[%s9282_s3 + $0x78] sm:$0xff] }
 0x5bb   :  { %5229 = vmatprep.subr.bf16.mxu1 %v6028_v12  ;;  %v5995_v12 = vcombine.low %v3248_v5, %v3252_v43  ;;  %v5988_v2 = vcombine.high %v3240_v61, %v3244_v33 }
 0x5bc   :  { %v8932_v13 = vpop.f32.mrf.mxu0 }
 0x5be   :  { %v8940_v1 = vpop.f32.mrf.mxu0  ;;  %5230 = vmatpush1.bf16.msra.mxu1 %v6027_v27  ;;  %v3236_v27 = vld [vmem:[%s9282_s3 + $0x38] sm:$0xff] }
 0x5bf   :  { %5231 = vmatprep.subr.bf16.mxu1 %v6020_v14  ;;  %v5987_v14 = vcombine.low %v3240_v61, %v3244_v33  ;;  %v5980_v51 = vcombine.high %v3232_v49, %v3236_v27 }
 0x5c0   :  { %v5102_v26 = vpop.f32.mrf.mxu0 }
 0x5c1   :  { %5148 = vmatmul.mubr.bf16.gmra.mxu1 %v8632_v23  ;;  %v3344_v26 = vld [vmem:[%s9282_s3 + $0x398] sm:$0xff] }
 0x5c2   :  { %v5103_v21 = vpop.f32.mrf.mxu0  ;;  %5157 = vmatprep.mubr.bf16.mxu1 %v8672_v53  ;;  %5232 = vmatpush1.bf16.msra.mxu1 %v6019_v30  ;;  %v5979_v30 = vcombine.low %v3232_v49, %v3236_v27  ;;  %v6091_v5 = vcombine.low %v3344_v26, %v3348_v25 }
 0x5c3   :  { %5233 = vmatprep.subr.bf16.mxu1 %v6012_v48  ;;  %v6092_v21 = vcombine.high %v3344_v26, %v3348_v25 }
 0x5c6   :  { %5234 = vmatpush1.bf16.msra.mxu1 %v6011_v8  ;;  %v3336_v8 = vld [vmem:[%s9282_s3 + $0x358] sm:$0xff] }
 0x5c7   :  { %5235 = vmatprep.subr.bf16.mxu1 %v6004_v20  ;;  %v3340_v20 = vld [vmem:[%s9282_s3 + $0x378] sm:$0xff] }
 0x5c8   :  { %v6084_v43 = vcombine.high %v3336_v8, %v3340_v20  ;;  %v6083_v61 = vcombine.low %v3336_v8, %v3340_v20  ;;  %v3300_v8 = vld [vmem:[%s9282_s3 + $0x238] sm:$0xff] }
 0x5c9   :  { %5158 = vmatmul.mubr.bf16.gmra.mxu1 %v8674_v50 }
 0x5ca   :  { %5236 = vmatpush1.bf16.msra.mxu1 %v6003_v17  ;;  %5259 = vmatprep.mubr.bf16.mxu1 %v8597_v15  ;;  %v3356_v15 = vld [vmem:[%s9282_s3 + $0x3f8] sm:$0xff] }
 0x5cb   :  { %5237 = vmatprep.subr.bf16.mxu1 %v5996_v40  ;;  %v6100_v48 = vcombine.high %v3352_v0, %v3356_v15  ;;  %v6099_v57 = vcombine.low %v3352_v0, %v3356_v15  ;;  %v3328_v17 = vld [vmem:[%s9282_s3 + $0x318] sm:$0xff] }
 0x5cc   :  { %v3332_v40 = vld [vmem:[%s9282_s3 + $0x338] sm:$0xff] }
 0x5cd   :  { %v6076_v33 = vcombine.high %v3328_v17, %v3332_v40  ;;  %v6075_v49 = vcombine.low %v3328_v17, %v3332_v40 }
 0x5ce   :  { %5238 = vmatpush1.bf16.msra.mxu1 %v5995_v12  ;;  %v3320_v12 = vld [vmem:[%s9282_s3 + $0x2d8] sm:$0xff] }
 0x5cf   :  { %5239 = vmatprep.subr.bf16.mxu1 %v5988_v2  ;;  %v3324_v2 = vld [vmem:[%s9282_s3 + $0x2f8] sm:$0xff] }
 0x5d0   :  { %v6068_v27 = vcombine.high %v3320_v12, %v3324_v2  ;;  %v6067_v0 = vcombine.low %v3320_v12, %v3324_v2 }
 0x5d2   :  { %5240 = vmatpush1.bf16.msra.mxu1 %v5987_v14  ;;  %v3312_v14 = vld [vmem:[%s9282_s3 + $0x298] sm:$0xff] }
 0x5d3   :  { %5241 = vmatprep.subr.bf16.mxu1 %v5980_v51  ;;  %v3316_v51 = vld [vmem:[%s9282_s3 + $0x2b8] sm:$0xff] }
 0x5d4   :  { %v6060_v15 = vcombine.high %v3312_v14, %v3316_v51  ;;  %v6059_v26 = vcombine.low %v3312_v14, %v3316_v51 }
 0x5d6   :  { %5242 = vmatpush1.bf16.msra.mxu1 %v5979_v30  ;;  %v3304_v30 = vld [vmem:[%s9282_s3 + $0x258] sm:$0xff] }
 0x5d7   :  { %5243 = vmatprep.subr.bf16.mxu1 %v6100_v48  ;;  %v3308_v48 = vld [vmem:[%s9282_s3 + $0x278] sm:$0xff] }
 0x5d8   :  { %v6052_v25 = vcombine.high %v3304_v30, %v3308_v48 }
 0x5da   :  { %5244 = vmatpush2.bf16.msra.mxu1 %v6099_v57 }
 0x5db   :  { %5245 = vmatprep.subr.bf16.mxu1 %v6092_v21  ;;  %v3296_v21 = vld [vmem:[%s9282_s3 + $0x218] sm:$0xff] }
 0x5de   :  { %5246 = vmatpush2.bf16.msra.mxu1 %v6091_v5  ;;  %v6051_v5 = vcombine.low %v3304_v30, %v3308_v48 }
 0x5df   :  { %5247 = vmatprep.subr.bf16.mxu1 %v6084_v43  ;;  %v6044_v43 = vcombine.high %v3296_v21, %v3300_v8 }
 0x5e2   :  { %5248 = vmatpush2.bf16.msra.mxu1 %v6083_v61  ;;  %v6043_v61 = vcombine.low %v3296_v21, %v3300_v8 }
 0x5e3   :  { %5249 = vmatprep.subr.bf16.mxu1 %v6076_v33 }
 0x5e6   :  { %5250 = vmatpush2.bf16.msra.mxu1 %v6075_v49 }
 0x5e7   :  { %5251 = vmatprep.subr.bf16.mxu1 %v6068_v27 }
 0x5ea   :  { %5252 = vmatpush2.bf16.msra.mxu1 %v6067_v0 }
 0x5eb   :  { %5253 = vmatprep.subr.bf16.mxu1 %v6060_v15 }
 0x5ec   :  { %v9012_v57 = vpop.f32.mrf.mxu0 }
 0x5ee   :  { %v9020_v20 = vpop.f32.mrf.mxu0  ;;  %5254 = vmatpush2.bf16.msra.mxu1 %v6059_v26 }
 0x5ef   :  { %9361 = vst [vmem:[#allocation6_spill] sm:$0xff] %v9020_v20  ;;  %5255 = vmatprep.subr.bf16.mxu1 %v6052_v25 }
 0x5f0   :  { %v9022_v17 = vpop.f32.mrf.mxu0 }
 0x5f1   :  { %9362 = vst [vmem:[#allocation22_spill] sm:$0xff] %v9022_v17 }
 0x5f2   :  { %v9024_v40 = vpop.f32.mrf.mxu0  ;;  %5256 = vmatpush2.bf16.msra.mxu1 %v6051_v5 }
 0x5f3   :  { %9363 = vst [vmem:[#allocation15_spill] sm:$0xff] %v9024_v40  ;;  %5257 = vmatprep.subr.bf16.mxu1 %v6044_v43 }
 0x5f4   :  { %v9026_v33 = vpop.f32.mrf.mxu0 }
 0x5f5   :  { %9364 = vst [vmem:[#allocation7_spill] sm:$0xff] %v9026_v33 }
 0x5f6   :  { %v9028_v12 = vpop.f32.mrf.mxu0  ;;  %5258 = vmatpush2.bf16.msra.mxu1 %v6043_v61 }
 0x5f7   :  { %9365 = vst [vmem:[#allocation23_spill] sm:$0xff] %v9028_v12  ;;  %v4895_v49 = vpop.f32.mrf.mxu1  ;;  %v9385_v12 = vsub.s32 1, %v7867_v37 }
 0x5f8   :  { %v9030_v2 = vpop.f32.mrf.mxu0 }
 0x5f9   :  { %9366 = vst [vmem:[#allocation16_spill] sm:$0xff] %v9030_v2  ;;  %5260 = vmatmul.mubr.bf16.vlgmr.msra.gmra.mxu1 %v8595_v45  ;;  %v4897_v14 = vpop.f32.mrf.mxu1 }
 0x5fa   :  { %v9033_v27 = vpop.f32.mrf.mxu0  ;;  %5269 = vmatprep.mubr.bf16.mxu1 %v8630_v3 }
 0x5fb   :  { %9367 = vst [vmem:[#allocation8_spill] sm:$0xff] %v9033_v27  ;;  %v4899_v0 = vpop.f32.mrf.mxu1  ;;  %v9096_v27 = vld [vmem:[%s9284_s4] sm:$0xff] }
 0x5fc   :  { %v9036_v51 = vpop.f32.mrf.mxu0  ;;  %v3494_v33 = vrot.slane %v9096_v27, %v9385_v12 }
 0x5fd   :  { %9368 = vst [vmem:[#allocation17_spill] sm:$0xff] %v9036_v51  ;;  %v4901_v30 = vpop.f32.mrf.mxu1 }
 0x5fe   :  { %v9038_v15 = vpop.f32.mrf.mxu0  ;;  %v4898_v40 = vadd.f32 %v4897_v14, %v3494_v33  ;;  %v4902_v17 = vadd.f32 %v4901_v30, %v3494_v33 }
 0x5ff   :  { %9369 = vst [vmem:[#allocation24_spill] sm:$0xff] %v9038_v15  ;;  %v4905_v26 = vpop.f32.mrf.mxu1 }
 0x600   :  { %v5224_v48 = vpop.f32.mrf.mxu0  ;;  %v4963_v12 = vadd.f32 %v8783_v41, %v4902_v17 }
 0x601   :  { %5270 = vmatmul.mubr.bf16.gmra.mxu1 %v8632_v23  ;;  %v4907_v21 = vpop.f32.mrf.mxu1 }
 0x602   :  { %v5225_v25 = vpop.f32.mrf.mxu0  ;;  %5279 = vmatprep.mubr.bf16.mxu1 %v8672_v53 }
 0x603   :  { %v4909_v45 = vpop.f32.mrf.mxu1 }
 0x605   :  { %v4911_v8 = vpop.f32.mrf.mxu1 }
 0x606   :  { %v4912_v14 = vadd.f32 %v4911_v8, %v3494_v33 }
 0x608   :  { %v4973_v17 = vadd.f32 %v8806_v28, %v4912_v14 }
 0x609   :  { %5280 = vmatmul.mubr.bf16.gmra.mxu1 %v8674_v50 }
 0x60c   :  { %v4915_v3 = vpop.f32.mrf.mxu1 }
 0x60e   :  { %v4917_v5 = vpop.f32.mrf.mxu1 }
 0x610   :  { %v4919_v43 = vpop.f32.mrf.mxu1 }
 0x612   :  { %v4920_v61 = vpop.f32.mrf.mxu1 }
 0x62c   :  { %v9043_v11 = vpop.f32.mrf.mxu0 }
 0x62e   :  { %v9045_v19 = vpop.f32.mrf.mxu0 }
 0x62f   :  { %9370 = vst [vmem:[#allocation9_spill] sm:$0xff] %v9045_v19  ;;  %v4908_v19 = vadd.f32 %v4907_v21, %v3494_v33 }
 0x630   :  { %v9047_v48 = vpop.f32.mrf.mxu0 }
 0x631   :  { %9371 = vst [vmem:[#allocation18_spill] sm:$0xff] %v9047_v48 }
 0x632   :  { %v9049_v4 = vpop.f32.mrf.mxu0 }
 0x633   :  { %9372 = vst [vmem:[#allocation10_spill] sm:$0xff] %v9049_v4 }
 0x634   :  { %v9051_v23 = vpop.f32.mrf.mxu0 }
 0x635   :  { %9373 = vst [vmem:[#allocation25_spill] sm:$0xff] %v9051_v23 }
 0x636   :  { %v9053_v53 = vpop.f32.mrf.mxu0 }
 0x637   :  { %9374 = vst [vmem:[#allocation26_spill] sm:$0xff] %v9053_v53 }
 0x638   :  { %v9055_v25 = vpop.f32.mrf.mxu0 }
 0x639   :  { %9375 = vst [vmem:[#allocation27_spill] sm:$0xff] %v9055_v25  ;;  %v9057_v50 = vpop.f32.mrf.mxu1 }
 0x63a   :  { %v9059_v38 = vpop.f32.mrf.mxu0 }
 0x63b   :  { %9376 = vst [vmem:[#allocation28_spill] sm:$0xff] %v9059_v38  ;;  %v9061_v43 = vpop.f32.mrf.mxu1 }
 0x63c   :  { %v9063_v61 = vpop.f32.mrf.mxu0 }
 0x63d   :  { %9377 = vst [vmem:[#allocation29_spill] sm:$0xff] %v9063_v61  ;;  %v9065_v60 = vpop.f32.mrf.mxu1 }
 0x63e   :  { %v9067_v58 = vpop.f32.mrf.mxu0 }
 0x63f   :  { %9378 = vst [vmem:[#allocation30_spill] sm:$0xff] %v9067_v58  ;;  %v9069_v6 = vpop.f32.mrf.mxu1 }
 0x640   :  { %v5346_v36 = vpop.f32.mrf.mxu0 }
 0x641   :  { %v9071_v31 = vpop.f32.mrf.mxu1 }
 0x642   :  { %v5347_v55 = vpop.f32.mrf.mxu0 }
 0x643   :  { %v9073_v44 = vpop.f32.mrf.mxu1 }
 0x645   :  { %v9075_v39 = vpop.f32.mrf.mxu1 }
 0x647   :  { %v9077_v34 = vpop.f32.mrf.mxu1 }
 0x649   :  { %v9079_v42 = vpop.f32.mrf.mxu1 }
 0x64b   :  { %v9081_v24 = vpop.f32.mrf.mxu1 }
 0x64d   :  { %v5041_v15 = vpop.f32.mrf.mxu1 }
 0x64f   :  { %v5042_v22 = vpop.f32.mrf.mxu1 }
 0x650   :  { %v9383_v22 = vsub.s32 0, %v7867_v37 }
 0x652   :  { %v3490_v15 = vrot.slane %v9096_v27, %v9383_v22  ;;  %v4959_v22 = vadd.f32 %v8773_v59, %v4898_v40  ;;  %v4918_v40 = vadd.f32 %v4917_v5, %v3494_v33 }
 0x654   :  { %v4896_v23 = vadd.f32 %v4895_v49, %v3490_v15  ;;  %v6230_v49 = vmul.f32 -1.442695, %v4959_v22 }
 0x679   :  { %v9083_v51 = vpop.f32.mrf.mxu1 }
 0x67b   :  { %v9085_v58 = vpop.f32.mrf.mxu1 }
 0x67d   :  { %v9087_v36 = vpop.f32.mrf.mxu1 }
 0x67f   :  { %v9089_v61 = vpop.f32.mrf.mxu1 }
 0x680   :  { %9379 = vst [vmem:[#allocation31_spill] sm:$0xff] %v9089_v61  ;;  %v4906_v61 = vadd.f32 %v4905_v26, %v3490_v15 }
 0x681   :  { %v9091_v55 = vpop.f32.mrf.mxu1 }
 0x682   :  { %9380 = vst [vmem:[#allocation32_spill] sm:$0xff] %v9091_v55 }
 0x683   :  { %v9098_v38 = vpop.f32.mrf.mxu1 }
 0x684   :  { %9381 = vst [vmem:[#allocation33_spill] sm:$0xff] %v9098_v38  ;;  %v4957_v38 = vadd.f32 %v8763_v63, %v4896_v23  ;;  %v9388_v63 = vsub.s32 2, %v7867_v37 }
 0x685   :  { %v9100_v2 = vpop.f32.mrf.mxu1 }
 0x686   :  { %9382 = vst [vmem:[#allocation34_spill] sm:$0xff] %v9100_v2  ;;  %v4900_v2 = vadd.f32 %v4899_v0, %v3490_v15  ;;  %v9122_v0 = vrot.slane %v9096_v27, %v9388_v63 }
 0x687   :  { %v9105_v25 = vpop.f32.mrf.mxu1 }
 0x688   :  { %9384 = vst [vmem:[#allocation35_spill] sm:$0xff] %v9105_v25  ;;  %v6229_v25 = vmul.f32 -1.442695, %v4957_v38  ;;  %v4961_v20 = vadd.f32 %v8775_v52, %v4900_v2  ;;  %v4969_v38 = vadd.f32 %v8795_v56, %v4908_v19  ;;  %v6232_v52 = vmul.f32 -1.442695, %v4963_v12 }
 0x689   :  { %v9110_v53 = vpop.f32.mrf.mxu1  ;;  %v5018_v19 = vadd.f32 %v9057_v50, %v9122_v0  ;;  %v5028_v50 = vadd.f32 %v9071_v31, %v9122_v0 }
 0x68a   :  { %9386 = vst [vmem:[#allocation36_spill] sm:$0xff] %v9110_v53  ;;  %v4910_v53 = vadd.f32 %v4909_v45, %v3490_v15  ;;  %6474 = vpow2.f32 %v6229_v25  ;;  %v6231_v59 = vmul.f32 -1.442695, %v4961_v20  ;;  %v6234_v21 = vmul.f32 -1.442695, %v4969_v38 }
 0x68b   :  { %v9112_v55 = vpop.f32.mrf.mxu1  ;;  %6476 = vpow2.f32 %v6230_v49  ;;  %v4979_v20 = vadd.f32 %v8818_v18, %v4918_v40  ;;  %v5079_v8 = vadd.f32 %v8890_v9, %v5018_v19  ;;  %v5089_v22 = vadd.f32 %v8910_v46, %v5028_v50 }
 0x68c   :  { %9387 = vst [vmem:[#allocation37_spill] sm:$0xff] %v9112_v55  ;;  %v4967_v55 = vadd.f32 %v8785_v16, %v4906_v61  ;;  %v4971_v2 = vadd.f32 %v8797_v32, %v4910_v53  ;;  %v9389_v16 = vsub.s32 3, %v7867_v37  ;;  %6478 = vpow2.f32 %v6231_v59 }
 0x68d   :  { %v5163_v4 = vpop.f32.mrf.mxu1  ;;  %6480 = vpow2.f32 %v6232_v52  ;;  %v6236_v32 = vmul.f32 -1.442695, %v4973_v17  ;;  %v6238_v45 = vmul.f32 -1.442695, %v4979_v20  ;;  %v6239_v5 = vmul.f32 -1.442695, %v5079_v8 }
 0x68e   :  { %v4916_v4 = vadd.f32 %v4915_v3, %v3490_v15  ;;  %v6233_v41 = vmul.f32 -1.442695, %v4967_v55  ;;  %v9130_v30 = vrot.slane %v9096_v27, %v9389_v16  ;;  %v6235_v56 = vmul.f32 -1.442695, %v4971_v2 }
 0x68f   :  { %v5164_v48 = vpop.f32.mrf.mxu1  ;;  %v6243_v59 = vmul.f32 -1.442695, %v5089_v22 }
 0x690   :  { %v4977_v26 = vadd.f32 %v8809_v7, %v4916_v4  ;;  %6482 = vpow2.f32 %v6233_v41  ;;  %v5020_v28 = vadd.f32 %v9061_v43, %v9130_v30  ;;  %v5022_v7 = vadd.f32 %v9065_v60, %v9122_v0 }
 0x691   :  { %6484 = vpow2.f32 %v6234_v21  ;;  %v5024_v3 = vadd.f32 %v9069_v6, %v9130_v30  ;;  %v5032_v4 = vadd.f32 %v9075_v39, %v9122_v0  ;;  %v5034_v46 = vadd.f32 %v9077_v34, %v9130_v30 }
 0x692   :  { %v6237_v33 = vmul.f32 -1.442695, %v4977_v26  ;;  %6486 = vpow2.f32 %v6235_v56  ;;  %v5081_v18 = vadd.f32 %v8898_v54, %v5020_v28  ;;  %v5083_v23 = vadd.f32 %v8900_v62, %v5022_v7 }
 0x693   :  { %6488 = vpow2.f32 %v6236_v32  ;;  %v5085_v9 = vadd.f32 %v8908_v29, %v5024_v3  ;;  %v5030_v29 = vadd.f32 %v9073_v44, %v9130_v30  ;;  %v5038_v41 = vadd.f32 %v9079_v42, %v9122_v0 }
 0x694   :  { %6490 = vpow2.f32 %v6237_v33  ;;  %v6240_v53 = vmul.f32 -1.442695, %v5081_v18  ;;  %v6241_v54 = vmul.f32 -1.442695, %v5083_v23  ;;  %v5093_v39 = vadd.f32 %v8920_v10, %v5032_v4  ;;  %v9396_v4 = vld [vmem:[#allocation31_spill] sm:$0xff] }
 0x695   :  { %6492 = vpow2.f32 %v6238_v45  ;;  %v6242_v15 = vmul.f32 -1.442695, %v5085_v9  ;;  %v5091_v44 = vadd.f32 %v8918_v47, %v5030_v29  ;;  %v5095_v26 = vadd.f32 %v8929_v35, %v5034_v46 }
 0x696   :  { %6494 = vpow2.f32 %v6239_v5  ;;  %v5040_v34 = vadd.f32 %v9081_v24, %v9130_v30  ;;  %v5099_v47 = vadd.f32 %v8932_v13, %v5038_v41  ;;  %v6245_v42 = vmul.f32 -1.442695, %v5093_v39  ;;  %v9398_v41 = vld [vmem:[#allocation22_spill] sm:$0xff] }
 0x697   :  { %v6475_v48 = vpop.eup %6474  ;;  %6496 = vpow2.f32 %v6240_v53  ;;  %v6244_v19 = vmul.f32 -1.442695, %v5091_v44  ;;  %v6246_v56 = vmul.f32 -1.442695, %v5095_v26  ;;  %v9390_v35 = vsub.s32 4, %v7867_v37 }
 0x698   :  { %v6477_v25 = vpop.eup %6476  ;;  %v5379_v60 = vadd.f32 1.0, %v6475_v48  ;;  %v5101_v10 = vadd.f32 %v8940_v1, %v5040_v34  ;;  %v9391_v30 = vsub.s32 6, %v7867_v37  ;;  %v6247_v33 = vmul.f32 -1.442695, %v5099_v47  ;;  %v9400_v47 = vld [vmem:[#allocation15_spill] sm:$0xff] }
 0x699   :  { %v6479_v43 = vpop.eup %6478  ;;  %v5380_v55 = vadd.f32 1.0, %v6477_v25  ;;  %v9167_v24 = vrot.slane %v9096_v27, %v9390_v35  ;;  %v9392_v45 = vsub.s32 5, %v7867_v37  ;;  %v9393_v18 = vsub.s32 7, %v7867_v37 }
 0x69a   :  { %v6481_v61 = vpop.eup %6480  ;;  %6498 = vrcp.f32 %v5379_v60  ;;  %v5381_v62 = vadd.f32 1.0, %v6479_v43  ;;  %v9172_v28 = vrot.slane %v9096_v27, %v9391_v30  ;;  %v6248_v48 = vmul.f32 -1.442695, %v5101_v10  ;;  %v9402_v10 = vld [vmem:[#allocation33_spill] sm:$0xff] }
 0x69b   :  { %v5382_v49 = vadd.f32 1.0, %v6481_v61  ;;  %6500 = vpow2.f32 %v6241_v54  ;;  %v9177_v8 = vrot.slane %v9096_v27, %v9392_v45  ;;  %v9182_v3 = vrot.slane %v9096_v27, %v9393_v18  ;;  %v9403_v18 = vld [vmem:[#allocation34_spill] sm:$0xff] }
 0x69c   :  { %6502 = vrcp.f32 %v5380_v55  ;;  %v5140_v25 = vadd.f32 %v9083_v51, %v9167_v24  ;;  %v5144_v51 = vadd.f32 %v9087_v36, %v9167_v24 }
 0x69d   :  { %v6483_v6 = vpop.eup %6482  ;;  %6504 = vpow2.f32 %v6242_v15  ;;  %v5142_v37 = vadd.f32 %v9085_v58, %v9177_v8 }
 0x69e   :  { %v6485_v12 = vpop.eup %6484  ;;  %v5383_v14 = vadd.f32 1.0, %v6483_v6  ;;  %6506 = vrcp.f32 %v5381_v62  ;;  %v5201_v62 = vadd.f32 %v9012_v57, %v5140_v25 }
 0x69f   :  { %v6487_v31 = vpop.eup %6486  ;;  %v5384_v40 = vadd.f32 1.0, %v6485_v12  ;;  %6508 = vrcp.f32 %v5382_v49  ;;  %v9394_v49 = vld [vmem:[#allocation9_spill] sm:$0xff] }
 0x6a0   :  { %v6489_v63 = vpop.eup %6488  ;;  %v5385_v2 = vadd.f32 1.0, %v6487_v31  ;;  %6510 = vrcp.f32 %v5383_v14 }
 0x6a1   :  { %v6491_v38 = vpop.eup %6490  ;;  %v5386_v17 = vadd.f32 1.0, %v6489_v63  ;;  %6512 = vpow2.f32 %v6243_v59  ;;  %v5146_v63 = vadd.f32 %v9396_v4, %v9177_v8 }
 0x6a2   :  { %v6493_v52 = vpop.eup %6492  ;;  %v5387_v16 = vadd.f32 1.0, %v6491_v38  ;;  %6514 = vrcp.f32 %v5384_v40  ;;  %v9397_v40 = vld [vmem:[#allocation18_spill] sm:$0xff] }
 0x6a3   :  { %v5388_v21 = vadd.f32 1.0, %v6493_v52  ;;  %v6495_v20 = vpop.eup %6494  ;;  %6516 = vrcp.f32 %v5385_v2 }
 0x6a4   :  { %6518 = vrcp.f32 %v5386_v17  ;;  %v6497_v0 = vpop.eup %6496  ;;  %v5439_v32 = vadd.f32 1.0, %v6495_v20  ;;  %v5205_v17 = vadd.f32 %v9398_v41, %v5144_v51  ;;  %v9408_v51 = vld [vmem:[#allocation35_spill] sm:$0xff]  ;;  %v9412_v41 = vld [vmem:[#allocation28_spill] sm:$0xff] }
 0x6a5   :  { %6520 = vrcp.f32 %v5387_v16  ;;  %v5440_v7 = vadd.f32 1.0, %v6497_v0  ;;  %v9401_v0 = vld [vmem:[#allocation32_spill] sm:$0xff] }
 0x6a6   :  { %6522 = vrcp.f32 %v5388_v21  ;;  %v9399_v21 = vld [vmem:[#allocation10_spill] sm:$0xff] }
 0x6a7   :  { %v6499_v13 = vpop.eup %6498  ;;  %6524 = vpow2.f32 %v6244_v19 }
 0x6a8   :  { %v6501_v1 = vpop.eup %6500  ;;  %6526 = vpow2.f32 %v6245_v42  ;;  %v5207_v42 = vadd.f32 %v9400_v47, %v5146_v63  ;;  %v9410_v63 = vld [vmem:[#allocation16_spill] sm:$0xff] }
 0x6a9   :  { %v6503_v5 = vpop.eup %6502  ;;  %6528 = vpow2.f32 %v6246_v56  ;;  %v5441_v60 = vadd.f32 1.0, %v6501_v1  ;;  %v5150_v56 = vadd.f32 %v9401_v0, %v9167_v24  ;;  %v9414_v0 = vld [vmem:[#allocation29_spill] sm:$0xff] }
 0x6aa   :  { %v6505_v53 = vpop.eup %6504  ;;  %6530 = vrcp.f32 %v5439_v32  ;;  %v5152_v32 = vadd.f32 %v9402_v10, %v9177_v8  ;;  %v9415_v10 = vld [vmem:[#allocation37_spill] sm:$0xff] }
 0x6ab   :  { %v6507_v50 = vpop.eup %6506  ;;  %6532 = vpow2.f32 %v6247_v33  ;;  %v5442_v6 = vadd.f32 1.0, %v6505_v53 }
 0x6ac   :  { %v6509_v27 = vpop.eup %6508  ;;  %6534 = vrcp.f32 %v5440_v7 }
 0x6ad   :  { %v6511_v55 = vpop.eup %6510  ;;  %6536 = vpow2.f32 %v6248_v48  ;;  %v9404_v48 = vld [vmem:[#allocation25_spill] sm:$0xff] }
 0x6ae   :  { %v6513_v22 = vpop.eup %6512  ;;  %6538 = vrcp.f32 %v5441_v60 }
 0x6af   :  { %v6515_v31 = vpop.eup %6514  ;;  %6540 = vrcp.f32 %v5442_v6  ;;  %v5443_v44 = vadd.f32 1.0, %v6513_v22 }
 0x6b0   :  { %v6517_v46 = vpop.eup %6516 }
 0x6b1   :  { %v6519_v2 = vpop.eup %6518 }
 0x6b2   :  { %v9202_v16 = vpop.eup %6520 }
 0x6b3   :  { %v9205_v19 = vpop.eup %6522 }
 0x6b9   :  { %v5261_v23 = vpop.f32.mrf.mxu1 }
 0x6ba   :  { %v5262_v9 = vadd.f32 %v5261_v23, %v9172_v28 }
 0x6bb   :  { %v5263_v43 = vpop.f32.mrf.mxu1 }
 0x6bc   :  { %v5323_v54 = vadd.f32 %v9043_v11, %v5262_v9  ;;  %v5264_v61 = vadd.f32 %v5263_v43, %v9182_v3  ;;  %v9395_v11 = vld [vmem:[#allocation6_spill] sm:$0xff] }
 0x6bd   :  { %v5265_v15 = vpop.f32.mrf.mxu1  ;;  %v5203_v14 = vadd.f32 %v9395_v11, %v5142_v37 }
 0x6be   :  { %v5469_v12 = vmul.f32 %v6499_v13, %v5323_v54  ;;  %v5325_v58 = vadd.f32 %v9394_v49, %v5264_v61  ;;  %v5266_v29 = vadd.f32 %v5265_v15, %v9172_v28  ;;  %v6525_v13 = vpop.eup %6524  ;;  %v9406_v54 = vld [vmem:[#allocation7_spill] sm:$0xff]  ;;  %v5156_v15 = vadd.f32 %v9408_v51, %v9177_v8 }
 0x6bf   :  { %v5267_v59 = vpop.f32.mrf.mxu1  ;;  %v6527_v7 = vpop.eup %6526  ;;  %v9407_v61 = vld [vmem:[#allocation23_spill] sm:$0xff]  ;;  %v5444_v4 = vadd.f32 1.0, %v6525_v13 }
 0x6c0   :  { %v5479_v38 = vadd.f32 %v5469_v12, %v5201_v62  ;;  %v5470_v36 = vmul.f32 %v6503_v5, %v5325_v58  ;;  %v5327_v52 = vadd.f32 %v9397_v40, %v5266_v29  ;;  %v5268_v57 = vadd.f32 %v5267_v59, %v9182_v3  ;;  %v6529_v25 = vpop.eup %6528  ;;  %v9409_v58 = vld [vmem:[#allocation27_spill] sm:$0xff] }
 0x6c1   :  { %v5271_v39 = vpop.f32.mrf.mxu1  ;;  %v5154_v5 = vadd.f32 %v9403_v18, %v9167_v24  ;;  %v6531_v43 = vpop.eup %6530  ;;  %v5213_v6 = vadd.f32 %v9407_v61, %v5152_v32 }
 0x6c2   :  { %6542 = vtanh.f32 %v5479_v38  ;;  %v5480_v26 = vadd.f32 %v5470_v36, %v5203_v14  ;;  %v5471_v34 = vmul.f32 %v6507_v50, %v5327_v52  ;;  %v5329_v20 = vadd.f32 %v9399_v21, %v5268_v57  ;;  %v9405_v50 = vld [vmem:[#allocation26_spill] sm:$0xff]  ;;  %v6533_v12 = vpop.eup %6532  ;;  %v9411_v38 = vld [vmem:[#allocation36_spill] sm:$0xff] }
 0x6c3   :  { %v5272_v35 = vadd.f32 %v5271_v39, %v9172_v28  ;;  %v5273_v30 = vpop.f32.mrf.mxu1  ;;  %v6535_v14 = vpop.eup %6534  ;;  %v5215_v59 = vadd.f32 %v9410_v63, %v5154_v5  ;;  %v5160_v36 = vadd.f32 %v9411_v38, %v9167_v24  ;;  %v5445_v39 = vadd.f32 1.0, %v6527_v7 }
 0x6c4   :  { %6544 = vtanh.f32 %v5480_v26  ;;  %v5481_v33 = vadd.f32 %v5471_v34, %v5205_v17  ;;  %v5472_v45 = vmul.f32 %v6509_v27, %v5329_v20  ;;  %v5274_v1 = vadd.f32 %v5273_v30, %v9182_v3  ;;  %v6537_v57 = vpop.eup %6536  ;;  %v9413_v26 = vld [vmem:[#allocation8_spill] sm:$0xff]  ;;  %v9416_v30 = vld [vmem:[#allocation17_spill] sm:$0xff] }
 0x6c5   :  { %6546 = vrcp.f32 %v5443_v44  ;;  %v5333_v23 = vadd.f32 %v9404_v48, %v5272_v35  ;;  %v5275_v53 = vpop.f32.mrf.mxu1  ;;  %v5211_v27 = vadd.f32 %v9406_v54, %v5150_v56  ;;  %v5217_v34 = vadd.f32 %v9413_v26, %v5156_v15  ;;  %v6539_v20 = vpop.eup %6538  ;;  %v9418_v48 = vld [vmem:[#allocation11_spill] sm:$0xff]  ;;  %v9421_v15 = vld [vmem:[#allocation12_spill] sm:$0xff] }
 0x6c6   :  { %6548 = vtanh.f32 %v5481_v33  ;;  %v5482_v9 = vadd.f32 %v5472_v45, %v5207_v42  ;;  %v5335_v60 = vadd.f32 %v9405_v50, %v5274_v1  ;;  %v5276_v37 = vadd.f32 %v5275_v53, %v9172_v28 }
 0x6c7   :  { %v5473_v22 = vmul.f32 %v6511_v55, %v5333_v23  ;;  %v5277_v62 = vpop.f32.mrf.mxu1  ;;  %v5446_v56 = vadd.f32 1.0, %v6529_v25  ;;  %v5221_v13 = vadd.f32 %v9416_v30, %v5160_v36  ;;  %v5447_v5 = vadd.f32 1.0, %v6533_v12  ;;  %v9424_v36 = vld [vmem:[#allocation20_spill] sm:$0xff]  ;;  %v9428_v30 = vld [vmem:[#allocation5_spill] sm:$0xff] }
 0x6c8   :  { %6550 = vtanh.f32 %v5482_v9  ;;  %v5474_v49 = vmul.f32 %v6515_v31, %v5335_v60  ;;  %v5337_v29 = vadd.f32 %v9409_v58, %v5276_v37  ;;  %v5278_v11 = vadd.f32 %v5277_v62, %v9182_v3  ;;  %v9420_v37 = vld [vmem:[#allocation3_spill] sm:$0xff] }
 0x6c9   :  { %v5483_v40 = vadd.f32 %v5473_v22, %v5211_v27  ;;  %v5281_v52 = vpop.f32.mrf.mxu1  ;;  %v5448_v27 = vadd.f32 1.0, %v6537_v57 }
 0x6ca   :  { %v5484_v44 = vadd.f32 %v5474_v49, %v5213_v6  ;;  %v5475_v55 = vmul.f32 %v6517_v46, %v5337_v29  ;;  %v5339_v17 = vadd.f32 %v9412_v41, %v5278_v11  ;;  %v5282_v31 = vadd.f32 %v5281_v52, %v9172_v28  ;;  %v6541_v28 = vpop.eup %6540  ;;  %v9425_v41 = vld [vmem:[#allocation21_spill] sm:$0xff] }
 0x6cb   :  { %6552 = vtanh.f32 %v5483_v40  ;;  %v5283_v21 = vpop.f32.mrf.mxu1  ;;  %v5162_v46 = vadd.f32 %v9415_v10, %v9177_v8 }
 0x6cc   :  { %6554 = vtanh.f32 %v5484_v44  ;;  %v5485_v47 = vadd.f32 %v5475_v55, %v5215_v59  ;;  %v5476_v42 = vmul.f32 %v6519_v2, %v5339_v17  ;;  %v5343_v24 = vadd.f32 %v9414_v0, %v5282_v31  ;;  %v9417_v2 = vld [vmem:[#allocation30_spill] sm:$0xff] }
 0x6cd   :  { %6556 = vrcp.f32 %v5444_v4  ;;  %v5284_v32 = vadd.f32 %v5283_v21, %v9182_v3  ;;  %v5285_v35 = vpop.f32.mrf.mxu1  ;;  %v9419_v3 = vld [vmem:[#allocation24_spill] sm:$0xff]  ;;  %v9423_v4 = vld [vmem:[#allocation19_spill] sm:$0xff] }
 0x6ce   :  { %6558 = vtanh.f32 %v5485_v47  ;;  %v5486_v33 = vadd.f32 %v5476_v42, %v5217_v34  ;;  %v5477_v45 = vmul.f32 %v9202_v16, %v5343_v24  ;;  %v5223_v25 = vadd.f32 %v9419_v3, %v5162_v46 }
 0x6cf   :  { %v6543_v1 = vpop.eup %6542  ;;  %6560 = vrcp.f32 %v5445_v39  ;;  %v5345_v7 = vadd.f32 %v9417_v2, %v5284_v32  ;;  %v5286_v18 = vpop.f32.mrf.mxu1 }
 0x6d0   :  { %v5499_v23 = vsub.f32 %v9418_v48, %v6543_v1  ;;  %6562 = vtanh.f32 %v5486_v33  ;;  %v5487_v8 = vadd.f32 %v5477_v45, %v5221_v13 }
 0x6d1   :  { %v6545_v53 = vpop.eup %6544  ;;  %6564 = vrcp.f32 %v5446_v56  ;;  %v5478_v9 = vmul.f32 %v9205_v19, %v5345_v7  ;;  %v9427_v56 = vld [vmem:[#allocation14_spill] sm:$0xff] }
 0x6d2   :  { %v6547_v50 = vpop.eup %6546  ;;  %v5509_v60 = vmul.f32 %v6531_v43, %v5499_v23  ;;  %v5500_v16 = vsub.f32 %v9420_v37, %v6545_v53  ;;  %6566 = vtanh.f32 %v5487_v8  ;;  %v9422_v43 = vld [vmem:[#allocation4_spill] sm:$0xff] }
 0x6d3   :  { %v6549_v54 = vpop.eup %6548  ;;  %v5488_v61 = vadd.f32 %v5478_v9, %v5223_v25  ;;  %6568 = vrcp.f32 %v5447_v5 }
 0x6d4   :  { %v5519_v6 = vadd.f32 %v6543_v1, %v5509_v60  ;;  %v5510_v51 = vmul.f32 %v6535_v14, %v5500_v16  ;;  %v5501_v22 = vsub.f32 %v9421_v15, %v6549_v54 }
 0x6d5   :  { %v6551_v62 = vpop.eup %6550  ;;  %6570 = vtanh.f32 %v5488_v61 }
 0x6d6   :  { %5529 = vst [vmem:[%s9285_s5] sm:$0xff] %v5519_v6  ;;  %v5520_v19 = vadd.f32 %v6545_v53, %v5510_v51  ;;  %v5511_v12 = vmul.f32 %v6539_v20, %v5501_v22  ;;  %v5502_v49 = vsub.f32 %v9422_v43, %v6551_v62  ;;  %6572 = vrcp.f32 %v5448_v27  ;;  %v9426_v20 = vld [vmem:[#allocation13_spill] sm:$0xff] }
 0x6d8   :  { %v6553_v58 = vpop.eup %6552  ;;  %5530 = vst [vmem:[%s9285_s5 + $0x8] sm:$0xff] %v5520_v19  ;;  %v5521_v29 = vadd.f32 %v6549_v54, %v5511_v12  ;;  %v5512_v11 = vmul.f32 %v6541_v28, %v5502_v49 }
 0x6d9   :  { %v6555_v14 = vpop.eup %6554  ;;  %v5503_v63 = vsub.f32 %v9423_v4, %v6553_v58 }
 0x6da   :  { %v6557_v59 = vpop.eup %6556  ;;  %5531 = vst [vmem:[%s9285_s5 + $0x10] sm:$0xff] %v5521_v29  ;;  %v5522_v38 = vadd.f32 %v6551_v62, %v5512_v11  ;;  %v5504_v40 = vsub.f32 %v9424_v36, %v6555_v14 }
 0x6db   :  { %v6559_v52 = vpop.eup %6558  ;;  %v5513_v57 = vmul.f32 %v6547_v50, %v5503_v63 }
 0x6dc   :  { %v6561_v44 = vpop.eup %6560  ;;  %5532 = vst [vmem:[%s9285_s5 + $0x18] sm:$0xff] %v5522_v38  ;;  %v5514_v55 = vmul.f32 %v6557_v59, %v5504_v40  ;;  %v5505_v17 = vsub.f32 %v9425_v41, %v6559_v52 }
 0x6dd   :  { %v6563_v31 = vpop.eup %6562  ;;  %v5523_v39 = vadd.f32 %v6553_v58, %v5513_v57 }
 0x6de   :  { %v6565_v26 = vpop.eup %6564  ;;  %v5524_v34 = vadd.f32 %v6555_v14, %v5514_v55  ;;  %v5515_v21 = vmul.f32 %v6561_v44, %v5505_v17  ;;  %v5506_v47 = vsub.f32 %v9426_v20, %v6563_v31 }
 0x6df   :  { %v6567_v42 = vpop.eup %6566  ;;  %5533 = vst [vmem:[%s9285_s5 + $0x20] sm:$0xff] %v5523_v39 }
 0x6e0   :  { %5534 = vst [vmem:[%s9285_s5 + $0x28] sm:$0xff] %v5524_v34  ;;  %v5525_v0 = vadd.f32 %v6559_v52, %v5515_v21  ;;  %v5516_v24 = vmul.f32 %v6565_v26, %v5506_v47  ;;  %v5507_v10 = vsub.f32 %v9427_v56, %v6567_v42  ;;  %v6569_v46 = vpop.eup %6568 }
 0x6e2   :  { %v6571_v32 = vpop.eup %6570  ;;  %5535 = vst [vmem:[%s9285_s5 + $0x30] sm:$0xff] %v5525_v0  ;;  %v5526_v35 = vadd.f32 %v6563_v31, %v5516_v24  ;;  %v5517_v28 = vmul.f32 %v6569_v46, %v5507_v10 }
 0x6e3   :  { %v5508_v13 = vsub.f32 %v9428_v30, %v6571_v32  ;;  %v6573_v33 = vpop.eup %6572 }
 0x6e4   :  { %5536 = vst [vmem:[%s9285_s5 + $0x38] sm:$0xff] %v5526_v35  ;;  %v5527_v45 = vadd.f32 %v6567_v42, %v5517_v28 }
 0x6e5   :  { %v5518_v1 = vmul.f32 %v6573_v33, %v5508_v13 }
 0x6e6   :  { %5537 = vst [vmem:[%s9285_s5 + $0x40] sm:$0x3f] %v5527_v45 }
 0x6e7   :  { %v5528_v2 = vadd.f32 %v6571_v32, %v5518_v1 }
 0x6e9   :  { %5538 = vst [vmem:[%s9285_s5 + $0x48] sm:$0x3f] %v5528_v2 }

</bundles_post_ra>
